<compile_context>
chip_gen: v7x
topology: tpu7x:2x2x1
jax: 0.10.0
libtpu: 0.0.40
codegen_flags: <defaults>
</compile_context>

<pallas_src>
import jax
import jax.numpy as jnp
from jax import lax
from jax.experimental import pallas as pl
from jax.experimental.pallas import tpu as pltpu


def cnn_lstm_kernel(
    x_ref,        # (Bblk, L*C)    lane-dense input block
    wih_ref,      # (C, 4H)        weight_ih.T, gate-permuted [i,f,o,g]
    whh_ref,      # (H, 4H)        weight_hh.T, gate-permuted [i,f,o,g]
    bg_ref,       # (1, 4H)        bias_ih + bias_hh, gate-permuted
    whelpB_ref,   # (L*H, L*C)     block-diagonal help.weight.T
    bhelpL_ref,   # (1, L*C)       tiled help bias
    woutT_ref,    # (L*C, NCp)     out.weight.T, lane-padded
    bout_ref,     # (1, NCp)
    out_ref,      # (Bblk, NCp)
    hall_ref,     # scratch (Bblk, L*H)   hidden states, lane-dense
):
    Bblk, LC = x_ref.shape
    C, H4 = wih_ref.shape
    H = whh_ref.shape[0]
    L = LC // C

    wih = wih_ref[...]
    whh = whh_ref[...]
    bg = bg_ref[...]

    h = jnp.zeros((Bblk, H), jnp.float32)
    c = jnp.zeros((Bblk, H), jnp.float32)

    # Group hidden-state stores into 128-lane-aligned slabs when possible.
    group = (128 // H) if (H <= 128 and 128 % H == 0) else 1
    pending = []

    # Fully unrolled recurrence: t is a Python int, so every x / gate / hall
    # slice below is static.
    for t in range(L):
        x_t = x_ref[:, t * C:(t + 1) * C]                              # (Bblk, C)
        gates = (jnp.dot(x_t, wih, preferred_element_type=jnp.float32)
                 + jnp.dot(h, whh, preferred_element_type=jnp.float32)
                 + bg)                                                 # (Bblk, 4H) [i,f,o,g]
        ifo = jax.nn.sigmoid(gates[:, :3 * H])
        g_g = jnp.tanh(gates[:, 3 * H:])
        i_g = ifo[:, 0 * H:1 * H]
        f_g = ifo[:, 1 * H:2 * H]
        o_g = ifo[:, 2 * H:3 * H]
        c = f_g * c + i_g * g_g
        h = o_g * jnp.tanh(c)

        pending.append(h)
        if len(pending) == group or t == L - 1:
            base = (t + 1 - len(pending)) * H
            slab = pending[0] if len(pending) == 1 else jnp.concatenate(
                pending, axis=-1)
            hall_ref[:, base:base + len(pending) * H] = slab
            pending = []

    # ---- Dense epilogue: help linear + sigmoid, gating, output linear. ----
    x = x_ref[...]                                                     # (Bblk, L*C)
    hall = hall_ref[...]                                               # (Bblk, L*H)
    feat = jax.nn.sigmoid(
        jnp.dot(hall, whelpB_ref[...], preferred_element_type=jnp.float32)
        + bhelpL_ref[...])                                             # (Bblk, L*C)
    focus = feat * x                                                   # (Bblk, L*C)
    out_ref[...] = (jnp.dot(focus, woutT_ref[...],
                            preferred_element_type=jnp.float32)
                    + bout_ref[...])


def _pick_batch_block(B, batch_block=None):
    """Per-generation batch block: grid=1 on single-TC chips, >=2 blocks on v7x."""
    if batch_block is not None:
        return max(8, ((int(batch_block) + 7) // 8) * 8)
    try:
        kind = jax.devices()[0].device_kind.lower()
    except Exception:  # pragma: no cover - defensive
        kind = ""
    dual_tc = ("v7" in kind) or ("7x" in kind)
    if dual_tc:
        # Two TensorCores + only 64 MiB VMEM: split the batch across >=2 blocks.
        cap = 128
        target = ((((B + 1) // 2) + 7) // 8) * 8
    else:
        # Single TensorCore: the grid is a serial loop -> one fat block.
        cap = 256
        target = ((B + 7) // 8) * 8
    return int(max(8, min(cap, target)))


def cnn_lstm_forward(x, wc, bc, wih, whh, bih, bhh, whelp, bhelp, wout, bout,
                     *, batch_block=None):
    """x: (B, C, L) float32. Returns (B, num_classes).

    The torch module's `convolved = elu(conv(x)).flatten(1)` is dead code
    (never used in the returned output), so the conv parameters are ignored.
    """
    del wc, bc  # dead code in the torch forward
    B, C, L = x.shape
    H = whh.shape[1]
    H4 = 4 * H
    NC = wout.shape[0]
    LC = L * C
    LH = L * H

    Bblk = _pick_batch_block(B, batch_block)
    Bp = ((B + Bblk - 1) // Bblk) * Bblk
    NCp = ((NC + 127) // 128) * 128

    f32 = jnp.float32

    # --- Layout plumbing (plain XLA glue; no kernel compute hoisted). ---
    # Lane-dense input: x_dense[b, l*C + c] = x[b, c, l].
    x_dense = jnp.transpose(x.astype(f32), (0, 2, 1)).reshape(B, LC)
    if Bp != B:
        x_dense = jnp.pad(x_dense, ((0, Bp - B), (0, 0)))

    # Gate reorder [i, f, g, o] -> [i, f, o, g] (contiguous sigmoid / tanh slices).
    perm = jnp.concatenate([jnp.arange(0, H), jnp.arange(H, 2 * H),
                            jnp.arange(3 * H, 4 * H), jnp.arange(2 * H, 3 * H)])
    wih_t = wih[perm].astype(f32).T                    # (C, 4H)
    whh_t = whh[perm].astype(f32).T                    # (H, 4H)
    bg = (bih + bhh)[perm].astype(f32).reshape(1, H4)  # (1, 4H)

    # Block-diagonal help weight so the help linear is one K = L*H matmul
    # producing the lane-dense (Bblk, L*C) feature slab directly.
    eye_l = jnp.eye(L, dtype=f32)
    whelp_big = jnp.kron(eye_l, whelp.astype(f32).T)           # (L*H, L*C)
    bhelp_tiled = jnp.tile(bhelp.astype(f32), L).reshape(1, LC)

    # Output linear operates directly on the lane-dense focus slab.
    wout_t = jnp.pad(wout.astype(f32).T, ((0, 0), (0, NCp - NC)))   # (L*C, NCp)
    bout_p = jnp.pad(bout.astype(f32).reshape(1, NC),
                     ((0, 0), (0, NCp - NC)))                       # (1, NCp)

    const = lambda shape: pl.BlockSpec(shape, lambda i, _s=shape: (0,) * len(_s))

    out = pl.pallas_call(
        cnn_lstm_kernel,
        out_shape=jax.ShapeDtypeStruct((Bp, NCp), f32),
        grid=(Bp // Bblk,),
        in_specs=[
            pl.BlockSpec((Bblk, LC), lambda i: (i, 0)),   # x, lane-dense
            const((C, H4)),                               # W_ih^T (permuted)
            const((H, H4)),                               # W_hh^T (permuted)
            const((1, H4)),                               # b_ih + b_hh (permuted)
            const((LH, LC)),                              # block-diag W_help^T
            const((1, LC)),                               # tiled b_help
            const((LC, NCp)),                             # W_out^T (padded)
            const((1, NCp)),                              # b_out (padded)
        ],
        out_specs=pl.BlockSpec((Bblk, NCp), lambda i: (i, 0)),
        scratch_shapes=[
            pltpu.VMEM((Bblk, LH), f32),                  # lane-dense hidden states
        ],
        compiler_params=pltpu.CompilerParams(
            dimension_semantics=("parallel",)),
    )(x_dense, wih_t, whh_t, bg, whelp_big, bhelp_tiled, wout_t, bout_p)

    return out[:B, :NC]


def reference_forward(x, wc, bc, wih, whh, bih, bhh, whelp, bhelp, wout, bout):
    """Pure-JAX reference matching the PyTorch forward."""
    del wc, bc
    B, C, L = x.shape
    H = whh.shape[1]
    xT = jnp.transpose(x, (0, 2, 1))                       # (B, L, C)

    def cell(carry, x_t):
        h, c = carry
        gates = x_t @ wih.T + h @ whh.T + bih + bhh
        i, f, g, o = jnp.split(gates, 4, axis=-1)
        i, f, o = jax.nn.sigmoid(i), jax.nn.sigmoid(f), jax.nn.sigmoid(o)
        g = jnp.tanh(g)
        c = f * c + i * g
        h = o * jnp.tanh(c)
        return (h, c), h

    h0 = jnp.zeros((B, H), jnp.float32)
    c0 = jnp.zeros((B, H), jnp.float32)
    _, hs = lax.scan(cell, (h0, c0), jnp.transpose(xT, (1, 0, 2)))
    hs = jnp.transpose(hs, (1, 0, 2))                      # (B, L, H)
    features = jax.nn.sigmoid(hs @ whelp.T + bhelp)        # (B, L, C)
    focus = features * xT
    return focus.reshape(B, -1) @ wout.T + bout            # (B, NC)


if __name__ == "__main__":
    B, C, L = 16, 4, 32           # batch, DNA alphabet size, sequence length
    H, F, K, NC = 32, 1, 26, 3    # hidden, num_filters, kernel_size, num_classes

    key = jax.random.PRNGKey(0)
    ks = jax.random.split(key, 11)
    x = jax.random.normal(ks[0], (B, C, L), jnp.float32)
    wc = jax.random.normal(ks[1], (F, C, K), jnp.float32) * 0.1
    bc = jax.random.normal(ks[2], (F,), jnp.float32) * 0.1
    wih = jax.random.normal(ks[3], (4 * H, C), jnp.float32) * 0.1
    whh = jax.random.normal(ks[4], (4 * H, H), jnp.float32) * 0.1
    bih = jax.random.normal(ks[5], (4 * H,), jnp.float32) * 0.1
    bhh = jax.random.normal(ks[6], (4 * H,), jnp.float32) * 0.1
    whelp = jax.random.normal(ks[7], (C, H), jnp.float32) * 0.1
    bhelp = jax.random.normal(ks[8], (C,), jnp.float32) * 0.1
    wout = jax.random.normal(ks[9], (NC, L * C), jnp.float32) * 0.1
    bout = jax.random.normal(ks[10], (NC,), jnp.float32) * 0.1

    ref = reference_forward(x, wc, bc, wih, whh, bih, bhh, whelp, bhelp, wout, bout)

    # Full batch, per-generation auto block (grid=1 on v5e/v6e, 2 blocks on v7x).
    out = cnn_lstm_forward(x, wc, bc, wih, whh, bih, bhh, whelp, bhelp, wout, bout)
    out = jax.block_until_ready(out)
    assert out.shape == (B, NC)
    assert jnp.allclose(out, ref, rtol=2e-3, atol=2e-3), (out, ref)

    # Explicit 8-row blocks -> exercises the multi-step (grid=2) path everywhere.
    out2 = cnn_lstm_forward(x, wc, bc, wih, whh, bih, bhh, whelp, bhelp,
                            wout, bout, batch_block=8)
    out2 = jax.block_until_ready(out2)
    assert out2.shape == (B, NC)
    assert jnp.allclose(out2, ref, rtol=2e-3, atol=2e-3), (out2, ref)

    # Ragged batch (B=3 -> padded to one block of 8 rows).
    out3 = cnn_lstm_forward(x[:3], wc, bc, wih, whh, bih, bhh, whelp, bhelp,
                            wout, bout)
    out3 = jax.block_until_ready(out3)
    assert out3.shape == (3, NC)
    assert jnp.allclose(out3, ref[:3], rtol=2e-3, atol=2e-3), (out3, ref[:3])

    print("KERNEL_OK")
</pallas_src>

<mosaic_0001>
module attributes {stable_mosaic.version = 11 : i64} {
  func.func @cnn_lstm_kernel(%arg0: i32, %arg1: memref<16x128xf32, #tpu.memory_space<vmem>>, %arg2: memref<4x128xf32, #tpu.memory_space<vmem>>, %arg3: memref<32x128xf32, #tpu.memory_space<vmem>>, %arg4: memref<1x128xf32, #tpu.memory_space<vmem>>, %arg5: memref<1024x128xf32, #tpu.memory_space<vmem>>, %arg6: memref<1x128xf32, #tpu.memory_space<vmem>>, %arg7: memref<128x128xf32, #tpu.memory_space<vmem>>, %arg8: memref<1x128xf32, #tpu.memory_space<vmem>>, %arg9: memref<16x128xf32, #tpu.memory_space<vmem>>, %arg10: memref<16x1024xf32, #tpu.memory_space<vmem>>) attributes {dimension_semantics = [#tpu.dimension_semantics<parallel>], iteration_bounds = array<i64: 1>, scalar_prefetch = 0 : i64, scratch_operands = 1 : i64, tpu.core_type = #tpu.core_type<tc>, window_params = [{transform_indices = @transform_0, window_bounds = array<i64: 16, 128>}, {pipeline_mode = #tpu.pipeline_mode<synchronous>, transform_indices = @transform_1, window_bounds = array<i64: 4, 128>}, {pipeline_mode = #tpu.pipeline_mode<synchronous>, transform_indices = @transform_2, window_bounds = array<i64: 32, 128>}, {pipeline_mode = #tpu.pipeline_mode<synchronous>, transform_indices = @transform_3, window_bounds = array<i64: 1, 128>}, {pipeline_mode = #tpu.pipeline_mode<synchronous>, transform_indices = @transform_4, window_bounds = array<i64: 1024, 128>}, {pipeline_mode = #tpu.pipeline_mode<synchronous>, transform_indices = @transform_5, window_bounds = array<i64: 1, 128>}, {pipeline_mode = #tpu.pipeline_mode<synchronous>, transform_indices = @transform_6, window_bounds = array<i64: 128, 128>}, {pipeline_mode = #tpu.pipeline_mode<synchronous>, transform_indices = @transform_7, window_bounds = array<i64: 1, 128>}, {transform_indices = @transform_8, window_bounds = array<i64: 16, 128>}]} {
    %c0 = arith.constant 0 : index
    %c0_0 = arith.constant 0 : index
    %0 = vector.load %arg2[%c0, %c0_0] : memref<4x128xf32, #tpu.memory_space<vmem>>, vector<4x128xf32>
    %c0_1 = arith.constant 0 : index
    %c0_2 = arith.constant 0 : index
    %1 = vector.load %arg3[%c0_1, %c0_2] : memref<32x128xf32, #tpu.memory_space<vmem>>, vector<32x128xf32>
    %c0_3 = arith.constant 0 : index
    %c0_4 = arith.constant 0 : index
    %2 = vector.load %arg4[%c0_3, %c0_4] : memref<1x128xf32, #tpu.memory_space<vmem>>, vector<1x128xf32>
    %cst = arith.constant 0.000000e+00 : f32
    %3 = vector.broadcast %cst : f32 to vector<16x32xf32>
    %cst_5 = arith.constant 0.000000e+00 : f32
    %4 = vector.broadcast %cst_5 : f32 to vector<16x32xf32>
    %c0_6 = arith.constant 0 : index
    %c0_7 = arith.constant 0 : index
    %5 = vector.load %arg1[%c0_6, %c0_7] : memref<16x128xf32, #tpu.memory_space<vmem>>, vector<16x4xf32>
    %cst_8 = arith.constant dense<0.000000e+00> : vector<16x128xf32>
    %6 = tpu.matmul %5, %0, %cst_8 {dimension_numbers = #tpu.dot_dimension_numbers<[1], [0], [0], [1], [0, 0, 1, 1], [], []>} : vector<16x4xf32>, vector<4x128xf32>, vector<16x128xf32> -> vector<16x128xf32>
    %cst_9 = arith.constant dense<0.000000e+00> : vector<16x128xf32>
    %7 = tpu.matmul %3, %1, %cst_9 {dimension_numbers = #tpu.dot_dimension_numbers<[1], [0], [0], [1], [0, 0, 1, 1], [], []>} : vector<16x32xf32>, vector<32x128xf32>, vector<16x128xf32> -> vector<16x128xf32>
    %8 = arith.addf %6, %7 : vector<16x128xf32>
    %9 = vector.broadcast %2 : vector<1x128xf32> to vector<16x128xf32>
    %10 = arith.addf %8, %9 : vector<16x128xf32>
    %11 = vector.extract_strided_slice %10 {offsets = [0, 0], sizes = [16, 96], strides = [1, 1]} : vector<16x128xf32> to vector<16x96xf32>
    %12 = arith.negf %11 : vector<16x96xf32>
    %13 = math.exp %12 : vector<16x96xf32>
    %cst_10 = arith.constant 1.000000e+00 : f32
    %14 = vector.broadcast %cst_10 : f32 to vector<16x96xf32>
    %15 = arith.addf %14, %13 : vector<16x96xf32>
    %16 = arith.divf %14, %15 : vector<16x96xf32>
    %17 = vector.extract_strided_slice %10 {offsets = [0, 96], sizes = [16, 32], strides = [1, 1]} : vector<16x128xf32> to vector<16x32xf32>
    %18 = math.tanh %17 : vector<16x32xf32>
    %19 = vector.extract_strided_slice %16 {offsets = [0, 0], sizes = [16, 32], strides = [1, 1]} : vector<16x96xf32> to vector<16x32xf32>
    %20 = vector.extract_strided_slice %16 {offsets = [0, 32], sizes = [16, 32], strides = [1, 1]} : vector<16x96xf32> to vector<16x32xf32>
    %21 = vector.extract_strided_slice %16 {offsets = [0, 64], sizes = [16, 32], strides = [1, 1]} : vector<16x96xf32> to vector<16x32xf32>
    %22 = arith.mulf %20, %4 : vector<16x32xf32>
    %23 = arith.mulf %19, %18 : vector<16x32xf32>
    %24 = arith.addf %22, %23 : vector<16x32xf32>
    %25 = math.tanh %24 : vector<16x32xf32>
    %26 = arith.mulf %21, %25 : vector<16x32xf32>
    %c0_11 = arith.constant 0 : index
    %c4 = arith.constant 4 : index
    %27 = vector.load %arg1[%c0_11, %c4] : memref<16x128xf32, #tpu.memory_space<vmem>>, vector<16x4xf32>
    %cst_12 = arith.constant dense<0.000000e+00> : vector<16x128xf32>
    %28 = tpu.matmul %27, %0, %cst_12 {dimension_numbers = #tpu.dot_dimension_numbers<[1], [0], [0], [1], [0, 0, 1, 1], [], []>} : vector<16x4xf32>, vector<4x128xf32>, vector<16x128xf32> -> vector<16x128xf32>
    %cst_13 = arith.constant dense<0.000000e+00> : vector<16x128xf32>
    %29 = tpu.matmul %26, %1, %cst_13 {dimension_numbers = #tpu.dot_dimension_numbers<[1], [0], [0], [1], [0, 0, 1, 1], [], []>} : vector<16x32xf32>, vector<32x128xf32>, vector<16x128xf32> -> vector<16x128xf32>
    %30 = arith.addf %28, %29 : vector<16x128xf32>
    %31 = vector.broadcast %2 : vector<1x128xf32> to vector<16x128xf32>
    %32 = arith.addf %30, %31 : vector<16x128xf32>
    %33 = vector.extract_strided_slice %32 {offsets = [0, 0], sizes = [16, 96], strides = [1, 1]} : vector<16x128xf32> to vector<16x96xf32>
    %34 = arith.negf %33 : vector<16x96xf32>
    %35 = math.exp %34 : vector<16x96xf32>
    %cst_14 = arith.constant 1.000000e+00 : f32
    %36 = vector.broadcast %cst_14 : f32 to vector<16x96xf32>
    %37 = arith.addf %36, %35 : vector<16x96xf32>
    %38 = arith.divf %36, %37 : vector<16x96xf32>
    %39 = vector.extract_strided_slice %32 {offsets = [0, 96], sizes = [16, 32], strides = [1, 1]} : vector<16x128xf32> to vector<16x32xf32>
    %40 = math.tanh %39 : vector<16x32xf32>
    %41 = vector.extract_strided_slice %38 {offsets = [0, 0], sizes = [16, 32], strides = [1, 1]} : vector<16x96xf32> to vector<16x32xf32>
    %42 = vector.extract_strided_slice %38 {offsets = [0, 32], sizes = [16, 32], strides = [1, 1]} : vector<16x96xf32> to vector<16x32xf32>
    %43 = vector.extract_strided_slice %38 {offsets = [0, 64], sizes = [16, 32], strides = [1, 1]} : vector<16x96xf32> to vector<16x32xf32>
    %44 = arith.mulf %42, %24 : vector<16x32xf32>
    %45 = arith.mulf %41, %40 : vector<16x32xf32>
    %46 = arith.addf %44, %45 : vector<16x32xf32>
    %47 = math.tanh %46 : vector<16x32xf32>
    %48 = arith.mulf %43, %47 : vector<16x32xf32>
    %c0_15 = arith.constant 0 : index
    %c8 = arith.constant 8 : index
    %49 = vector.load %arg1[%c0_15, %c8] : memref<16x128xf32, #tpu.memory_space<vmem>>, vector<16x4xf32>
    %cst_16 = arith.constant dense<0.000000e+00> : vector<16x128xf32>
    %50 = tpu.matmul %49, %0, %cst_16 {dimension_numbers = #tpu.dot_dimension_numbers<[1], [0], [0], [1], [0, 0, 1, 1], [], []>} : vector<16x4xf32>, vector<4x128xf32>, vector<16x128xf32> -> vector<16x128xf32>
    %cst_17 = arith.constant dense<0.000000e+00> : vector<16x128xf32>
    %51 = tpu.matmul %48, %1, %cst_17 {dimension_numbers = #tpu.dot_dimension_numbers<[1], [0], [0], [1], [0, 0, 1, 1], [], []>} : vector<16x32xf32>, vector<32x128xf32>, vector<16x128xf32> -> vector<16x128xf32>
    %52 = arith.addf %50, %51 : vector<16x128xf32>
    %53 = vector.broadcast %2 : vector<1x128xf32> to vector<16x128xf32>
    %54 = arith.addf %52, %53 : vector<16x128xf32>
    %55 = vector.extract_strided_slice %54 {offsets = [0, 0], sizes = [16, 96], strides = [1, 1]} : vector<16x128xf32> to vector<16x96xf32>
    %56 = arith.negf %55 : vector<16x96xf32>
    %57 = math.exp %56 : vector<16x96xf32>
    %cst_18 = arith.constant 1.000000e+00 : f32
    %58 = vector.broadcast %cst_18 : f32 to vector<16x96xf32>
    %59 = arith.addf %58, %57 : vector<16x96xf32>
    %60 = arith.divf %58, %59 : vector<16x96xf32>
    %61 = vector.extract_strided_slice %54 {offsets = [0, 96], sizes = [16, 32], strides = [1, 1]} : vector<16x128xf32> to vector<16x32xf32>
    %62 = math.tanh %61 : vector<16x32xf32>
    %63 = vector.extract_strided_slice %60 {offsets = [0, 0], sizes = [16, 32], strides = [1, 1]} : vector<16x96xf32> to vector<16x32xf32>
    %64 = vector.extract_strided_slice %60 {offsets = [0, 32], sizes = [16, 32], strides = [1, 1]} : vector<16x96xf32> to vector<16x32xf32>
    %65 = vector.extract_strided_slice %60 {offsets = [0, 64], sizes = [16, 32], strides = [1, 1]} : vector<16x96xf32> to vector<16x32xf32>
    %66 = arith.mulf %64, %46 : vector<16x32xf32>
    %67 = arith.mulf %63, %62 : vector<16x32xf32>
    %68 = arith.addf %66, %67 : vector<16x32xf32>
    %69 = math.tanh %68 : vector<16x32xf32>
    %70 = arith.mulf %65, %69 : vector<16x32xf32>
    %c0_19 = arith.constant 0 : index
    %c12 = arith.constant 12 : index
    %71 = vector.load %arg1[%c0_19, %c12] : memref<16x128xf32, #tpu.memory_space<vmem>>, vector<16x4xf32>
    %cst_20 = arith.constant dense<0.000000e+00> : vector<16x128xf32>
    %72 = tpu.matmul %71, %0, %cst_20 {dimension_numbers = #tpu.dot_dimension_numbers<[1], [0], [0], [1], [0, 0, 1, 1], [], []>} : vector<16x4xf32>, vector<4x128xf32>, vector<16x128xf32> -> vector<16x128xf32>
    %cst_21 = arith.constant dense<0.000000e+00> : vector<16x128xf32>
    %73 = tpu.matmul %70, %1, %cst_21 {dimension_numbers = #tpu.dot_dimension_numbers<[1], [0], [0], [1], [0, 0, 1, 1], [], []>} : vector<16x32xf32>, vector<32x128xf32>, vector<16x128xf32> -> vector<16x128xf32>
    %74 = arith.addf %72, %73 : vector<16x128xf32>
    %75 = vector.broadcast %2 : vector<1x128xf32> to vector<16x128xf32>
    %76 = arith.addf %74, %75 : vector<16x128xf32>
    %77 = vector.extract_strided_slice %76 {offsets = [0, 0], sizes = [16, 96], strides = [1, 1]} : vector<16x128xf32> to vector<16x96xf32>
    %78 = arith.negf %77 : vector<16x96xf32>
    %79 = math.exp %78 : vector<16x96xf32>
    %cst_22 = arith.constant 1.000000e+00 : f32
    %80 = vector.broadcast %cst_22 : f32 to vector<16x96xf32>
    %81 = arith.addf %80, %79 : vector<16x96xf32>
    %82 = arith.divf %80, %81 : vector<16x96xf32>
    %83 = vector.extract_strided_slice %76 {offsets = [0, 96], sizes = [16, 32], strides = [1, 1]} : vector<16x128xf32> to vector<16x32xf32>
    %84 = math.tanh %83 : vector<16x32xf32>
    %85 = vector.extract_strided_slice %82 {offsets = [0, 0], sizes = [16, 32], strides = [1, 1]} : vector<16x96xf32> to vector<16x32xf32>
    %86 = vector.extract_strided_slice %82 {offsets = [0, 32], sizes = [16, 32], strides = [1, 1]} : vector<16x96xf32> to vector<16x32xf32>
    %87 = vector.extract_strided_slice %82 {offsets = [0, 64], sizes = [16, 32], strides = [1, 1]} : vector<16x96xf32> to vector<16x32xf32>
    %88 = arith.mulf %86, %68 : vector<16x32xf32>
    %89 = arith.mulf %85, %84 : vector<16x32xf32>
    %90 = arith.addf %88, %89 : vector<16x32xf32>
    %91 = math.tanh %90 : vector<16x32xf32>
    %92 = arith.mulf %87, %91 : vector<16x32xf32>
    %93 = tpu.concatenate %26, %48, %70, %92 in 1 : vector<16x32xf32>, vector<16x32xf32>, vector<16x32xf32>, vector<16x32xf32> -> vector<16x128xf32>
    %c0_23 = arith.constant 0 : index
    %c0_24 = arith.constant 0 : index
    %94 = vector.load %arg10[%c0_23, %c0_24] : memref<16x1024xf32, #tpu.memory_space<vmem>>, vector<16x128xf32>
    tpu.vector_store %arg10[%c0_23, %c0_24], %93 {strides = array<i32>} : memref<16x1024xf32, #tpu.memory_space<vmem>>, vector<16x128xf32>,
    %c0_25 = arith.constant 0 : index
    %c16 = arith.constant 16 : index
    %95 = vector.load %arg1[%c0_25, %c16] : memref<16x128xf32, #tpu.memory_space<vmem>>, vector<16x4xf32>
    %cst_26 = arith.constant dense<0.000000e+00> : vector<16x128xf32>
    %96 = tpu.matmul %95, %0, %cst_26 {dimension_numbers = #tpu.dot_dimension_numbers<[1], [0], [0], [1], [0, 0, 1, 1], [], []>} : vector<16x4xf32>, vector<4x128xf32>, vector<16x128xf32> -> vector<16x128xf32>
    %cst_27 = arith.constant dense<0.000000e+00> : vector<16x128xf32>
    %97 = tpu.matmul %92, %1, %cst_27 {dimension_numbers = #tpu.dot_dimension_numbers<[1], [0], [0], [1], [0, 0, 1, 1], [], []>} : vector<16x32xf32>, vector<32x128xf32>, vector<16x128xf32> -> vector<16x128xf32>
    %98 = arith.addf %96, %97 : vector<16x128xf32>
    %99 = vector.broadcast %2 : vector<1x128xf32> to vector<16x128xf32>
    %100 = arith.addf %98, %99 : vector<16x128xf32>
    %101 = vector.extract_strided_slice %100 {offsets = [0, 0], sizes = [16, 96], strides = [1, 1]} : vector<16x128xf32> to vector<16x96xf32>
    %102 = arith.negf %101 : vector<16x96xf32>
    %103 = math.exp %102 : vector<16x96xf32>
    %cst_28 = arith.constant 1.000000e+00 : f32
    %104 = vector.broadcast %cst_28 : f32 to vector<16x96xf32>
    %105 = arith.addf %104, %103 : vector<16x96xf32>
    %106 = arith.divf %104, %105 : vector<16x96xf32>
    %107 = vector.extract_strided_slice %100 {offsets = [0, 96], sizes = [16, 32], strides = [1, 1]} : vector<16x128xf32> to vector<16x32xf32>
    %108 = math.tanh %107 : vector<16x32xf32>
    %109 = vector.extract_strided_slice %106 {offsets = [0, 0], sizes = [16, 32], strides = [1, 1]} : vector<16x96xf32> to vector<16x32xf32>
    %110 = vector.extract_strided_slice %106 {offsets = [0, 32], sizes = [16, 32], strides = [1, 1]} : vector<16x96xf32> to vector<16x32xf32>
    %111 = vector.extract_strided_slice %106 {offsets = [0, 64], sizes = [16, 32], strides = [1, 1]} : vector<16x96xf32> to vector<16x32xf32>
    %112 = arith.mulf %110, %90 : vector<16x32xf32>
    %113 = arith.mulf %109, %108 : vector<16x32xf32>
    %114 = arith.addf %112, %113 : vector<16x32xf32>
    %115 = math.tanh %114 : vector<16x32xf32>
    %116 = arith.mulf %111, %115 : vector<16x32xf32>
    %c0_29 = arith.constant 0 : index
    %c20 = arith.constant 20 : index
    %117 = vector.load %arg1[%c0_29, %c20] : memref<16x128xf32, #tpu.memory_space<vmem>>, vector<16x4xf32>
    %cst_30 = arith.constant dense<0.000000e+00> : vector<16x128xf32>
    %118 = tpu.matmul %117, %0, %cst_30 {dimension_numbers = #tpu.dot_dimension_numbers<[1], [0], [0], [1], [0, 0, 1, 1], [], []>} : vector<16x4xf32>, vector<4x128xf32>, vector<16x128xf32> -> vector<16x128xf32>
    %cst_31 = arith.constant dense<0.000000e+00> : vector<16x128xf32>
    %119 = tpu.matmul %116, %1, %cst_31 {dimension_numbers = #tpu.dot_dimension_numbers<[1], [0], [0], [1], [0, 0, 1, 1], [], []>} : vector<16x32xf32>, vector<32x128xf32>, vector<16x128xf32> -> vector<16x128xf32>
    %120 = arith.addf %118, %119 : vector<16x128xf32>
    %121 = vector.broadcast %2 : vector<1x128xf32> to vector<16x128xf32>
    %122 = arith.addf %120, %121 : vector<16x128xf32>
    %123 = vector.extract_strided_slice %122 {offsets = [0, 0], sizes = [16, 96], strides = [1, 1]} : vector<16x128xf32> to vector<16x96xf32>
    %124 = arith.negf %123 : vector<16x96xf32>
    %125 = math.exp %124 : vector<16x96xf32>
    %cst_32 = arith.constant 1.000000e+00 : f32
    %126 = vector.broadcast %cst_32 : f32 to vector<16x96xf32>
    %127 = arith.addf %126, %125 : vector<16x96xf32>
    %128 = arith.divf %126, %127 : vector<16x96xf32>
    %129 = vector.extract_strided_slice %122 {offsets = [0, 96], sizes = [16, 32], strides = [1, 1]} : vector<16x128xf32> to vector<16x32xf32>
    %130 = math.tanh %129 : vector<16x32xf32>
    %131 = vector.extract_strided_slice %128 {offsets = [0, 0], sizes = [16, 32], strides = [1, 1]} : vector<16x96xf32> to vector<16x32xf32>
    %132 = vector.extract_strided_slice %128 {offsets = [0, 32], sizes = [16, 32], strides = [1, 1]} : vector<16x96xf32> to vector<16x32xf32>
    %133 = vector.extract_strided_slice %128 {offsets = [0, 64], sizes = [16, 32], strides = [1, 1]} : vector<16x96xf32> to vector<16x32xf32>
    %134 = arith.mulf %132, %114 : vector<16x32xf32>
    %135 = arith.mulf %131, %130 : vector<16x32xf32>
    %136 = arith.addf %134, %135 : vector<16x32xf32>
    %137 = math.tanh %136 : vector<16x32xf32>
    %138 = arith.mulf %133, %137 : vector<16x32xf32>
    %c0_33 = arith.constant 0 : index
    %c24 = arith.constant 24 : index
    %139 = vector.load %arg1[%c0_33, %c24] : memref<16x128xf32, #tpu.memory_space<vmem>>, vector<16x4xf32>
    %cst_34 = arith.constant dense<0.000000e+00> : vector<16x128xf32>
    %140 = tpu.matmul %139, %0, %cst_34 {dimension_numbers = #tpu.dot_dimension_numbers<[1], [0], [0], [1], [0, 0, 1, 1], [], []>} : vector<16x4xf32>, vector<4x128xf32>, vector<16x128xf32> -> vector<16x128xf32>
    %cst_35 = arith.constant dense<0.000000e+00> : vector<16x128xf32>
    %141 = tpu.matmul %138, %1, %cst_35 {dimension_numbers = #tpu.dot_dimension_numbers<[1], [0], [0], [1], [0, 0, 1, 1], [], []>} : vector<16x32xf32>, vector<32x128xf32>, vector<16x128xf32> -> vector<16x128xf32>
    %142 = arith.addf %140, %141 : vector<16x128xf32>
    %143 = vector.broadcast %2 : vector<1x128xf32> to vector<16x128xf32>
    %144 = arith.addf %142, %143 : vector<16x128xf32>
    %145 = vector.extract_strided_slice %144 {offsets = [0, 0], sizes = [16, 96], strides = [1, 1]} : vector<16x128xf32> to vector<16x96xf32>
    %146 = arith.negf %145 : vector<16x96xf32>
    %147 = math.exp %146 : vector<16x96xf32>
    %cst_36 = arith.constant 1.000000e+00 : f32
    %148 = vector.broadcast %cst_36 : f32 to vector<16x96xf32>
    %149 = arith.addf %148, %147 : vector<16x96xf32>
    %150 = arith.divf %148, %149 : vector<16x96xf32>
    %151 = vector.extract_strided_slice %144 {offsets = [0, 96], sizes = [16, 32], strides = [1, 1]} : vector<16x128xf32> to vector<16x32xf32>
    %152 = math.tanh %151 : vector<16x32xf32>
    %153 = vector.extract_strided_slice %150 {offsets = [0, 0], sizes = [16, 32], strides = [1, 1]} : vector<16x96xf32> to vector<16x32xf32>
    %154 = vector.extract_strided_slice %150 {offsets = [0, 32], sizes = [16, 32], strides = [1, 1]} : vector<16x96xf32> to vector<16x32xf32>
    %155 = vector.extract_strided_slice %150 {offsets = [0, 64], sizes = [16, 32], strides = [1, 1]} : vector<16x96xf32> to vector<16x32xf32>
    %156 = arith.mulf %154, %136 : vector<16x32xf32>
    %157 = arith.mulf %153, %152 : vector<16x32xf32>
    %158 = arith.addf %156, %157 : vector<16x32xf32>
    %159 = math.tanh %158 : vector<16x32xf32>
    %160 = arith.mulf %155, %159 : vector<16x32xf32>
    %c0_37 = arith.constant 0 : index
    %c28 = arith.constant 28 : index
    %161 = vector.load %arg1[%c0_37, %c28] : memref<16x128xf32, #tpu.memory_space<vmem>>, vector<16x4xf32>
    %cst_38 = arith.constant dense<0.000000e+00> : vector<16x128xf32>
    %162 = tpu.matmul %161, %0, %cst_38 {dimension_numbers = #tpu.dot_dimension_numbers<[1], [0], [0], [1], [0, 0, 1, 1], [], []>} : vector<16x4xf32>, vector<4x128xf32>, vector<16x128xf32> -> vector<16x128xf32>
    %cst_39 = arith.constant dense<0.000000e+00> : vector<16x128xf32>
    %163 = tpu.matmul %160, %1, %cst_39 {dimension_numbers = #tpu.dot_dimension_numbers<[1], [0], [0], [1], [0, 0, 1, 1], [], []>} : vector<16x32xf32>, vector<32x128xf32>, vector<16x128xf32> -> vector<16x128xf32>
    %164 = arith.addf %162, %163 : vector<16x128xf32>
    %165 = vector.broadcast %2 : vector<1x128xf32> to vector<16x128xf32>
    %166 = arith.addf %164, %165 : vector<16x128xf32>
    %167 = vector.extract_strided_slice %166 {offsets = [0, 0], sizes = [16, 96], strides = [1, 1]} : vector<16x128xf32> to vector<16x96xf32>
    %168 = arith.negf %167 : vector<16x96xf32>
    %169 = math.exp %168 : vector<16x96xf32>
    %cst_40 = arith.constant 1.000000e+00 : f32
    %170 = vector.broadcast %cst_40 : f32 to vector<16x96xf32>
    %171 = arith.addf %170, %169 : vector<16x96xf32>
    %172 = arith.divf %170, %171 : vector<16x96xf32>
    %173 = vector.extract_strided_slice %166 {offsets = [0, 96], sizes = [16, 32], strides = [1, 1]} : vector<16x128xf32> to vector<16x32xf32>
    %174 = math.tanh %173 : vector<16x32xf32>
    %175 = vector.extract_strided_slice %172 {offsets = [0, 0], sizes = [16, 32], strides = [1, 1]} : vector<16x96xf32> to vector<16x32xf32>
    %176 = vector.extract_strided_slice %172 {offsets = [0, 32], sizes = [16, 32], strides = [1, 1]} : vector<16x96xf32> to vector<16x32xf32>
    %177 = vector.extract_strided_slice %172 {offsets = [0, 64], sizes = [16, 32], strides = [1, 1]} : vector<16x96xf32> to vector<16x32xf32>
    %178 = arith.mulf %176, %158 : vector<16x32xf32>
    %179 = arith.mulf %175, %174 : vector<16x32xf32>
    %180 = arith.addf %178, %179 : vector<16x32xf32>
    %181 = math.tanh %180 : vector<16x32xf32>
    %182 = arith.mulf %177, %181 : vector<16x32xf32>
    %183 = tpu.concatenate %116, %138, %160, %182 in 1 : vector<16x32xf32>, vector<16x32xf32>, vector<16x32xf32>, vector<16x32xf32> -> vector<16x128xf32>
    %c0_41 = arith.constant 0 : index
    %c128 = arith.constant 128 : index
    %184 = vector.load %arg10[%c0_41, %c128] : memref<16x1024xf32, #tpu.memory_space<vmem>>, vector<16x128xf32>
    tpu.vector_store %arg10[%c0_41, %c128], %183 {strides = array<i32>} : memref<16x1024xf32, #tpu.memory_space<vmem>>, vector<16x128xf32>,
    %c0_42 = arith.constant 0 : index
    %c32 = arith.constant 32 : index
    %185 = vector.load %arg1[%c0_42, %c32] : memref<16x128xf32, #tpu.memory_space<vmem>>, vector<16x4xf32>
    %cst_43 = arith.constant dense<0.000000e+00> : vector<16x128xf32>
    %186 = tpu.matmul %185, %0, %cst_43 {dimension_numbers = #tpu.dot_dimension_numbers<[1], [0], [0], [1], [0, 0, 1, 1], [], []>} : vector<16x4xf32>, vector<4x128xf32>, vector<16x128xf32> -> vector<16x128xf32>
    %cst_44 = arith.constant dense<0.000000e+00> : vector<16x128xf32>
    %187 = tpu.matmul %182, %1, %cst_44 {dimension_numbers = #tpu.dot_dimension_numbers<[1], [0], [0], [1], [0, 0, 1, 1], [], []>} : vector<16x32xf32>, vector<32x128xf32>, vector<16x128xf32> -> vector<16x128xf32>
    %188 = arith.addf %186, %187 : vector<16x128xf32>
    %189 = vector.broadcast %2 : vector<1x128xf32> to vector<16x128xf32>
    %190 = arith.addf %188, %189 : vector<16x128xf32>
    %191 = vector.extract_strided_slice %190 {offsets = [0, 0], sizes = [16, 96], strides = [1, 1]} : vector<16x128xf32> to vector<16x96xf32>
    %192 = arith.negf %191 : vector<16x96xf32>
    %193 = math.exp %192 : vector<16x96xf32>
    %cst_45 = arith.constant 1.000000e+00 : f32
    %194 = vector.broadcast %cst_45 : f32 to vector<16x96xf32>
    %195 = arith.addf %194, %193 : vector<16x96xf32>
    %196 = arith.divf %194, %195 : vector<16x96xf32>
    %197 = vector.extract_strided_slice %190 {offsets = [0, 96], sizes = [16, 32], strides = [1, 1]} : vector<16x128xf32> to vector<16x32xf32>
    %198 = math.tanh %197 : vector<16x32xf32>
    %199 = vector.extract_strided_slice %196 {offsets = [0, 0], sizes = [16, 32], strides = [1, 1]} : vector<16x96xf32> to vector<16x32xf32>
    %200 = vector.extract_strided_slice %196 {offsets = [0, 32], sizes = [16, 32], strides = [1, 1]} : vector<16x96xf32> to vector<16x32xf32>
    %201 = vector.extract_strided_slice %196 {offsets = [0, 64], sizes = [16, 32], strides = [1, 1]} : vector<16x96xf32> to vector<16x32xf32>
    %202 = arith.mulf %200, %180 : vector<16x32xf32>
    %203 = arith.mulf %199, %198 : vector<16x32xf32>
    %204 = arith.addf %202, %203 : vector<16x32xf32>
    %205 = math.tanh %204 : vector<16x32xf32>
    %206 = arith.mulf %201, %205 : vector<16x32xf32>
    %c0_46 = arith.constant 0 : index
    %c36 = arith.constant 36 : index
    %207 = vector.load %arg1[%c0_46, %c36] : memref<16x128xf32, #tpu.memory_space<vmem>>, vector<16x4xf32>
    %cst_47 = arith.constant dense<0.000000e+00> : vector<16x128xf32>
    %208 = tpu.matmul %207, %0, %cst_47 {dimension_numbers = #tpu.dot_dimension_numbers<[1], [0], [0], [1], [0, 0, 1, 1], [], []>} : vector<16x4xf32>, vector<4x128xf32>, vector<16x128xf32> -> vector<16x128xf32>
    %cst_48 = arith.constant dense<0.000000e+00> : vector<16x128xf32>
    %209 = tpu.matmul %206, %1, %cst_48 {dimension_numbers = #tpu.dot_dimension_numbers<[1], [0], [0], [1], [0, 0, 1, 1], [], []>} : vector<16x32xf32>, vector<32x128xf32>, vector<16x128xf32> -> vector<16x128xf32>
    %210 = arith.addf %208, %209 : vector<16x128xf32>
    %211 = vector.broadcast %2 : vector<1x128xf32> to vector<16x128xf32>
    %212 = arith.addf %210, %211 : vector<16x128xf32>
    %213 = vector.extract_strided_slice %212 {offsets = [0, 0], sizes = [16, 96], strides = [1, 1]} : vector<16x128xf32> to vector<16x96xf32>
    %214 = arith.negf %213 : vector<16x96xf32>
    %215 = math.exp %214 : vector<16x96xf32>
    %cst_49 = arith.constant 1.000000e+00 : f32
    %216 = vector.broadcast %cst_49 : f32 to vector<16x96xf32>
    %217 = arith.addf %216, %215 : vector<16x96xf32>
    %218 = arith.divf %216, %217 : vector<16x96xf32>
    %219 = vector.extract_strided_slice %212 {offsets = [0, 96], sizes = [16, 32], strides = [1, 1]} : vector<16x128xf32> to vector<16x32xf32>
    %220 = math.tanh %219 : vector<16x32xf32>
    %221 = vector.extract_strided_slice %218 {offsets = [0, 0], sizes = [16, 32], strides = [1, 1]} : vector<16x96xf32> to vector<16x32xf32>
    %222 = vector.extract_strided_slice %218 {offsets = [0, 32], sizes = [16, 32], strides = [1, 1]} : vector<16x96xf32> to vector<16x32xf32>
    %223 = vector.extract_strided_slice %218 {offsets = [0, 64], sizes = [16, 32], strides = [1, 1]} : vector<16x96xf32> to vector<16x32xf32>
    %224 = arith.mulf %222, %204 : vector<16x32xf32>
    %225 = arith.mulf %221, %220 : vector<16x32xf32>
    %226 = arith.addf %224, %225 : vector<16x32xf32>
    %227 = math.tanh %226 : vector<16x32xf32>
    %228 = arith.mulf %223, %227 : vector<16x32xf32>
    %c0_50 = arith.constant 0 : index
    %c40 = arith.constant 40 : index
    %229 = vector.load %arg1[%c0_50, %c40] : memref<16x128xf32, #tpu.memory_space<vmem>>, vector<16x4xf32>
    %cst_51 = arith.constant dense<0.000000e+00> : vector<16x128xf32>
    %230 = tpu.matmul %229, %0, %cst_51 {dimension_numbers = #tpu.dot_dimension_numbers<[1], [0], [0], [1], [0, 0, 1, 1], [], []>} : vector<16x4xf32>, vector<4x128xf32>, vector<16x128xf32> -> vector<16x128xf32>
    %cst_52 = arith.constant dense<0.000000e+00> : vector<16x128xf32>
    %231 = tpu.matmul %228, %1, %cst_52 {dimension_numbers = #tpu.dot_dimension_numbers<[1], [0], [0], [1], [0, 0, 1, 1], [], []>} : vector<16x32xf32>, vector<32x128xf32>, vector<16x128xf32> -> vector<16x128xf32>
    %232 = arith.addf %230, %231 : vector<16x128xf32>
    %233 = vector.broadcast %2 : vector<1x128xf32> to vector<16x128xf32>
    %234 = arith.addf %232, %233 : vector<16x128xf32>
    %235 = vector.extract_strided_slice %234 {offsets = [0, 0], sizes = [16, 96], strides = [1, 1]} : vector<16x128xf32> to vector<16x96xf32>
    %236 = arith.negf %235 : vector<16x96xf32>
    %237 = math.exp %236 : vector<16x96xf32>
    %cst_53 = arith.constant 1.000000e+00 : f32
    %238 = vector.broadcast %cst_53 : f32 to vector<16x96xf32>
    %239 = arith.addf %238, %237 : vector<16x96xf32>
    %240 = arith.divf %238, %239 : vector<16x96xf32>
    %241 = vector.extract_strided_slice %234 {offsets = [0, 96], sizes = [16, 32], strides = [1, 1]} : vector<16x128xf32> to vector<16x32xf32>
    %242 = math.tanh %241 : vector<16x32xf32>
    %243 = vector.extract_strided_slice %240 {offsets = [0, 0], sizes = [16, 32], strides = [1, 1]} : vector<16x96xf32> to vector<16x32xf32>
    %244 = vector.extract_strided_slice %240 {offsets = [0, 32], sizes = [16, 32], strides = [1, 1]} : vector<16x96xf32> to vector<16x32xf32>
    %245 = vector.extract_strided_slice %240 {offsets = [0, 64], sizes = [16, 32], strides = [1, 1]} : vector<16x96xf32> to vector<16x32xf32>
    %246 = arith.mulf %244, %226 : vector<16x32xf32>
    %247 = arith.mulf %243, %242 : vector<16x32xf32>
    %248 = arith.addf %246, %247 : vector<16x32xf32>
    %249 = math.tanh %248 : vector<16x32xf32>
    %250 = arith.mulf %245, %249 : vector<16x32xf32>
    %c0_54 = arith.constant 0 : index
    %c44 = arith.constant 44 : index
    %251 = vector.load %arg1[%c0_54, %c44] : memref<16x128xf32, #tpu.memory_space<vmem>>, vector<16x4xf32>
    %cst_55 = arith.constant dense<0.000000e+00> : vector<16x128xf32>
    %252 = tpu.matmul %251, %0, %cst_55 {dimension_numbers = #tpu.dot_dimension_numbers<[1], [0], [0], [1], [0, 0, 1, 1], [], []>} : vector<16x4xf32>, vector<4x128xf32>, vector<16x128xf32> -> vector<16x128xf32>
    %cst_56 = arith.constant dense<0.000000e+00> : vector<16x128xf32>
    %253 = tpu.matmul %250, %1, %cst_56 {dimension_numbers = #tpu.dot_dimension_numbers<[1], [0], [0], [1], [0, 0, 1, 1], [], []>} : vector<16x32xf32>, vector<32x128xf32>, vector<16x128xf32> -> vector<16x128xf32>
    %254 = arith.addf %252, %253 : vector<16x128xf32>
    %255 = vector.broadcast %2 : vector<1x128xf32> to vector<16x128xf32>
    %256 = arith.addf %254, %255 : vector<16x128xf32>
    %257 = vector.extract_strided_slice %256 {offsets = [0, 0], sizes = [16, 96], strides = [1, 1]} : vector<16x128xf32> to vector<16x96xf32>
    %258 = arith.negf %257 : vector<16x96xf32>
    %259 = math.exp %258 : vector<16x96xf32>
    %cst_57 = arith.constant 1.000000e+00 : f32
    %260 = vector.broadcast %cst_57 : f32 to vector<16x96xf32>
    %261 = arith.addf %260, %259 : vector<16x96xf32>
    %262 = arith.divf %260, %261 : vector<16x96xf32>
    %263 = vector.extract_strided_slice %256 {offsets = [0, 96], sizes = [16, 32], strides = [1, 1]} : vector<16x128xf32> to vector<16x32xf32>
    %264 = math.tanh %263 : vector<16x32xf32>
    %265 = vector.extract_strided_slice %262 {offsets = [0, 0], sizes = [16, 32], strides = [1, 1]} : vector<16x96xf32> to vector<16x32xf32>
    %266 = vector.extract_strided_slice %262 {offsets = [0, 32], sizes = [16, 32], strides = [1, 1]} : vector<16x96xf32> to vector<16x32xf32>
    %267 = vector.extract_strided_slice %262 {offsets = [0, 64], sizes = [16, 32], strides = [1, 1]} : vector<16x96xf32> to vector<16x32xf32>
    %268 = arith.mulf %266, %248 : vector<16x32xf32>
    %269 = arith.mulf %265, %264 : vector<16x32xf32>
    %270 = arith.addf %268, %269 : vector<16x32xf32>
    %271 = math.tanh %270 : vector<16x32xf32>
    %272 = arith.mulf %267, %271 : vector<16x32xf32>
    %273 = tpu.concatenate %206, %228, %250, %272 in 1 : vector<16x32xf32>, vector<16x32xf32>, vector<16x32xf32>, vector<16x32xf32> -> vector<16x128xf32>
    %c0_58 = arith.constant 0 : index
    %c256 = arith.constant 256 : index
    %274 = vector.load %arg10[%c0_58, %c256] : memref<16x1024xf32, #tpu.memory_space<vmem>>, vector<16x128xf32>
    tpu.vector_store %arg10[%c0_58, %c256], %273 {strides = array<i32>} : memref<16x1024xf32, #tpu.memory_space<vmem>>, vector<16x128xf32>,
    %c0_59 = arith.constant 0 : index
    %c48 = arith.constant 48 : index
    %275 = vector.load %arg1[%c0_59, %c48] : memref<16x128xf32, #tpu.memory_space<vmem>>, vector<16x4xf32>
    %cst_60 = arith.constant dense<0.000000e+00> : vector<16x128xf32>
    %276 = tpu.matmul %275, %0, %cst_60 {dimension_numbers = #tpu.dot_dimension_numbers<[1], [0], [0], [1], [0, 0, 1, 1], [], []>} : vector<16x4xf32>, vector<4x128xf32>, vector<16x128xf32> -> vector<16x128xf32>
    %cst_61 = arith.constant dense<0.000000e+00> : vector<16x128xf32>
    %277 = tpu.matmul %272, %1, %cst_61 {dimension_numbers = #tpu.dot_dimension_numbers<[1], [0], [0], [1], [0, 0, 1, 1], [], []>} : vector<16x32xf32>, vector<32x128xf32>, vector<16x128xf32> -> vector<16x128xf32>
    %278 = arith.addf %276, %277 : vector<16x128xf32>
    %279 = vector.broadcast %2 : vector<1x128xf32> to vector<16x128xf32>
    %280 = arith.addf %278, %279 : vector<16x128xf32>
    %281 = vector.extract_strided_slice %280 {offsets = [0, 0], sizes = [16, 96], strides = [1, 1]} : vector<16x128xf32> to vector<16x96xf32>
    %282 = arith.negf %281 : vector<16x96xf32>
    %283 = math.exp %282 : vector<16x96xf32>
    %cst_62 = arith.constant 1.000000e+00 : f32
    %284 = vector.broadcast %cst_62 : f32 to vector<16x96xf32>
    %285 = arith.addf %284, %283 : vector<16x96xf32>
    %286 = arith.divf %284, %285 : vector<16x96xf32>
    %287 = vector.extract_strided_slice %280 {offsets = [0, 96], sizes = [16, 32], strides = [1, 1]} : vector<16x128xf32> to vector<16x32xf32>
    %288 = math.tanh %287 : vector<16x32xf32>
    %289 = vector.extract_strided_slice %286 {offsets = [0, 0], sizes = [16, 32], strides = [1, 1]} : vector<16x96xf32> to vector<16x32xf32>
    %290 = vector.extract_strided_slice %286 {offsets = [0, 32], sizes = [16, 32], strides = [1, 1]} : vector<16x96xf32> to vector<16x32xf32>
    %291 = vector.extract_strided_slice %286 {offsets = [0, 64], sizes = [16, 32], strides = [1, 1]} : vector<16x96xf32> to vector<16x32xf32>
    %292 = arith.mulf %290, %270 : vector<16x32xf32>
    %293 = arith.mulf %289, %288 : vector<16x32xf32>
    %294 = arith.addf %292, %293 : vector<16x32xf32>
    %295 = math.tanh %294 : vector<16x32xf32>
    %296 = arith.mulf %291, %295 : vector<16x32xf32>
    %c0_63 = arith.constant 0 : index
    %c52 = arith.constant 52 : index
    %297 = vector.load %arg1[%c0_63, %c52] : memref<16x128xf32, #tpu.memory_space<vmem>>, vector<16x4xf32>
    %cst_64 = arith.constant dense<0.000000e+00> : vector<16x128xf32>
    %298 = tpu.matmul %297, %0, %cst_64 {dimension_numbers = #tpu.dot_dimension_numbers<[1], [0], [0], [1], [0, 0, 1, 1], [], []>} : vector<16x4xf32>, vector<4x128xf32>, vector<16x128xf32> -> vector<16x128xf32>
    %cst_65 = arith.constant dense<0.000000e+00> : vector<16x128xf32>
    %299 = tpu.matmul %296, %1, %cst_65 {dimension_numbers = #tpu.dot_dimension_numbers<[1], [0], [0], [1], [0, 0, 1, 1], [], []>} : vector<16x32xf32>, vector<32x128xf32>, vector<16x128xf32> -> vector<16x128xf32>
    %300 = arith.addf %298, %299 : vector<16x128xf32>
    %301 = vector.broadcast %2 : vector<1x128xf32> to vector<16x128xf32>
    %302 = arith.addf %300, %301 : vector<16x128xf32>
    %303 = vector.extract_strided_slice %302 {offsets = [0, 0], sizes = [16, 96], strides = [1, 1]} : vector<16x128xf32> to vector<16x96xf32>
    %304 = arith.negf %303 : vector<16x96xf32>
    %305 = math.exp %304 : vector<16x96xf32>
    %cst_66 = arith.constant 1.000000e+00 : f32
    %306 = vector.broadcast %cst_66 : f32 to vector<16x96xf32>
    %307 = arith.addf %306, %305 : vector<16x96xf32>
    %308 = arith.divf %306, %307 : vector<16x96xf32>
    %309 = vector.extract_strided_slice %302 {offsets = [0, 96], sizes = [16, 32], strides = [1, 1]} : vector<16x128xf32> to vector<16x32xf32>
    %310 = math.tanh %309 : vector<16x32xf32>
    %311 = vector.extract_strided_slice %308 {offsets = [0, 0], sizes = [16, 32], strides = [1, 1]} : vector<16x96xf32> to vector<16x32xf32>
    %312 = vector.extract_strided_slice %308 {offsets = [0, 32], sizes = [16, 32], strides = [1, 1]} : vector<16x96xf32> to vector<16x32xf32>
    %313 = vector.extract_strided_slice %308 {offsets = [0, 64], sizes = [16, 32], strides = [1, 1]} : vector<16x96xf32> to vector<16x32xf32>
    %314 = arith.mulf %312, %294 : vector<16x32xf32>
    %315 = arith.mulf %311, %310 : vector<16x32xf32>
    %316 = arith.addf %314, %315 : vector<16x32xf32>
    %317 = math.tanh %316 : vector<16x32xf32>
    %318 = arith.mulf %313, %317 : vector<16x32xf32>
    %c0_67 = arith.constant 0 : index
    %c56 = arith.constant 56 : index
    %319 = vector.load %arg1[%c0_67, %c56] : memref<16x128xf32, #tpu.memory_space<vmem>>, vector<16x4xf32>
    %cst_68 = arith.constant dense<0.000000e+00> : vector<16x128xf32>
    %320 = tpu.matmul %319, %0, %cst_68 {dimension_numbers = #tpu.dot_dimension_numbers<[1], [0], [0], [1], [0, 0, 1, 1], [], []>} : vector<16x4xf32>, vector<4x128xf32>, vector<16x128xf32> -> vector<16x128xf32>
    %cst_69 = arith.constant dense<0.000000e+00> : vector<16x128xf32>
    %321 = tpu.matmul %318, %1, %cst_69 {dimension_numbers = #tpu.dot_dimension_numbers<[1], [0], [0], [1], [0, 0, 1, 1], [], []>} : vector<16x32xf32>, vector<32x128xf32>, vector<16x128xf32> -> vector<16x128xf32>
    %322 = arith.addf %320, %321 : vector<16x128xf32>
    %323 = vector.broadcast %2 : vector<1x128xf32> to vector<16x128xf32>
    %324 = arith.addf %322, %323 : vector<16x128xf32>
    %325 = vector.extract_strided_slice %324 {offsets = [0, 0], sizes = [16, 96], strides = [1, 1]} : vector<16x128xf32> to vector<16x96xf32>
    %326 = arith.negf %325 : vector<16x96xf32>
    %327 = math.exp %326 : vector<16x96xf32>
    %cst_70 = arith.constant 1.000000e+00 : f32
    %328 = vector.broadcast %cst_70 : f32 to vector<16x96xf32>
    %329 = arith.addf %328, %327 : vector<16x96xf32>
    %330 = arith.divf %328, %329 : vector<16x96xf32>
    %331 = vector.extract_strided_slice %324 {offsets = [0, 96], sizes = [16, 32], strides = [1, 1]} : vector<16x128xf32> to vector<16x32xf32>
    %332 = math.tanh %331 : vector<16x32xf32>
    %333 = vector.extract_strided_slice %330 {offsets = [0, 0], sizes = [16, 32], strides = [1, 1]} : vector<16x96xf32> to vector<16x32xf32>
    %334 = vector.extract_strided_slice %330 {offsets = [0, 32], sizes = [16, 32], strides = [1, 1]} : vector<16x96xf32> to vector<16x32xf32>
    %335 = vector.extract_strided_slice %330 {offsets = [0, 64], sizes = [16, 32], strides = [1, 1]} : vector<16x96xf32> to vector<16x32xf32>
    %336 = arith.mulf %334, %316 : vector<16x32xf32>
    %337 = arith.mulf %333, %332 : vector<16x32xf32>
    %338 = arith.addf %336, %337 : vector<16x32xf32>
    %339 = math.tanh %338 : vector<16x32xf32>
    %340 = arith.mulf %335, %339 : vector<16x32xf32>
    %c0_71 = arith.constant 0 : index
    %c60 = arith.constant 60 : index
    %341 = vector.load %arg1[%c0_71, %c60] : memref<16x128xf32, #tpu.memory_space<vmem>>, vector<16x4xf32>
    %cst_72 = arith.constant dense<0.000000e+00> : vector<16x128xf32>
    %342 = tpu.matmul %341, %0, %cst_72 {dimension_numbers = #tpu.dot_dimension_numbers<[1], [0], [0], [1], [0, 0, 1, 1], [], []>} : vector<16x4xf32>, vector<4x128xf32>, vector<16x128xf32> -> vector<16x128xf32>
    %cst_73 = arith.constant dense<0.000000e+00> : vector<16x128xf32>
    %343 = tpu.matmul %340, %1, %cst_73 {dimension_numbers = #tpu.dot_dimension_numbers<[1], [0], [0], [1], [0, 0, 1, 1], [], []>} : vector<16x32xf32>, vector<32x128xf32>, vector<16x128xf32> -> vector<16x128xf32>
    %344 = arith.addf %342, %343 : vector<16x128xf32>
    %345 = vector.broadcast %2 : vector<1x128xf32> to vector<16x128xf32>
    %346 = arith.addf %344, %345 : vector<16x128xf32>
    %347 = vector.extract_strided_slice %346 {offsets = [0, 0], sizes = [16, 96], strides = [1, 1]} : vector<16x128xf32> to vector<16x96xf32>
    %348 = arith.negf %347 : vector<16x96xf32>
    %349 = math.exp %348 : vector<16x96xf32>
    %cst_74 = arith.constant 1.000000e+00 : f32
    %350 = vector.broadcast %cst_74 : f32 to vector<16x96xf32>
    %351 = arith.addf %350, %349 : vector<16x96xf32>
    %352 = arith.divf %350, %351 : vector<16x96xf32>
    %353 = vector.extract_strided_slice %346 {offsets = [0, 96], sizes = [16, 32], strides = [1, 1]} : vector<16x128xf32> to vector<16x32xf32>
    %354 = math.tanh %353 : vector<16x32xf32>
    %355 = vector.extract_strided_slice %352 {offsets = [0, 0], sizes = [16, 32], strides = [1, 1]} : vector<16x96xf32> to vector<16x32xf32>
    %356 = vector.extract_strided_slice %352 {offsets = [0, 32], sizes = [16, 32], strides = [1, 1]} : vector<16x96xf32> to vector<16x32xf32>
    %357 = vector.extract_strided_slice %352 {offsets = [0, 64], sizes = [16, 32], strides = [1, 1]} : vector<16x96xf32> to vector<16x32xf32>
    %358 = arith.mulf %356, %338 : vector<16x32xf32>
    %359 = arith.mulf %355, %354 : vector<16x32xf32>
    %360 = arith.addf %358, %359 : vector<16x32xf32>
    %361 = math.tanh %360 : vector<16x32xf32>
    %362 = arith.mulf %357, %361 : vector<16x32xf32>
    %363 = tpu.concatenate %296, %318, %340, %362 in 1 : vector<16x32xf32>, vector<16x32xf32>, vector<16x32xf32>, vector<16x32xf32> -> vector<16x128xf32>
    %c0_75 = arith.constant 0 : index
    %c384 = arith.constant 384 : index
    %364 = vector.load %arg10[%c0_75, %c384] : memref<16x1024xf32, #tpu.memory_space<vmem>>, vector<16x128xf32>
    tpu.vector_store %arg10[%c0_75, %c384], %363 {strides = array<i32>} : memref<16x1024xf32, #tpu.memory_space<vmem>>, vector<16x128xf32>,
    %c0_76 = arith.constant 0 : index
    %c64 = arith.constant 64 : index
    %365 = vector.load %arg1[%c0_76, %c64] : memref<16x128xf32, #tpu.memory_space<vmem>>, vector<16x4xf32>
    %cst_77 = arith.constant dense<0.000000e+00> : vector<16x128xf32>
    %366 = tpu.matmul %365, %0, %cst_77 {dimension_numbers = #tpu.dot_dimension_numbers<[1], [0], [0], [1], [0, 0, 1, 1], [], []>} : vector<16x4xf32>, vector<4x128xf32>, vector<16x128xf32> -> vector<16x128xf32>
    %cst_78 = arith.constant dense<0.000000e+00> : vector<16x128xf32>
    %367 = tpu.matmul %362, %1, %cst_78 {dimension_numbers = #tpu.dot_dimension_numbers<[1], [0], [0], [1], [0, 0, 1, 1], [], []>} : vector<16x32xf32>, vector<32x128xf32>, vector<16x128xf32> -> vector<16x128xf32>
    %368 = arith.addf %366, %367 : vector<16x128xf32>
    %369 = vector.broadcast %2 : vector<1x128xf32> to vector<16x128xf32>
    %370 = arith.addf %368, %369 : vector<16x128xf32>
    %371 = vector.extract_strided_slice %370 {offsets = [0, 0], sizes = [16, 96], strides = [1, 1]} : vector<16x128xf32> to vector<16x96xf32>
    %372 = arith.negf %371 : vector<16x96xf32>
    %373 = math.exp %372 : vector<16x96xf32>
    %cst_79 = arith.constant 1.000000e+00 : f32
    %374 = vector.broadcast %cst_79 : f32 to vector<16x96xf32>
    %375 = arith.addf %374, %373 : vector<16x96xf32>
    %376 = arith.divf %374, %375 : vector<16x96xf32>
    %377 = vector.extract_strided_slice %370 {offsets = [0, 96], sizes = [16, 32], strides = [1, 1]} : vector<16x128xf32> to vector<16x32xf32>
    %378 = math.tanh %377 : vector<16x32xf32>
    %379 = vector.extract_strided_slice %376 {offsets = [0, 0], sizes = [16, 32], strides = [1, 1]} : vector<16x96xf32> to vector<16x32xf32>
    %380 = vector.extract_strided_slice %376 {offsets = [0, 32], sizes = [16, 32], strides = [1, 1]} : vector<16x96xf32> to vector<16x32xf32>
    %381 = vector.extract_strided_slice %376 {offsets = [0, 64], sizes = [16, 32], strides = [1, 1]} : vector<16x96xf32> to vector<16x32xf32>
    %382 = arith.mulf %380, %360 : vector<16x32xf32>
    %383 = arith.mulf %379, %378 : vector<16x32xf32>
    %384 = arith.addf %382, %383 : vector<16x32xf32>
    %385 = math.tanh %384 : vector<16x32xf32>
    %386 = arith.mulf %381, %385 : vector<16x32xf32>
    %c0_80 = arith.constant 0 : index
    %c68 = arith.constant 68 : index
    %387 = vector.load %arg1[%c0_80, %c68] : memref<16x128xf32, #tpu.memory_space<vmem>>, vector<16x4xf32>
    %cst_81 = arith.constant dense<0.000000e+00> : vector<16x128xf32>
    %388 = tpu.matmul %387, %0, %cst_81 {dimension_numbers = #tpu.dot_dimension_numbers<[1], [0], [0], [1], [0, 0, 1, 1], [], []>} : vector<16x4xf32>, vector<4x128xf32>, vector<16x128xf32> -> vector<16x128xf32>
    %cst_82 = arith.constant dense<0.000000e+00> : vector<16x128xf32>
    %389 = tpu.matmul %386, %1, %cst_82 {dimension_numbers = #tpu.dot_dimension_numbers<[1], [0], [0], [1], [0, 0, 1, 1], [], []>} : vector<16x32xf32>, vector<32x128xf32>, vector<16x128xf32> -> vector<16x128xf32>
    %390 = arith.addf %388, %389 : vector<16x128xf32>
    %391 = vector.broadcast %2 : vector<1x128xf32> to vector<16x128xf32>
    %392 = arith.addf %390, %391 : vector<16x128xf32>
    %393 = vector.extract_strided_slice %392 {offsets = [0, 0], sizes = [16, 96], strides = [1, 1]} : vector<16x128xf32> to vector<16x96xf32>
    %394 = arith.negf %393 : vector<16x96xf32>
    %395 = math.exp %394 : vector<16x96xf32>
    %cst_83 = arith.constant 1.000000e+00 : f32
    %396 = vector.broadcast %cst_83 : f32 to vector<16x96xf32>
    %397 = arith.addf %396, %395 : vector<16x96xf32>
    %398 = arith.divf %396, %397 : vector<16x96xf32>
    %399 = vector.extract_strided_slice %392 {offsets = [0, 96], sizes = [16, 32], strides = [1, 1]} : vector<16x128xf32> to vector<16x32xf32>
    %400 = math.tanh %399 : vector<16x32xf32>
    %401 = vector.extract_strided_slice %398 {offsets = [0, 0], sizes = [16, 32], strides = [1, 1]} : vector<16x96xf32> to vector<16x32xf32>
    %402 = vector.extract_strided_slice %398 {offsets = [0, 32], sizes = [16, 32], strides = [1, 1]} : vector<16x96xf32> to vector<16x32xf32>
    %403 = vector.extract_strided_slice %398 {offsets = [0, 64], sizes = [16, 32], strides = [1, 1]} : vector<16x96xf32> to vector<16x32xf32>
    %404 = arith.mulf %402, %384 : vector<16x32xf32>
    %405 = arith.mulf %401, %400 : vector<16x32xf32>
    %406 = arith.addf %404, %405 : vector<16x32xf32>
    %407 = math.tanh %406 : vector<16x32xf32>
    %408 = arith.mulf %403, %407 : vector<16x32xf32>
    %c0_84 = arith.constant 0 : index
    %c72 = arith.constant 72 : index
    %409 = vector.load %arg1[%c0_84, %c72] : memref<16x128xf32, #tpu.memory_space<vmem>>, vector<16x4xf32>
    %cst_85 = arith.constant dense<0.000000e+00> : vector<16x128xf32>
    %410 = tpu.matmul %409, %0, %cst_85 {dimension_numbers = #tpu.dot_dimension_numbers<[1], [0], [0], [1], [0, 0, 1, 1], [], []>} : vector<16x4xf32>, vector<4x128xf32>, vector<16x128xf32> -> vector<16x128xf32>
    %cst_86 = arith.constant dense<0.000000e+00> : vector<16x128xf32>
    %411 = tpu.matmul %408, %1, %cst_86 {dimension_numbers = #tpu.dot_dimension_numbers<[1], [0], [0], [1], [0, 0, 1, 1], [], []>} : vector<16x32xf32>, vector<32x128xf32>, vector<16x128xf32> -> vector<16x128xf32>
    %412 = arith.addf %410, %411 : vector<16x128xf32>
    %413 = vector.broadcast %2 : vector<1x128xf32> to vector<16x128xf32>
    %414 = arith.addf %412, %413 : vector<16x128xf32>
    %415 = vector.extract_strided_slice %414 {offsets = [0, 0], sizes = [16, 96], strides = [1, 1]} : vector<16x128xf32> to vector<16x96xf32>
    %416 = arith.negf %415 : vector<16x96xf32>
    %417 = math.exp %416 : vector<16x96xf32>
    %cst_87 = arith.constant 1.000000e+00 : f32
    %418 = vector.broadcast %cst_87 : f32 to vector<16x96xf32>
    %419 = arith.addf %418, %417 : vector<16x96xf32>
    %420 = arith.divf %418, %419 : vector<16x96xf32>
    %421 = vector.extract_strided_slice %414 {offsets = [0, 96], sizes = [16, 32], strides = [1, 1]} : vector<16x128xf32> to vector<16x32xf32>
    %422 = math.tanh %421 : vector<16x32xf32>
    %423 = vector.extract_strided_slice %420 {offsets = [0, 0], sizes = [16, 32], strides = [1, 1]} : vector<16x96xf32> to vector<16x32xf32>
    %424 = vector.extract_strided_slice %420 {offsets = [0, 32], sizes = [16, 32], strides = [1, 1]} : vector<16x96xf32> to vector<16x32xf32>
    %425 = vector.extract_strided_slice %420 {offsets = [0, 64], sizes = [16, 32], strides = [1, 1]} : vector<16x96xf32> to vector<16x32xf32>
    %426 = arith.mulf %424, %406 : vector<16x32xf32>
    %427 = arith.mulf %423, %422 : vector<16x32xf32>
    %428 = arith.addf %426, %427 : vector<16x32xf32>
    %429 = math.tanh %428 : vector<16x32xf32>
    %430 = arith.mulf %425, %429 : vector<16x32xf32>
    %c0_88 = arith.constant 0 : index
    %c76 = arith.constant 76 : index
    %431 = vector.load %arg1[%c0_88, %c76] : memref<16x128xf32, #tpu.memory_space<vmem>>, vector<16x4xf32>
    %cst_89 = arith.constant dense<0.000000e+00> : vector<16x128xf32>
    %432 = tpu.matmul %431, %0, %cst_89 {dimension_numbers = #tpu.dot_dimension_numbers<[1], [0], [0], [1], [0, 0, 1, 1], [], []>} : vector<16x4xf32>, vector<4x128xf32>, vector<16x128xf32> -> vector<16x128xf32>
    %cst_90 = arith.constant dense<0.000000e+00> : vector<16x128xf32>
    %433 = tpu.matmul %430, %1, %cst_90 {dimension_numbers = #tpu.dot_dimension_numbers<[1], [0], [0], [1], [0, 0, 1, 1], [], []>} : vector<16x32xf32>, vector<32x128xf32>, vector<16x128xf32> -> vector<16x128xf32>
    %434 = arith.addf %432, %433 : vector<16x128xf32>
    %435 = vector.broadcast %2 : vector<1x128xf32> to vector<16x128xf32>
    %436 = arith.addf %434, %435 : vector<16x128xf32>
    %437 = vector.extract_strided_slice %436 {offsets = [0, 0], sizes = [16, 96], strides = [1, 1]} : vector<16x128xf32> to vector<16x96xf32>
    %438 = arith.negf %437 : vector<16x96xf32>
    %439 = math.exp %438 : vector<16x96xf32>
    %cst_91 = arith.constant 1.000000e+00 : f32
    %440 = vector.broadcast %cst_91 : f32 to vector<16x96xf32>
    %441 = arith.addf %440, %439 : vector<16x96xf32>
    %442 = arith.divf %440, %441 : vector<16x96xf32>
    %443 = vector.extract_strided_slice %436 {offsets = [0, 96], sizes = [16, 32], strides = [1, 1]} : vector<16x128xf32> to vector<16x32xf32>
    %444 = math.tanh %443 : vector<16x32xf32>
    %445 = vector.extract_strided_slice %442 {offsets = [0, 0], sizes = [16, 32], strides = [1, 1]} : vector<16x96xf32> to vector<16x32xf32>
    %446 = vector.extract_strided_slice %442 {offsets = [0, 32], sizes = [16, 32], strides = [1, 1]} : vector<16x96xf32> to vector<16x32xf32>
    %447 = vector.extract_strided_slice %442 {offsets = [0, 64], sizes = [16, 32], strides = [1, 1]} : vector<16x96xf32> to vector<16x32xf32>
    %448 = arith.mulf %446, %428 : vector<16x32xf32>
    %449 = arith.mulf %445, %444 : vector<16x32xf32>
    %450 = arith.addf %448, %449 : vector<16x32xf32>
    %451 = math.tanh %450 : vector<16x32xf32>
    %452 = arith.mulf %447, %451 : vector<16x32xf32>
    %453 = tpu.concatenate %386, %408, %430, %452 in 1 : vector<16x32xf32>, vector<16x32xf32>, vector<16x32xf32>, vector<16x32xf32> -> vector<16x128xf32>
    %c0_92 = arith.constant 0 : index
    %c512 = arith.constant 512 : index
    %454 = vector.load %arg10[%c0_92, %c512] : memref<16x1024xf32, #tpu.memory_space<vmem>>, vector<16x128xf32>
    tpu.vector_store %arg10[%c0_92, %c512], %453 {strides = array<i32>} : memref<16x1024xf32, #tpu.memory_space<vmem>>, vector<16x128xf32>,
    %c0_93 = arith.constant 0 : index
    %c80 = arith.constant 80 : index
    %455 = vector.load %arg1[%c0_93, %c80] : memref<16x128xf32, #tpu.memory_space<vmem>>, vector<16x4xf32>
    %cst_94 = arith.constant dense<0.000000e+00> : vector<16x128xf32>
    %456 = tpu.matmul %455, %0, %cst_94 {dimension_numbers = #tpu.dot_dimension_numbers<[1], [0], [0], [1], [0, 0, 1, 1], [], []>} : vector<16x4xf32>, vector<4x128xf32>, vector<16x128xf32> -> vector<16x128xf32>
    %cst_95 = arith.constant dense<0.000000e+00> : vector<16x128xf32>
    %457 = tpu.matmul %452, %1, %cst_95 {dimension_numbers = #tpu.dot_dimension_numbers<[1], [0], [0], [1], [0, 0, 1, 1], [], []>} : vector<16x32xf32>, vector<32x128xf32>, vector<16x128xf32> -> vector<16x128xf32>
    %458 = arith.addf %456, %457 : vector<16x128xf32>
    %459 = vector.broadcast %2 : vector<1x128xf32> to vector<16x128xf32>
    %460 = arith.addf %458, %459 : vector<16x128xf32>
    %461 = vector.extract_strided_slice %460 {offsets = [0, 0], sizes = [16, 96], strides = [1, 1]} : vector<16x128xf32> to vector<16x96xf32>
    %462 = arith.negf %461 : vector<16x96xf32>
    %463 = math.exp %462 : vector<16x96xf32>
    %cst_96 = arith.constant 1.000000e+00 : f32
    %464 = vector.broadcast %cst_96 : f32 to vector<16x96xf32>
    %465 = arith.addf %464, %463 : vector<16x96xf32>
    %466 = arith.divf %464, %465 : vector<16x96xf32>
    %467 = vector.extract_strided_slice %460 {offsets = [0, 96], sizes = [16, 32], strides = [1, 1]} : vector<16x128xf32> to vector<16x32xf32>
    %468 = math.tanh %467 : vector<16x32xf32>
    %469 = vector.extract_strided_slice %466 {offsets = [0, 0], sizes = [16, 32], strides = [1, 1]} : vector<16x96xf32> to vector<16x32xf32>
    %470 = vector.extract_strided_slice %466 {offsets = [0, 32], sizes = [16, 32], strides = [1, 1]} : vector<16x96xf32> to vector<16x32xf32>
    %471 = vector.extract_strided_slice %466 {offsets = [0, 64], sizes = [16, 32], strides = [1, 1]} : vector<16x96xf32> to vector<16x32xf32>
    %472 = arith.mulf %470, %450 : vector<16x32xf32>
    %473 = arith.mulf %469, %468 : vector<16x32xf32>
    %474 = arith.addf %472, %473 : vector<16x32xf32>
    %475 = math.tanh %474 : vector<16x32xf32>
    %476 = arith.mulf %471, %475 : vector<16x32xf32>
    %c0_97 = arith.constant 0 : index
    %c84 = arith.constant 84 : index
    %477 = vector.load %arg1[%c0_97, %c84] : memref<16x128xf32, #tpu.memory_space<vmem>>, vector<16x4xf32>
    %cst_98 = arith.constant dense<0.000000e+00> : vector<16x128xf32>
    %478 = tpu.matmul %477, %0, %cst_98 {dimension_numbers = #tpu.dot_dimension_numbers<[1], [0], [0], [1], [0, 0, 1, 1], [], []>} : vector<16x4xf32>, vector<4x128xf32>, vector<16x128xf32> -> vector<16x128xf32>
    %cst_99 = arith.constant dense<0.000000e+00> : vector<16x128xf32>
    %479 = tpu.matmul %476, %1, %cst_99 {dimension_numbers = #tpu.dot_dimension_numbers<[1], [0], [0], [1], [0, 0, 1, 1], [], []>} : vector<16x32xf32>, vector<32x128xf32>, vector<16x128xf32> -> vector<16x128xf32>
    %480 = arith.addf %478, %479 : vector<16x128xf32>
    %481 = vector.broadcast %2 : vector<1x128xf32> to vector<16x128xf32>
    %482 = arith.addf %480, %481 : vector<16x128xf32>
    %483 = vector.extract_strided_slice %482 {offsets = [0, 0], sizes = [16, 96], strides = [1, 1]} : vector<16x128xf32> to vector<16x96xf32>
    %484 = arith.negf %483 : vector<16x96xf32>
    %485 = math.exp %484 : vector<16x96xf32>
    %cst_100 = arith.constant 1.000000e+00 : f32
    %486 = vector.broadcast %cst_100 : f32 to vector<16x96xf32>
    %487 = arith.addf %486, %485 : vector<16x96xf32>
    %488 = arith.divf %486, %487 : vector<16x96xf32>
    %489 = vector.extract_strided_slice %482 {offsets = [0, 96], sizes = [16, 32], strides = [1, 1]} : vector<16x128xf32> to vector<16x32xf32>
    %490 = math.tanh %489 : vector<16x32xf32>
    %491 = vector.extract_strided_slice %488 {offsets = [0, 0], sizes = [16, 32], strides = [1, 1]} : vector<16x96xf32> to vector<16x32xf32>
    %492 = vector.extract_strided_slice %488 {offsets = [0, 32], sizes = [16, 32], strides = [1, 1]} : vector<16x96xf32> to vector<16x32xf32>
    %493 = vector.extract_strided_slice %488 {offsets = [0, 64], sizes = [16, 32], strides = [1, 1]} : vector<16x96xf32> to vector<16x32xf32>
    %494 = arith.mulf %492, %474 : vector<16x32xf32>
    %495 = arith.mulf %491, %490 : vector<16x32xf32>
    %496 = arith.addf %494, %495 : vector<16x32xf32>
    %497 = math.tanh %496 : vector<16x32xf32>
    %498 = arith.mulf %493, %497 : vector<16x32xf32>
    %c0_101 = arith.constant 0 : index
    %c88 = arith.constant 88 : index
    %499 = vector.load %arg1[%c0_101, %c88] : memref<16x128xf32, #tpu.memory_space<vmem>>, vector<16x4xf32>
    %cst_102 = arith.constant dense<0.000000e+00> : vector<16x128xf32>
    %500 = tpu.matmul %499, %0, %cst_102 {dimension_numbers = #tpu.dot_dimension_numbers<[1], [0], [0], [1], [0, 0, 1, 1], [], []>} : vector<16x4xf32>, vector<4x128xf32>, vector<16x128xf32> -> vector<16x128xf32>
    %cst_103 = arith.constant dense<0.000000e+00> : vector<16x128xf32>
    %501 = tpu.matmul %498, %1, %cst_103 {dimension_numbers = #tpu.dot_dimension_numbers<[1], [0], [0], [1], [0, 0, 1, 1], [], []>} : vector<16x32xf32>, vector<32x128xf32>, vector<16x128xf32> -> vector<16x128xf32>
    %502 = arith.addf %500, %501 : vector<16x128xf32>
    %503 = vector.broadcast %2 : vector<1x128xf32> to vector<16x128xf32>
    %504 = arith.addf %502, %503 : vector<16x128xf32>
    %505 = vector.extract_strided_slice %504 {offsets = [0, 0], sizes = [16, 96], strides = [1, 1]} : vector<16x128xf32> to vector<16x96xf32>
    %506 = arith.negf %505 : vector<16x96xf32>
    %507 = math.exp %506 : vector<16x96xf32>
    %cst_104 = arith.constant 1.000000e+00 : f32
    %508 = vector.broadcast %cst_104 : f32 to vector<16x96xf32>
    %509 = arith.addf %508, %507 : vector<16x96xf32>
    %510 = arith.divf %508, %509 : vector<16x96xf32>
    %511 = vector.extract_strided_slice %504 {offsets = [0, 96], sizes = [16, 32], strides = [1, 1]} : vector<16x128xf32> to vector<16x32xf32>
    %512 = math.tanh %511 : vector<16x32xf32>
    %513 = vector.extract_strided_slice %510 {offsets = [0, 0], sizes = [16, 32], strides = [1, 1]} : vector<16x96xf32> to vector<16x32xf32>
    %514 = vector.extract_strided_slice %510 {offsets = [0, 32], sizes = [16, 32], strides = [1, 1]} : vector<16x96xf32> to vector<16x32xf32>
    %515 = vector.extract_strided_slice %510 {offsets = [0, 64], sizes = [16, 32], strides = [1, 1]} : vector<16x96xf32> to vector<16x32xf32>
    %516 = arith.mulf %514, %496 : vector<16x32xf32>
    %517 = arith.mulf %513, %512 : vector<16x32xf32>
    %518 = arith.addf %516, %517 : vector<16x32xf32>
    %519 = math.tanh %518 : vector<16x32xf32>
    %520 = arith.mulf %515, %519 : vector<16x32xf32>
    %c0_105 = arith.constant 0 : index
    %c92 = arith.constant 92 : index
    %521 = vector.load %arg1[%c0_105, %c92] : memref<16x128xf32, #tpu.memory_space<vmem>>, vector<16x4xf32>
    %cst_106 = arith.constant dense<0.000000e+00> : vector<16x128xf32>
    %522 = tpu.matmul %521, %0, %cst_106 {dimension_numbers = #tpu.dot_dimension_numbers<[1], [0], [0], [1], [0, 0, 1, 1], [], []>} : vector<16x4xf32>, vector<4x128xf32>, vector<16x128xf32> -> vector<16x128xf32>
    %cst_107 = arith.constant dense<0.000000e+00> : vector<16x128xf32>
    %523 = tpu.matmul %520, %1, %cst_107 {dimension_numbers = #tpu.dot_dimension_numbers<[1], [0], [0], [1], [0, 0, 1, 1], [], []>} : vector<16x32xf32>, vector<32x128xf32>, vector<16x128xf32> -> vector<16x128xf32>
    %524 = arith.addf %522, %523 : vector<16x128xf32>
    %525 = vector.broadcast %2 : vector<1x128xf32> to vector<16x128xf32>
    %526 = arith.addf %524, %525 : vector<16x128xf32>
    %527 = vector.extract_strided_slice %526 {offsets = [0, 0], sizes = [16, 96], strides = [1, 1]} : vector<16x128xf32> to vector<16x96xf32>
    %528 = arith.negf %527 : vector<16x96xf32>
    %529 = math.exp %528 : vector<16x96xf32>
    %cst_108 = arith.constant 1.000000e+00 : f32
    %530 = vector.broadcast %cst_108 : f32 to vector<16x96xf32>
    %531 = arith.addf %530, %529 : vector<16x96xf32>
    %532 = arith.divf %530, %531 : vector<16x96xf32>
    %533 = vector.extract_strided_slice %526 {offsets = [0, 96], sizes = [16, 32], strides = [1, 1]} : vector<16x128xf32> to vector<16x32xf32>
    %534 = math.tanh %533 : vector<16x32xf32>
    %535 = vector.extract_strided_slice %532 {offsets = [0, 0], sizes = [16, 32], strides = [1, 1]} : vector<16x96xf32> to vector<16x32xf32>
    %536 = vector.extract_strided_slice %532 {offsets = [0, 32], sizes = [16, 32], strides = [1, 1]} : vector<16x96xf32> to vector<16x32xf32>
    %537 = vector.extract_strided_slice %532 {offsets = [0, 64], sizes = [16, 32], strides = [1, 1]} : vector<16x96xf32> to vector<16x32xf32>
    %538 = arith.mulf %536, %518 : vector<16x32xf32>
    %539 = arith.mulf %535, %534 : vector<16x32xf32>
    %540 = arith.addf %538, %539 : vector<16x32xf32>
    %541 = math.tanh %540 : vector<16x32xf32>
    %542 = arith.mulf %537, %541 : vector<16x32xf32>
    %543 = tpu.concatenate %476, %498, %520, %542 in 1 : vector<16x32xf32>, vector<16x32xf32>, vector<16x32xf32>, vector<16x32xf32> -> vector<16x128xf32>
    %c0_109 = arith.constant 0 : index
    %c640 = arith.constant 640 : index
    %544 = vector.load %arg10[%c0_109, %c640] : memref<16x1024xf32, #tpu.memory_space<vmem>>, vector<16x128xf32>
    tpu.vector_store %arg10[%c0_109, %c640], %543 {strides = array<i32>} : memref<16x1024xf32, #tpu.memory_space<vmem>>, vector<16x128xf32>,
    %c0_110 = arith.constant 0 : index
    %c96 = arith.constant 96 : index
    %545 = vector.load %arg1[%c0_110, %c96] : memref<16x128xf32, #tpu.memory_space<vmem>>, vector<16x4xf32>
    %cst_111 = arith.constant dense<0.000000e+00> : vector<16x128xf32>
    %546 = tpu.matmul %545, %0, %cst_111 {dimension_numbers = #tpu.dot_dimension_numbers<[1], [0], [0], [1], [0, 0, 1, 1], [], []>} : vector<16x4xf32>, vector<4x128xf32>, vector<16x128xf32> -> vector<16x128xf32>
    %cst_112 = arith.constant dense<0.000000e+00> : vector<16x128xf32>
    %547 = tpu.matmul %542, %1, %cst_112 {dimension_numbers = #tpu.dot_dimension_numbers<[1], [0], [0], [1], [0, 0, 1, 1], [], []>} : vector<16x32xf32>, vector<32x128xf32>, vector<16x128xf32> -> vector<16x128xf32>
    %548 = arith.addf %546, %547 : vector<16x128xf32>
    %549 = vector.broadcast %2 : vector<1x128xf32> to vector<16x128xf32>
    %550 = arith.addf %548, %549 : vector<16x128xf32>
    %551 = vector.extract_strided_slice %550 {offsets = [0, 0], sizes = [16, 96], strides = [1, 1]} : vector<16x128xf32> to vector<16x96xf32>
    %552 = arith.negf %551 : vector<16x96xf32>
    %553 = math.exp %552 : vector<16x96xf32>
    %cst_113 = arith.constant 1.000000e+00 : f32
    %554 = vector.broadcast %cst_113 : f32 to vector<16x96xf32>
    %555 = arith.addf %554, %553 : vector<16x96xf32>
    %556 = arith.divf %554, %555 : vector<16x96xf32>
    %557 = vector.extract_strided_slice %550 {offsets = [0, 96], sizes = [16, 32], strides = [1, 1]} : vector<16x128xf32> to vector<16x32xf32>
    %558 = math.tanh %557 : vector<16x32xf32>
    %559 = vector.extract_strided_slice %556 {offsets = [0, 0], sizes = [16, 32], strides = [1, 1]} : vector<16x96xf32> to vector<16x32xf32>
    %560 = vector.extract_strided_slice %556 {offsets = [0, 32], sizes = [16, 32], strides = [1, 1]} : vector<16x96xf32> to vector<16x32xf32>
    %561 = vector.extract_strided_slice %556 {offsets = [0, 64], sizes = [16, 32], strides = [1, 1]} : vector<16x96xf32> to vector<16x32xf32>
    %562 = arith.mulf %560, %540 : vector<16x32xf32>
    %563 = arith.mulf %559, %558 : vector<16x32xf32>
    %564 = arith.addf %562, %563 : vector<16x32xf32>
    %565 = math.tanh %564 : vector<16x32xf32>
    %566 = arith.mulf %561, %565 : vector<16x32xf32>
    %c0_114 = arith.constant 0 : index
    %c100 = arith.constant 100 : index
    %567 = vector.load %arg1[%c0_114, %c100] : memref<16x128xf32, #tpu.memory_space<vmem>>, vector<16x4xf32>
    %cst_115 = arith.constant dense<0.000000e+00> : vector<16x128xf32>
    %568 = tpu.matmul %567, %0, %cst_115 {dimension_numbers = #tpu.dot_dimension_numbers<[1], [0], [0], [1], [0, 0, 1, 1], [], []>} : vector<16x4xf32>, vector<4x128xf32>, vector<16x128xf32> -> vector<16x128xf32>
    %cst_116 = arith.constant dense<0.000000e+00> : vector<16x128xf32>
    %569 = tpu.matmul %566, %1, %cst_116 {dimension_numbers = #tpu.dot_dimension_numbers<[1], [0], [0], [1], [0, 0, 1, 1], [], []>} : vector<16x32xf32>, vector<32x128xf32>, vector<16x128xf32> -> vector<16x128xf32>
    %570 = arith.addf %568, %569 : vector<16x128xf32>
    %571 = vector.broadcast %2 : vector<1x128xf32> to vector<16x128xf32>
    %572 = arith.addf %570, %571 : vector<16x128xf32>
    %573 = vector.extract_strided_slice %572 {offsets = [0, 0], sizes = [16, 96], strides = [1, 1]} : vector<16x128xf32> to vector<16x96xf32>
    %574 = arith.negf %573 : vector<16x96xf32>
    %575 = math.exp %574 : vector<16x96xf32>
    %cst_117 = arith.constant 1.000000e+00 : f32
    %576 = vector.broadcast %cst_117 : f32 to vector<16x96xf32>
    %577 = arith.addf %576, %575 : vector<16x96xf32>
    %578 = arith.divf %576, %577 : vector<16x96xf32>
    %579 = vector.extract_strided_slice %572 {offsets = [0, 96], sizes = [16, 32], strides = [1, 1]} : vector<16x128xf32> to vector<16x32xf32>
    %580 = math.tanh %579 : vector<16x32xf32>
    %581 = vector.extract_strided_slice %578 {offsets = [0, 0], sizes = [16, 32], strides = [1, 1]} : vector<16x96xf32> to vector<16x32xf32>
    %582 = vector.extract_strided_slice %578 {offsets = [0, 32], sizes = [16, 32], strides = [1, 1]} : vector<16x96xf32> to vector<16x32xf32>
    %583 = vector.extract_strided_slice %578 {offsets = [0, 64], sizes = [16, 32], strides = [1, 1]} : vector<16x96xf32> to vector<16x32xf32>
    %584 = arith.mulf %582, %564 : vector<16x32xf32>
    %585 = arith.mulf %581, %580 : vector<16x32xf32>
    %586 = arith.addf %584, %585 : vector<16x32xf32>
    %587 = math.tanh %586 : vector<16x32xf32>
    %588 = arith.mulf %583, %587 : vector<16x32xf32>
    %c0_118 = arith.constant 0 : index
    %c104 = arith.constant 104 : index
    %589 = vector.load %arg1[%c0_118, %c104] : memref<16x128xf32, #tpu.memory_space<vmem>>, vector<16x4xf32>
    %cst_119 = arith.constant dense<0.000000e+00> : vector<16x128xf32>
    %590 = tpu.matmul %589, %0, %cst_119 {dimension_numbers = #tpu.dot_dimension_numbers<[1], [0], [0], [1], [0, 0, 1, 1], [], []>} : vector<16x4xf32>, vector<4x128xf32>, vector<16x128xf32> -> vector<16x128xf32>
    %cst_120 = arith.constant dense<0.000000e+00> : vector<16x128xf32>
    %591 = tpu.matmul %588, %1, %cst_120 {dimension_numbers = #tpu.dot_dimension_numbers<[1], [0], [0], [1], [0, 0, 1, 1], [], []>} : vector<16x32xf32>, vector<32x128xf32>, vector<16x128xf32> -> vector<16x128xf32>
    %592 = arith.addf %590, %591 : vector<16x128xf32>
    %593 = vector.broadcast %2 : vector<1x128xf32> to vector<16x128xf32>
    %594 = arith.addf %592, %593 : vector<16x128xf32>
    %595 = vector.extract_strided_slice %594 {offsets = [0, 0], sizes = [16, 96], strides = [1, 1]} : vector<16x128xf32> to vector<16x96xf32>
    %596 = arith.negf %595 : vector<16x96xf32>
    %597 = math.exp %596 : vector<16x96xf32>
    %cst_121 = arith.constant 1.000000e+00 : f32
    %598 = vector.broadcast %cst_121 : f32 to vector<16x96xf32>
    %599 = arith.addf %598, %597 : vector<16x96xf32>
    %600 = arith.divf %598, %599 : vector<16x96xf32>
    %601 = vector.extract_strided_slice %594 {offsets = [0, 96], sizes = [16, 32], strides = [1, 1]} : vector<16x128xf32> to vector<16x32xf32>
    %602 = math.tanh %601 : vector<16x32xf32>
    %603 = vector.extract_strided_slice %600 {offsets = [0, 0], sizes = [16, 32], strides = [1, 1]} : vector<16x96xf32> to vector<16x32xf32>
    %604 = vector.extract_strided_slice %600 {offsets = [0, 32], sizes = [16, 32], strides = [1, 1]} : vector<16x96xf32> to vector<16x32xf32>
    %605 = vector.extract_strided_slice %600 {offsets = [0, 64], sizes = [16, 32], strides = [1, 1]} : vector<16x96xf32> to vector<16x32xf32>
    %606 = arith.mulf %604, %586 : vector<16x32xf32>
    %607 = arith.mulf %603, %602 : vector<16x32xf32>
    %608 = arith.addf %606, %607 : vector<16x32xf32>
    %609 = math.tanh %608 : vector<16x32xf32>
    %610 = arith.mulf %605, %609 : vector<16x32xf32>
    %c0_122 = arith.constant 0 : index
    %c108 = arith.constant 108 : index
    %611 = vector.load %arg1[%c0_122, %c108] : memref<16x128xf32, #tpu.memory_space<vmem>>, vector<16x4xf32>
    %cst_123 = arith.constant dense<0.000000e+00> : vector<16x128xf32>
    %612 = tpu.matmul %611, %0, %cst_123 {dimension_numbers = #tpu.dot_dimension_numbers<[1], [0], [0], [1], [0, 0, 1, 1], [], []>} : vector<16x4xf32>, vector<4x128xf32>, vector<16x128xf32> -> vector<16x128xf32>
    %cst_124 = arith.constant dense<0.000000e+00> : vector<16x128xf32>
    %613 = tpu.matmul %610, %1, %cst_124 {dimension_numbers = #tpu.dot_dimension_numbers<[1], [0], [0], [1], [0, 0, 1, 1], [], []>} : vector<16x32xf32>, vector<32x128xf32>, vector<16x128xf32> -> vector<16x128xf32>
    %614 = arith.addf %612, %613 : vector<16x128xf32>
    %615 = vector.broadcast %2 : vector<1x128xf32> to vector<16x128xf32>
    %616 = arith.addf %614, %615 : vector<16x128xf32>
    %617 = vector.extract_strided_slice %616 {offsets = [0, 0], sizes = [16, 96], strides = [1, 1]} : vector<16x128xf32> to vector<16x96xf32>
    %618 = arith.negf %617 : vector<16x96xf32>
    %619 = math.exp %618 : vector<16x96xf32>
    %cst_125 = arith.constant 1.000000e+00 : f32
    %620 = vector.broadcast %cst_125 : f32 to vector<16x96xf32>
    %621 = arith.addf %620, %619 : vector<16x96xf32>
    %622 = arith.divf %620, %621 : vector<16x96xf32>
    %623 = vector.extract_strided_slice %616 {offsets = [0, 96], sizes = [16, 32], strides = [1, 1]} : vector<16x128xf32> to vector<16x32xf32>
    %624 = math.tanh %623 : vector<16x32xf32>
    %625 = vector.extract_strided_slice %622 {offsets = [0, 0], sizes = [16, 32], strides = [1, 1]} : vector<16x96xf32> to vector<16x32xf32>
    %626 = vector.extract_strided_slice %622 {offsets = [0, 32], sizes = [16, 32], strides = [1, 1]} : vector<16x96xf32> to vector<16x32xf32>
    %627 = vector.extract_strided_slice %622 {offsets = [0, 64], sizes = [16, 32], strides = [1, 1]} : vector<16x96xf32> to vector<16x32xf32>
    %628 = arith.mulf %626, %608 : vector<16x32xf32>
    %629 = arith.mulf %625, %624 : vector<16x32xf32>
    %630 = arith.addf %628, %629 : vector<16x32xf32>
    %631 = math.tanh %630 : vector<16x32xf32>
    %632 = arith.mulf %627, %631 : vector<16x32xf32>
    %633 = tpu.concatenate %566, %588, %610, %632 in 1 : vector<16x32xf32>, vector<16x32xf32>, vector<16x32xf32>, vector<16x32xf32> -> vector<16x128xf32>
    %c0_126 = arith.constant 0 : index
    %c768 = arith.constant 768 : index
    %634 = vector.load %arg10[%c0_126, %c768] : memref<16x1024xf32, #tpu.memory_space<vmem>>, vector<16x128xf32>
    tpu.vector_store %arg10[%c0_126, %c768], %633 {strides = array<i32>} : memref<16x1024xf32, #tpu.memory_space<vmem>>, vector<16x128xf32>,
    %c0_127 = arith.constant 0 : index
    %c112 = arith.constant 112 : index
    %635 = vector.load %arg1[%c0_127, %c112] : memref<16x128xf32, #tpu.memory_space<vmem>>, vector<16x4xf32>
    %cst_128 = arith.constant dense<0.000000e+00> : vector<16x128xf32>
    %636 = tpu.matmul %635, %0, %cst_128 {dimension_numbers = #tpu.dot_dimension_numbers<[1], [0], [0], [1], [0, 0, 1, 1], [], []>} : vector<16x4xf32>, vector<4x128xf32>, vector<16x128xf32> -> vector<16x128xf32>
    %cst_129 = arith.constant dense<0.000000e+00> : vector<16x128xf32>
    %637 = tpu.matmul %632, %1, %cst_129 {dimension_numbers = #tpu.dot_dimension_numbers<[1], [0], [0], [1], [0, 0, 1, 1], [], []>} : vector<16x32xf32>, vector<32x128xf32>, vector<16x128xf32> -> vector<16x128xf32>
    %638 = arith.addf %636, %637 : vector<16x128xf32>
    %639 = vector.broadcast %2 : vector<1x128xf32> to vector<16x128xf32>
    %640 = arith.addf %638, %639 : vector<16x128xf32>
    %641 = vector.extract_strided_slice %640 {offsets = [0, 0], sizes = [16, 96], strides = [1, 1]} : vector<16x128xf32> to vector<16x96xf32>
    %642 = arith.negf %641 : vector<16x96xf32>
    %643 = math.exp %642 : vector<16x96xf32>
    %cst_130 = arith.constant 1.000000e+00 : f32
    %644 = vector.broadcast %cst_130 : f32 to vector<16x96xf32>
    %645 = arith.addf %644, %643 : vector<16x96xf32>
    %646 = arith.divf %644, %645 : vector<16x96xf32>
    %647 = vector.extract_strided_slice %640 {offsets = [0, 96], sizes = [16, 32], strides = [1, 1]} : vector<16x128xf32> to vector<16x32xf32>
    %648 = math.tanh %647 : vector<16x32xf32>
    %649 = vector.extract_strided_slice %646 {offsets = [0, 0], sizes = [16, 32], strides = [1, 1]} : vector<16x96xf32> to vector<16x32xf32>
    %650 = vector.extract_strided_slice %646 {offsets = [0, 32], sizes = [16, 32], strides = [1, 1]} : vector<16x96xf32> to vector<16x32xf32>
    %651 = vector.extract_strided_slice %646 {offsets = [0, 64], sizes = [16, 32], strides = [1, 1]} : vector<16x96xf32> to vector<16x32xf32>
    %652 = arith.mulf %650, %630 : vector<16x32xf32>
    %653 = arith.mulf %649, %648 : vector<16x32xf32>
    %654 = arith.addf %652, %653 : vector<16x32xf32>
    %655 = math.tanh %654 : vector<16x32xf32>
    %656 = arith.mulf %651, %655 : vector<16x32xf32>
    %c0_131 = arith.constant 0 : index
    %c116 = arith.constant 116 : index
    %657 = vector.load %arg1[%c0_131, %c116] : memref<16x128xf32, #tpu.memory_space<vmem>>, vector<16x4xf32>
    %cst_132 = arith.constant dense<0.000000e+00> : vector<16x128xf32>
    %658 = tpu.matmul %657, %0, %cst_132 {dimension_numbers = #tpu.dot_dimension_numbers<[1], [0], [0], [1], [0, 0, 1, 1], [], []>} : vector<16x4xf32>, vector<4x128xf32>, vector<16x128xf32> -> vector<16x128xf32>
    %cst_133 = arith.constant dense<0.000000e+00> : vector<16x128xf32>
    %659 = tpu.matmul %656, %1, %cst_133 {dimension_numbers = #tpu.dot_dimension_numbers<[1], [0], [0], [1], [0, 0, 1, 1], [], []>} : vector<16x32xf32>, vector<32x128xf32>, vector<16x128xf32> -> vector<16x128xf32>
    %660 = arith.addf %658, %659 : vector<16x128xf32>
    %661 = vector.broadcast %2 : vector<1x128xf32> to vector<16x128xf32>
    %662 = arith.addf %660, %661 : vector<16x128xf32>
    %663 = vector.extract_strided_slice %662 {offsets = [0, 0], sizes = [16, 96], strides = [1, 1]} : vector<16x128xf32> to vector<16x96xf32>
    %664 = arith.negf %663 : vector<16x96xf32>
    %665 = math.exp %664 : vector<16x96xf32>
    %cst_134 = arith.constant 1.000000e+00 : f32
    %666 = vector.broadcast %cst_134 : f32 to vector<16x96xf32>
    %667 = arith.addf %666, %665 : vector<16x96xf32>
    %668 = arith.divf %666, %667 : vector<16x96xf32>
    %669 = vector.extract_strided_slice %662 {offsets = [0, 96], sizes = [16, 32], strides = [1, 1]} : vector<16x128xf32> to vector<16x32xf32>
    %670 = math.tanh %669 : vector<16x32xf32>
    %671 = vector.extract_strided_slice %668 {offsets = [0, 0], sizes = [16, 32], strides = [1, 1]} : vector<16x96xf32> to vector<16x32xf32>
    %672 = vector.extract_strided_slice %668 {offsets = [0, 32], sizes = [16, 32], strides = [1, 1]} : vector<16x96xf32> to vector<16x32xf32>
    %673 = vector.extract_strided_slice %668 {offsets = [0, 64], sizes = [16, 32], strides = [1, 1]} : vector<16x96xf32> to vector<16x32xf32>
    %674 = arith.mulf %672, %654 : vector<16x32xf32>
    %675 = arith.mulf %671, %670 : vector<16x32xf32>
    %676 = arith.addf %674, %675 : vector<16x32xf32>
    %677 = math.tanh %676 : vector<16x32xf32>
    %678 = arith.mulf %673, %677 : vector<16x32xf32>
    %c0_135 = arith.constant 0 : index
    %c120 = arith.constant 120 : index
    %679 = vector.load %arg1[%c0_135, %c120] : memref<16x128xf32, #tpu.memory_space<vmem>>, vector<16x4xf32>
    %cst_136 = arith.constant dense<0.000000e+00> : vector<16x128xf32>
    %680 = tpu.matmul %679, %0, %cst_136 {dimension_numbers = #tpu.dot_dimension_numbers<[1], [0], [0], [1], [0, 0, 1, 1], [], []>} : vector<16x4xf32>, vector<4x128xf32>, vector<16x128xf32> -> vector<16x128xf32>
    %cst_137 = arith.constant dense<0.000000e+00> : vector<16x128xf32>
    %681 = tpu.matmul %678, %1, %cst_137 {dimension_numbers = #tpu.dot_dimension_numbers<[1], [0], [0], [1], [0, 0, 1, 1], [], []>} : vector<16x32xf32>, vector<32x128xf32>, vector<16x128xf32> -> vector<16x128xf32>
    %682 = arith.addf %680, %681 : vector<16x128xf32>
    %683 = vector.broadcast %2 : vector<1x128xf32> to vector<16x128xf32>
    %684 = arith.addf %682, %683 : vector<16x128xf32>
    %685 = vector.extract_strided_slice %684 {offsets = [0, 0], sizes = [16, 96], strides = [1, 1]} : vector<16x128xf32> to vector<16x96xf32>
    %686 = arith.negf %685 : vector<16x96xf32>
    %687 = math.exp %686 : vector<16x96xf32>
    %cst_138 = arith.constant 1.000000e+00 : f32
    %688 = vector.broadcast %cst_138 : f32 to vector<16x96xf32>
    %689 = arith.addf %688, %687 : vector<16x96xf32>
    %690 = arith.divf %688, %689 : vector<16x96xf32>
    %691 = vector.extract_strided_slice %684 {offsets = [0, 96], sizes = [16, 32], strides = [1, 1]} : vector<16x128xf32> to vector<16x32xf32>
    %692 = math.tanh %691 : vector<16x32xf32>
    %693 = vector.extract_strided_slice %690 {offsets = [0, 0], sizes = [16, 32], strides = [1, 1]} : vector<16x96xf32> to vector<16x32xf32>
    %694 = vector.extract_strided_slice %690 {offsets = [0, 32], sizes = [16, 32], strides = [1, 1]} : vector<16x96xf32> to vector<16x32xf32>
    %695 = vector.extract_strided_slice %690 {offsets = [0, 64], sizes = [16, 32], strides = [1, 1]} : vector<16x96xf32> to vector<16x32xf32>
    %696 = arith.mulf %694, %676 : vector<16x32xf32>
    %697 = arith.mulf %693, %692 : vector<16x32xf32>
    %698 = arith.addf %696, %697 : vector<16x32xf32>
    %699 = math.tanh %698 : vector<16x32xf32>
    %700 = arith.mulf %695, %699 : vector<16x32xf32>
    %c0_139 = arith.constant 0 : index
    %c124 = arith.constant 124 : index
    %701 = vector.load %arg1[%c0_139, %c124] : memref<16x128xf32, #tpu.memory_space<vmem>>, vector<16x4xf32>
    %cst_140 = arith.constant dense<0.000000e+00> : vector<16x128xf32>
    %702 = tpu.matmul %701, %0, %cst_140 {dimension_numbers = #tpu.dot_dimension_numbers<[1], [0], [0], [1], [0, 0, 1, 1], [], []>} : vector<16x4xf32>, vector<4x128xf32>, vector<16x128xf32> -> vector<16x128xf32>
    %cst_141 = arith.constant dense<0.000000e+00> : vector<16x128xf32>
    %703 = tpu.matmul %700, %1, %cst_141 {dimension_numbers = #tpu.dot_dimension_numbers<[1], [0], [0], [1], [0, 0, 1, 1], [], []>} : vector<16x32xf32>, vector<32x128xf32>, vector<16x128xf32> -> vector<16x128xf32>
    %704 = arith.addf %702, %703 : vector<16x128xf32>
    %705 = vector.broadcast %2 : vector<1x128xf32> to vector<16x128xf32>
    %706 = arith.addf %704, %705 : vector<16x128xf32>
    %707 = vector.extract_strided_slice %706 {offsets = [0, 0], sizes = [16, 96], strides = [1, 1]} : vector<16x128xf32> to vector<16x96xf32>
    %708 = arith.negf %707 : vector<16x96xf32>
    %709 = math.exp %708 : vector<16x96xf32>
    %cst_142 = arith.constant 1.000000e+00 : f32
    %710 = vector.broadcast %cst_142 : f32 to vector<16x96xf32>
    %711 = arith.addf %710, %709 : vector<16x96xf32>
    %712 = arith.divf %710, %711 : vector<16x96xf32>
    %713 = vector.extract_strided_slice %706 {offsets = [0, 96], sizes = [16, 32], strides = [1, 1]} : vector<16x128xf32> to vector<16x32xf32>
    %714 = math.tanh %713 : vector<16x32xf32>
    %715 = vector.extract_strided_slice %712 {offsets = [0, 0], sizes = [16, 32], strides = [1, 1]} : vector<16x96xf32> to vector<16x32xf32>
    %716 = vector.extract_strided_slice %712 {offsets = [0, 32], sizes = [16, 32], strides = [1, 1]} : vector<16x96xf32> to vector<16x32xf32>
    %717 = vector.extract_strided_slice %712 {offsets = [0, 64], sizes = [16, 32], strides = [1, 1]} : vector<16x96xf32> to vector<16x32xf32>
    %718 = arith.mulf %716, %698 : vector<16x32xf32>
    %719 = arith.mulf %715, %714 : vector<16x32xf32>
    %720 = arith.addf %718, %719 : vector<16x32xf32>
    %721 = math.tanh %720 : vector<16x32xf32>
    %722 = arith.mulf %717, %721 : vector<16x32xf32>
    %723 = tpu.concatenate %656, %678, %700, %722 in 1 : vector<16x32xf32>, vector<16x32xf32>, vector<16x32xf32>, vector<16x32xf32> -> vector<16x128xf32>
    %c0_143 = arith.constant 0 : index
    %c896 = arith.constant 896 : index
    %724 = vector.load %arg10[%c0_143, %c896] : memref<16x1024xf32, #tpu.memory_space<vmem>>, vector<16x128xf32>
    tpu.vector_store %arg10[%c0_143, %c896], %723 {strides = array<i32>} : memref<16x1024xf32, #tpu.memory_space<vmem>>, vector<16x128xf32>,
    %c0_144 = arith.constant 0 : index
    %c0_145 = arith.constant 0 : index
    %725 = vector.load %arg1[%c0_144, %c0_145] : memref<16x128xf32, #tpu.memory_space<vmem>>, vector<16x128xf32>
    %c0_146 = arith.constant 0 : index
    %c0_147 = arith.constant 0 : index
    %726 = vector.load %arg10[%c0_146, %c0_147] : memref<16x1024xf32, #tpu.memory_space<vmem>>, vector<16x1024xf32>
    %c0_148 = arith.constant 0 : index
    %c0_149 = arith.constant 0 : index
    %727 = vector.load %arg5[%c0_148, %c0_149] : memref<1024x128xf32, #tpu.memory_space<vmem>>, vector<1024x128xf32>
    %cst_150 = arith.constant dense<0.000000e+00> : vector<16x128xf32>
    %728 = tpu.matmul %726, %727, %cst_150 {dimension_numbers = #tpu.dot_dimension_numbers<[1], [0], [0], [1], [0, 0, 1, 1], [], []>} : vector<16x1024xf32>, vector<1024x128xf32>, vector<16x128xf32> -> vector<16x128xf32>
    %c0_151 = arith.constant 0 : index
    %c0_152 = arith.constant 0 : index
    %729 = vector.load %arg6[%c0_151, %c0_152] : memref<1x128xf32, #tpu.memory_space<vmem>>, vector<1x128xf32>
    %730 = vector.broadcast %729 : vector<1x128xf32> to vector<16x128xf32>
    %731 = arith.addf %728, %730 : vector<16x128xf32>
    %732 = arith.negf %731 : vector<16x128xf32>
    %733 = math.exp %732 : vector<16x128xf32>
    %cst_153 = arith.constant 1.000000e+00 : f32
    %734 = vector.broadcast %cst_153 : f32 to vector<16x128xf32>
    %735 = arith.addf %734, %733 : vector<16x128xf32>
    %736 = arith.divf %734, %735 : vector<16x128xf32>
    %737 = arith.mulf %736, %725 : vector<16x128xf32>
    %c0_154 = arith.constant 0 : index
    %c0_155 = arith.constant 0 : index
    %738 = vector.load %arg7[%c0_154, %c0_155] : memref<128x128xf32, #tpu.memory_space<vmem>>, vector<128x128xf32>
    %cst_156 = arith.constant dense<0.000000e+00> : vector<16x128xf32>
    %739 = tpu.matmul %737, %738, %cst_156 {dimension_numbers = #tpu.dot_dimension_numbers<[1], [0], [0], [1], [0, 0, 1, 1], [], []>} : vector<16x128xf32>, vector<128x128xf32>, vector<16x128xf32> -> vector<16x128xf32>
    %c0_157 = arith.constant 0 : index
    %c0_158 = arith.constant 0 : index
    %740 = vector.load %arg8[%c0_157, %c0_158] : memref<1x128xf32, #tpu.memory_space<vmem>>, vector<1x128xf32>
    %741 = vector.broadcast %740 : vector<1x128xf32> to vector<16x128xf32>
    %742 = arith.addf %739, %741 : vector<16x128xf32>
    %c0_159 = arith.constant 0 : index
    %c0_160 = arith.constant 0 : index
    %743 = vector.load %arg9[%c0_159, %c0_160] : memref<16x128xf32, #tpu.memory_space<vmem>>, vector<16x128xf32>
    tpu.vector_store %arg9[%c0_159, %c0_160], %742 {strides = array<i32>} : memref<16x128xf32, #tpu.memory_space<vmem>>, vector<16x128xf32>,
    return
  }
  func.func @transform_0(%arg0: i32) -> (i32, i32) {
    %c0_i32 = arith.constant 0 : i32
    %c0_i32_0 = arith.constant 0 : i32
    return %arg0, %c0_i32 : i32, i32
  }
  func.func @transform_1(%arg0: i32) -> (i32, i32) {
    %c0_i32 = arith.constant 0 : i32
    %c0_i32_0 = arith.constant 0 : i32
    %c0_i32_1 = arith.constant 0 : i32
    return %c0_i32, %c0_i32_0 : i32, i32
  }
  func.func @transform_2(%arg0: i32) -> (i32, i32) {
    %c0_i32 = arith.constant 0 : i32
    %c0_i32_0 = arith.constant 0 : i32
    %c0_i32_1 = arith.constant 0 : i32
    return %c0_i32, %c0_i32_0 : i32, i32
  }
  func.func @transform_3(%arg0: i32) -> (i32, i32) {
    %c0_i32 = arith.constant 0 : i32
    %c0_i32_0 = arith.constant 0 : i32
    %c0_i32_1 = arith.constant 0 : i32
    return %c0_i32, %c0_i32_0 : i32, i32
  }
  func.func @transform_4(%arg0: i32) -> (i32, i32) {
    %c0_i32 = arith.constant 0 : i32
    %c0_i32_0 = arith.constant 0 : i32
    %c0_i32_1 = arith.constant 0 : i32
    return %c0_i32, %c0_i32_0 : i32, i32
  }
  func.func @transform_5(%arg0: i32) -> (i32, i32) {
    %c0_i32 = arith.constant 0 : i32
    %c0_i32_0 = arith.constant 0 : i32
    %c0_i32_1 = arith.constant 0 : i32
    return %c0_i32, %c0_i32_0 : i32, i32
  }
  func.func @transform_6(%arg0: i32) -> (i32, i32) {
    %c0_i32 = arith.constant 0 : i32
    %c0_i32_0 = arith.constant 0 : i32
    %c0_i32_1 = arith.constant 0 : i32
    return %c0_i32, %c0_i32_0 : i32, i32
  }
  func.func @transform_7(%arg0: i32) -> (i32, i32) {
    %c0_i32 = arith.constant 0 : i32
    %c0_i32_0 = arith.constant 0 : i32
    %c0_i32_1 = arith.constant 0 : i32
    return %c0_i32, %c0_i32_0 : i32, i32
  }
  func.func @transform_8(%arg0: i32) -> (i32, i32) {
    %c0_i32 = arith.constant 0 : i32
    %c0_i32_0 = arith.constant 0 : i32
    return %arg0, %c0_i32 : i32, i32
  }
}

</mosaic_0001>

<bundles_post_ra>
// kernel: tpu_custom_call.1
= control target key start
LH: loop header
LB: loop body
LE: loop exit
PB: predicated region body
PF: predicated region fallthrough
CT: control target
= control target key end

     0   :  { %13 = vsyncpa [#allocation4], 0  ;;  %s11758_s0 = inlined_call_operand.hbm [shape: f32[16,128], index: 0, kind: input, shape index: {}]   ;;  %s11759_s1 = inlined_call_operand.hbm [shape: f32[4,128], index: 1, kind: input, shape index: {}]   ;;  %s11760_s2 = inlined_call_operand.hbm [shape: f32[32,128], index: 2, kind: input, shape index: {}]   ;;  %s11761_s3 = inlined_call_operand.vmem [shape: f32[1,128], index: 3, kind: input, shape index: {}]   ;;  %s11762_s4 = inlined_call_operand.hbm [shape: f32[1024,128], index: 4, kind: input, shape index: {}]   ;;  %s11763_s5 = inlined_call_operand.vmem [shape: f32[1,128], index: 5, kind: input, shape index: {}]   ;;  %s11764_s6 = inlined_call_operand.hbm [shape: f32[128,128], index: 6, kind: input, shape index: {}]   ;;  %s11765_s7 = inlined_call_operand.vmem [shape: f32[1,128], index: 7, kind: input, shape index: {}]   ;;  %s11766_s8 = inlined_call_operand.hbm [shape: f32[16,128], index: 8, kind: output, shape index: {}]  }
   0x1   :  { %14 = vsyncpa [#allocation7], 0 }
   0x2   :  { %15 = vsyncpa [#allocation10], 0 }
   0x3   :  { %16 = vsyncpa [#allocation5], 0  ;;  %s10378_s27 = smov [#allocation6]   ;;  %s10238_s9 = scalar_lea.hbm %s11759_s1, 64 }
   0x4   :  { %s35_s28 = sshll.u32 %s10378_s27, 4  ;;  %p10239_p0 = scmp.ne.s32.totalorder %s11759_s1, %s10238_s9  ;;  %s36_s28 = int_to_ptr.vmem [resolvable:$true] %s35_s28 }
   0x5   :  { %p10242_p1 = scmp.lt.u32.totalorder %s10238_s9, %s11759_s1 }
   0x7   :  { %p10244_p2 = pnand %p10242_p1, %p10239_p0 }
   0x9   :  { %10247 = shalt.err (!%p10244_p2)
}
   0xa   :  { %s10248_s14 = scalar_lea.vmem %s36_s28, 64  ;;  %p10253_p4 = scmp.lt.s32.totalorder %s36_s28, %s36_s28 }
   0xb   :  { %p10249_p3 = scmp.ne.s32.totalorder %s36_s28, %s10248_s14  ;;  %p10254_p5 = scmp.lt.s32.totalorder %s10248_s14, %s10248_s14 }
   0xd   :  { %p10255_p6 = por %p10254_p5, %p10253_p4 }
   0xf   :  { %p10256_p7 = pnand %p10255_p6, %p10249_p3 }
  0x11   :  { %10259 = shalt.err (!%p10256_p7)
}
  0x12   :  { %38 = dma.hbm_to_vmem [thread:$0]  %s11759_s1, 64, %s36_s28, [#allocation7]  }
  0x13   :  { %s10379_s17 = smov [#allocation9]   ;;  %s10380_s19 = smov [#allocation3]  }
  0x14   :  { %s58_s18 = sshll.u32 %s10379_s17, 4  ;;  %s22_s20 = sshll.u32 %s10380_s19, 4  ;;  %s59_s18 = int_to_ptr.vmem [resolvable:$true] %s58_s18  ;;  %s23_s20 = int_to_ptr.vmem [resolvable:$true] %s22_s20 }
  0x15   :  { %s10260_s23 = scalar_lea.hbm %s11762_s4, 16384 }
  0x16   :  { %p10261_p8 = scmp.ne.s32.totalorder %s11762_s4, %s10260_s23  ;;  %p10264_p9 = scmp.lt.u32.totalorder %s10260_s23, %s11762_s4 }
  0x18   :  { %p10266_p10 = pnand %p10264_p9, %p10261_p8 }
  0x1a   :  { %10269 = shalt.err (!%p10266_p10)
}
  0x1b   :  { %s10270_s1 = scalar_lea.vmem %s59_s18, 16384  ;;  %p10275_p12 = scmp.lt.s32.totalorder %s59_s18, %s59_s18 }
  0x1c   :  { %p10271_p11 = scmp.ne.s32.totalorder %s59_s18, %s10270_s1  ;;  %p10276_p13 = scmp.lt.s32.totalorder %s10270_s1, %s10270_s1 }
  0x1e   :  { %p10277_p0 = por %p10276_p13, %p10275_p12 }
  0x20   :  { %p10278_p1 = pnand %p10277_p0, %p10271_p11 }
  0x22   :  { %10281 = shalt.err (!%p10278_p1)
}
  0x23   :  { %s10381_s28 = smov 128   ;;  %s10382_s29 = smov 8  }
  0x24   :  { %64 = dma.hbm_to_vmem [thread:$0]  %s11762_s4, 16384, %s59_s18, [#allocation10], %s10381_s28, %s10381_s28, %s10382_s29  }
  0x25   :  { %s10282_s12 = scalar_lea.hbm %s11758_s0, 256 }
  0x26   :  { %p10283_p2 = scmp.ne.s32.totalorder %s11758_s0, %s10282_s12  ;;  %p10286_p3 = scmp.lt.u32.totalorder %s10282_s12, %s11758_s0 }
  0x28   :  { %p10288_p4 = pnand %p10286_p3, %p10283_p2 }
  0x2a   :  { %10291 = shalt.err (!%p10288_p4)
}
  0x2b   :  { %s10292_s17 = scalar_lea.vmem %s23_s20, 256  ;;  %p10297_p6 = scmp.lt.s32.totalorder %s23_s20, %s23_s20 }
  0x2c   :  { %p10293_p5 = scmp.ne.s32.totalorder %s23_s20, %s10292_s17  ;;  %p10298_p7 = scmp.lt.s32.totalorder %s10292_s17, %s10292_s17 }
  0x2e   :  { %p10299_p8 = por %p10298_p7, %p10297_p6 }
  0x30   :  { %p10300_p9 = pnand %p10299_p8, %p10293_p5 }
  0x32   :  { %10303 = shalt.err (!%p10300_p9)
}
  0x33   :  { %28 = dma.hbm_to_vmem [thread:$0]  %s11758_s0, 256, %s23_s20, [#allocation4], %s10381_s28, %s10381_s28, %s10382_s29  }
  0x34   :  { %s10383_s19 = smov [#allocation8]   ;;  %s10384_s22 = smov [#allocation11]  }
  0x35   :  { %s44_s21 = sshll.u32 %s10383_s19, 4  ;;  %s72_s23 = sshll.u32 %s10384_s22, 4  ;;  %s45_s21 = int_to_ptr.vmem [resolvable:$true] %s44_s21  ;;  %s73_s23 = int_to_ptr.vmem [resolvable:$true] %s72_s23 }
  0x36   :  { %s10304_s26 = scalar_lea.hbm %s11760_s2, 512 }
  0x37   :  { %p10305_p10 = scmp.ne.s32.totalorder %s11760_s2, %s10304_s26  ;;  %p10308_p11 = scmp.lt.u32.totalorder %s10304_s26, %s11760_s2 }
  0x39   :  { %p10310_p12 = pnand %p10308_p11, %p10305_p10 }
  0x3b   :  { %10313 = shalt.err (!%p10310_p12)
}
  0x3c   :  { %s10314_s0 = scalar_lea.vmem %s45_s21, 512  ;;  %p10319_p0 = scmp.lt.s32.totalorder %s45_s21, %s45_s21 }
  0x3d   :  { %p10315_p13 = scmp.ne.s32.totalorder %s45_s21, %s10314_s0  ;;  %p10320_p1 = scmp.lt.s32.totalorder %s10314_s0, %s10314_s0 }
  0x3f   :  { %p10321_p2 = por %p10320_p1, %p10319_p0 }
  0x41   :  { %p10322_p3 = pnand %p10321_p2, %p10315_p13 }
  0x43   :  { %10325 = shalt.err (!%p10322_p3)
}
  0x44   :  { %50 = dma.hbm_to_vmem [thread:$0]  %s11760_s2, 512, %s45_s21, [#allocation7], %s10381_s28, %s10381_s28, %s10382_s29  }
  0x45   :  { %s10326_s13 = scalar_lea.hbm %s11764_s6, 2048 }
  0x46   :  { %p10327_p4 = scmp.ne.s32.totalorder %s11764_s6, %s10326_s13  ;;  %p10330_p5 = scmp.lt.u32.totalorder %s10326_s13, %s11764_s6 }
  0x48   :  { %p10332_p6 = pnand %p10330_p5, %p10327_p4 }
  0x4a   :  { %10335 = shalt.err (!%p10332_p6)
}
  0x4b   :  { %s10336_s4 = scalar_lea.vmem %s73_s23, 2048  ;;  %p10341_p8 = scmp.lt.s32.totalorder %s73_s23, %s73_s23 }
  0x4c   :  { %p10337_p7 = scmp.ne.s32.totalorder %s73_s23, %s10336_s4  ;;  %p10342_p9 = scmp.lt.s32.totalorder %s10336_s4, %s10336_s4 }
  0x4e   :  { %p10343_p10 = por %p10342_p9, %p10341_p8 }
  0x50   :  { %p10344_p11 = pnand %p10343_p10, %p10337_p7 }
  0x52   :  { %10347 = shalt.err (!%p10344_p11)
}
  0x53   :  { %78 = dma.hbm_to_vmem [thread:$0]  %s11764_s6, 2048, %s73_s23, [#allocation10], %s10381_s28, %s10381_s28, %s10382_s29  }
  0x54   :  { %10370 = dma.done.wait [#allocation4], 256  }
  0x55   :  { %10371 = vsyncadd [#allocation4], 4294967040 }
  0x56   :  { %10372 = dma.done.wait [#allocation7], 576  }
  0x57   :  { %10373 = vsyncadd [#allocation7], 4294966720 }
  0x58   :  { %10374 = dma.done.wait [#allocation10], 18432  }
  0x59   :  { %10375 = vsyncadd [#allocation10], 4294948864  ;;  %v10385_v0 = vmov 0.0   ;;  %vm190_vm0 = vcmask 1043456   ;;  %vm183_vm1 = vcmask 31744   ;;  %v97_v1 = vld [vmem:[#allocation8] sm:$0xff] }
  0x5a   :  { %8570 = vmatprep.mubr.f32.mxu1 %v10385_v0  ;;  %v98_v2 = vld [vmem:[#allocation8 + $0x8] sm:$0xff]  ;;  %v99_v3 = vld [vmem:[#allocation8 + $0x10] sm:$0xff]  ;;  %v100_v5 = vld [vmem:[#allocation8 + $0x18] sm:$0xff]  ;;  %s10386_s21 = smov 32   ;;  %s10387_s22 = smov 64   ;;  %vm104_vm2 = vcmask 261120  }
  0x5b   :  { %v10534_v4 = vpack.c.bf16 %v98_v2, %v97_v1  ;;  %v10536_v6 = vld [vmem:[#allocation6] sm:$0xf]  ;;  %v10538_v7 = vld [vmem:[#allocation3] sm:$0xff]  ;;  %v10540_v8 = vpack.c.bf16 %v100_v5, %v99_v3  ;;  %v10546_v9 = vld [vmem:[#allocation3 + $0x8] sm:$0xff]  ;;  %s10388_s23 = smov 124   ;;  %s10389_s24 = smov 120  }
  0x5c   :  { %8573 = vmatprep.subr.msk.mxu0 %vm190_vm0, %v10536_v6  ;;  %8575 = vmatprep.mubr.msk.f32.mxu0 %vm183_vm1, %v10538_v7  ;;  %v10570_v13 = vld [vmem:[%s11761_s3] ss:$0 sm:$0xff]  ;;  %s10390_s25 = smov 116   ;;  %s10391_s26 = smov 112   ;;  %vm997_vm3 = vcmask 523264   ;;  %vm1000_vm4 = vcmask 785408  }
  0x5d   :  { %9110 = vmatprep.subr.bf16.mxu1 %v10534_v4  ;;  %8574 = vmatpush3.msk.msra.mxu0 %vm190_vm0, %v10536_v6  ;;  %s10392_s27 = smov 108   ;;  %s10393_s1 = smov 104  }
  0x5e   :  { %9112 = vmatpush3.bf16.msra.mxu1 %v10534_v4  ;;  %8576 = vmatmul.mubr.msk.f32.vlgmr.msra.gmra.mrb[0].mxu0 %vm183_vm1, %v10546_v9  ;;  %s10394_s30 = smov 100   ;;  %s10395_s9 = smov 96  }
  0x5f   :  { %9114 = vmatprep.subr.bf16.mxu1 %v10540_v8  ;;  %9126 = vmatprep.subr.bf16.mxu0 %v10534_v4  ;;  %s10396_s10 = smov 92   ;;  %s10397_s11 = smov 88  }
  0x60   :  { %9128 = vmatpush3.bf16.msra.mxu0 %v10534_v4  ;;  %s10398_s12 = smov 84   ;;  %s10399_s13 = smov 80  }
  0x61   :  { %9130 = vmatprep.subr.bf16.mxu0 %v10540_v8  ;;  %s10400_s14 = smov 76   ;;  %s10401_s15 = smov 72  }
  0x62   :  { %9116 = vmatpush3.bf16.msra.mxu1 %v10540_v8  ;;  %s10402_s16 = smov 68   ;;  %s10403_s17 = smov 60  }
  0x63   :  { %9118 = vmatprep.subr.bf16.mxu1 %v10534_v4  ;;  %s10404_s18 = smov 56   ;;  %s10405_s6 = smov 52  }
  0x64   :  { %9132 = vmatpush3.bf16.msra.mxu0 %v10540_v8  ;;  %s10406_s19 = smov 48   ;;  %s10413_s0 = smov 16  }
  0x65   :  { %8571 = vmatmul.mubr.f32.vlgmr.msra.gmra.mrb[0].mxu1 %v10385_v0  ;;  %9142 = vmatprep.subr.bf16.mxu0 %v10534_v4  ;;  %s10414_s20 = smov 12  }
  0x66   :  { %9120 = vmatpush3.bf16.msra.mxu1 %v10534_v4 }
  0x67   :  { %9122 = vmatprep.subr.bf16.mxu1 %v10540_v8 }
  0x6a   :  { %9124 = vmatpush3.bf16.msra.mxu1 %v10540_v8 }
  0x6b   :  { %8589 = vmatprep.subr.msk.mxu1 %vm190_vm0, %v10536_v6 }
 0x131   :  { %v8577_v10 = vpop.f32.mrb[0].mxu0 }
 0x132   :  { %v260_v11 = vpop.f32.mrb[1].mxu0 }
 0x138   :  { %v8572_v12 = vpop.f32.mrb[0].mxu1 }
 0x139   :  { %v266_v14 = vadd.f32 %v8577_v10, %v8572_v12  ;;  %v174_v15 = vpop.f32.mrb[1].mxu1 }
 0x13a   :  { %v261_v16 = vadd.f32 %v260_v11, %v174_v15 }
 0x13b   :  { %v276_v18 = vadd.f32 %v10570_v13, %v266_v14 }
 0x13c   :  { %v275_v17 = vadd.f32 %v10570_v13, %v261_v16 }
 0x13d   :  { %v7882_v22 = vmul.f32 -1.442695, %v276_v18 }
 0x13e   :  { %9708 = vtanh.f32 %v275_v17  ;;  %v7881_v21 = vmul.f32 -1.442695, %v275_v17 }
 0x13f   :  { %9710 = vtanh.f32 %v276_v18 }
 0x140   :  { %9712 = vpow2.f32 %v7881_v21 }
 0x141   :  { %9714 = vpow2.f32 %v7882_v22 }
 0x148   :  { %v9709_v19 = vpop.eup %9708 }
 0x149   :  { %295 = vrot.lane.b32.xlu0 %v9709_v19, %s10386_s21  ;;  %v9711_v20 = vpop.eup %9710 }
 0x14a   :  { %v9713_v23 = vpop.eup %9712 }
 0x14b   :  { %v283_v24 = vadd.f32 1.0, %v9713_v23  ;;  %v9715_v25 = vpop.eup %9714 }
 0x14c   :  { %v284_v26 = vadd.f32 1.0, %v9715_v25 }
 0x14d   :  { %297 = vrot.lane.b32.xlu0 %v9711_v20, %s10386_s21  ;;  %9716 = vrcp.f32 %v283_v24 }
 0x14e   :  { %9718 = vrcp.f32 %v284_v26 }
 0x157   :  { %v9717_v27 = vpop.eup %9716 }
 0x158   :  { %v9719_v30 = vpop.eup %9718  ;;  %v291_v33 = vmul.f32 0.0, %v9717_v27 }
 0x159   :  { %v292_v36 = vmul.f32 0.0, %v9719_v30 }
 0x1bb   :  { %v296_v28 = vpop.permute.xlu0 %295 }
 0x1bc   :  { %v301_v29 = vmul.f32 %v9717_v27, %v296_v28 }
 0x1be   :  { %305 = vrot.lane.b32.xlu1 %v301_v29, %s10386_s21 }
 0x1bf   :  { %v298_v31 = vpop.permute.xlu0 %297 }
 0x1c0   :  { %v302_v32 = vmul.f32 %v9719_v30, %v298_v31 }
 0x1c2   :  { %307 = vrot.lane.b32.xlu1 %v302_v32, %s10386_s21 }
 0x230   :  { %v306_v34 = vpop.permute.xlu1 %305 }
 0x231   :  { %v10578_v35 = vadd.f32 %v306_v34, %v291_v33 }
 0x233   :  { %9720 = vtanh.f32 %v10578_v35 }
 0x234   :  { %v308_v37 = vpop.permute.xlu1 %307 }
 0x235   :  { %v312_v38 = vadd.f32 %v308_v37, %v292_v36 }
 0x237   :  { %9722 = vtanh.f32 %v312_v38 }
 0x23d   :  { %v9721_v39 = vpop.eup %9720 }
 0x23e   :  { %317 = vrot.lane.b32.xlu0 %v9721_v39, %s10386_s21 }
 0x241   :  { %v9723_v40 = vpop.eup %9722 }
 0x242   :  { %319 = vrot.lane.b32.xlu1 %v9723_v40, %s10386_s21 }
 0x2b0   :  { %v318_v41 = vpop.permute.xlu0 %317 }
 0x2b1   :  { %v323_v42 = vmul.f32 %v9717_v27, %v318_v41 }
 0x2b3   :  { %327 = vrot.lane.b32.xlu0 %v323_v42, %s10387_s22 }
 0x2b4   :  { %v320_v43 = vpop.permute.xlu1 %319 }
 0x2b5   :  { %v324_v44 = vmul.f32 %v9719_v30, %v320_v43 }
 0x2b7   :  { %329 = vrot.lane.b32.xlu1 %v324_v44, %s10387_s22  ;;  %410 = vrot.lane.b32.xlu0 %v10538_v7, %s10388_s23 }
 0x2bb   :  { %412 = vrot.lane.b32.xlu1 %v10546_v9, %s10388_s23  ;;  %s10407_s23 = smov 44  }
 0x325   :  { %v10587_v45 = vpop.permute.xlu0 %327 }
 0x326   :  { %8586 = vmatprep.mubr.msk.f32.mxu1 %vm104_vm2, %v10587_v45 }
 0x329   :  { %v10591_v46 = vpop.permute.xlu1 %329  ;;  %v411_v47 = vpop.permute.xlu0 %410 }
 0x32a   :  { %11794 = vst [vmem:[#allocation17_spill] sm:$0xff] %v10591_v46  ;;  %8587 = vmatmul.mubr.msk.f32.vlgmr.msra.gmra.mrb[2].mxu1 %vm104_vm2, %v10591_v46  ;;  %v7313_v46 = vld [vmem:[#allocation9 + $0x20] sm:$0xff] }
 0x32b   :  { %8590 = vmatpush3.msk.msra.mxu1 %vm190_vm0, %v10536_v6  ;;  %8591 = vmatprep.mubr.msk.f32.mxu1 %vm183_vm1, %v411_v47 }
 0x32c   :  { %8605 = vmatprep.subr.msk.mxu1 %vm190_vm0, %v10536_v6 }
 0x32d   :  { %v413_v48 = vpop.permute.xlu1 %412 }
 0x332   :  { %8592 = vmatmul.mubr.msk.f32.vlgmr.msra.gmra.mrb[2].mxu1 %vm183_vm1, %v413_v48 }
 0x333   :  { %8606 = vmatpush3.msk.msra.mxu1 %vm190_vm0, %v10536_v6 }
 0x334   :  { %9134 = vmatprep.subr.bf16.mxu1 %v10534_v4 }
 0x405   :  { %v8593_v49 = vpop.f32.mrb[2].mxu1 }
 0x406   :  { %v494_v50 = vadd.f32 %v8593_v49, %v10570_v13  ;;  %v484_v51 = vpop.f32.mrb[3].mxu1 }
 0x407   :  { %v493_v52 = vadd.f32 %v10570_v13, %v484_v51 }
 0x408   :  { %9724 = vtanh.f32 %v494_v50  ;;  %v7889_v55 = vmul.f32 -1.442695, %v494_v50 }
 0x409   :  { %9726 = vtanh.f32 %v493_v52  ;;  %v7888_v56 = vmul.f32 -1.442695, %v493_v52 }
 0x40a   :  { %9728 = vpow2.f32 %v7889_v55 }
 0x40b   :  { %9730 = vpow2.f32 %v7888_v56 }
 0x412   :  { %v9725_v53 = vpop.eup %9724 }
 0x413   :  { %v9727_v54 = vpop.eup %9726  ;;  %515 = vrot.lane.b32.xlu1 %v9725_v53, %s10386_s21 }
 0x414   :  { %513 = vrot.lane.b32.xlu0 %v9727_v54, %s10386_s21  ;;  %v9729_v57 = vpop.eup %9728 }
 0x415   :  { %v9731_v58 = vpop.eup %9730  ;;  %v502_v59 = vadd.f32 1.0, %v9729_v57 }
 0x416   :  { %v501_v60 = vadd.f32 1.0, %v9731_v58 }
 0x417   :  { %9732 = vrcp.f32 %v502_v59 }
 0x418   :  { %9734 = vrcp.f32 %v501_v60 }
 0x421   :  { %v9733_v61 = vpop.eup %9732 }
 0x422   :  { %v9735_v63 = vpop.eup %9734  ;;  %v510_v3 = vmul.f32 %v9733_v61, %v312_v38 }
 0x423   :  { %v509_v10 = vmul.f32 %v9735_v63, %v10578_v35 }
 0x485   :  { %v516_v62 = vpop.permute.xlu1 %515 }
 0x486   :  { %v520_v0 = vmul.f32 %v9733_v61, %v516_v62  ;;  %v514_v1 = vpop.permute.xlu0 %513 }
 0x487   :  { %v519_v2 = vmul.f32 %v9735_v63, %v514_v1 }
 0x488   :  { %525 = vrot.lane.b32.xlu1 %v520_v0, %s10386_s21 }
 0x489   :  { %523 = vrot.lane.b32.xlu0 %v519_v2, %s10386_s21 }
 0x4fa   :  { %v526_v5 = vpop.permute.xlu1 %525 }
 0x4fb   :  { %v10611_v11 = vadd.f32 %v526_v5, %v510_v3  ;;  %v524_v12 = vpop.permute.xlu0 %523 }
 0x4fc   :  { %v10613_v14 = vadd.f32 %v524_v12, %v509_v10 }
 0x4fd   :  { %9736 = vtanh.f32 %v10611_v11 }
 0x4fe   :  { %9738 = vtanh.f32 %v10613_v14 }
 0x507   :  { %v9737_v15 = vpop.eup %9736 }
 0x508   :  { %v9739_v16 = vpop.eup %9738  ;;  %537 = vrot.lane.b32.xlu1 %v9737_v15, %s10386_s21 }
 0x509   :  { %535 = vrot.lane.b32.xlu0 %v9739_v16, %s10386_s21 }
 0x50c   :  { %628 = vrot.lane.b32.xlu1 %v10538_v7, %s10389_s24 }
 0x510   :  { %630 = vrot.lane.b32.xlu1 %v10546_v9, %s10389_s24  ;;  %s10408_s24 = smov 40  }
 0x57a   :  { %v538_v17 = vpop.permute.xlu1 %537 }
 0x57b   :  { %v536_v18 = vpop.permute.xlu0 %535  ;;  %v10626_v21 = vmul.f32 %v9733_v61, %v538_v17 }
 0x57c   :  { %v10621_v19 = vmul.f32 %v9735_v63, %v536_v18 }
 0x57e   :  { %545 = vrot.lane.b32.xlu0 %v10621_v19, %s10387_s22  ;;  %v629_v20 = vpop.permute.xlu1 %628 }
 0x57f   :  { %8607 = vmatprep.mubr.msk.f32.mxu1 %vm183_vm1, %v629_v20 }
 0x582   :  { %547 = vrot.lane.b32.xlu0 %v10626_v21, %s10387_s22  ;;  %v631_v22 = vpop.permute.xlu1 %630 }
 0x583   :  { %8608 = vmatmul.mubr.msk.f32.vlgmr.msra.gmra.mrb[4].mxu1 %vm183_vm1, %v631_v22 }
 0x584   :  { %9136 = vmatpush3.bf16.msra.mxu1 %v10534_v4 }
 0x585   :  { %9138 = vmatprep.subr.bf16.mxu1 %v10540_v8 }
 0x588   :  { %9140 = vmatpush3.bf16.msra.mxu1 %v10540_v8 }
 0x589   :  { %8621 = vmatprep.subr.msk.mxu1 %vm190_vm0, %v10536_v6 }
 0x5f0   :  { %v546_v23 = vpop.permute.xlu0 %545 }
 0x5f1   :  { %8602 = vmatprep.mubr.msk.f32.mxu0 %vm104_vm2, %v546_v23 }
 0x5f4   :  { %v548_v24 = vpop.permute.xlu0 %547 }
 0x5f5   :  { %8603 = vmatmul.mubr.msk.f32.vlgmr.msra.gmra.mrb[2].mxu0 %vm104_vm2, %v548_v24 }
 0x5f6   :  { %9144 = vmatpush3.bf16.msra.mxu0 %v10534_v4 }
 0x5f7   :  { %9146 = vmatprep.subr.bf16.mxu0 %v10540_v8 }
 0x5fa   :  { %9148 = vmatpush3.bf16.msra.mxu0 %v10540_v8 }
 0x5fb   :  { %8637 = vmatprep.subr.msk.mxu0 %vm190_vm0, %v10536_v6 }
 0x656   :  { %v8609_v25 = vpop.f32.mrb[4].mxu1 }
 0x657   :  { %v702_v26 = vpop.f32.mrb[5].mxu1 }
 0x6c8   :  { %v8604_v27 = vpop.f32.mrb[2].mxu0 }
 0x6c9   :  { %v708_v28 = vadd.f32 %v8609_v25, %v8604_v27  ;;  %v619_v29 = vpop.f32.mrb[3].mxu0 }
 0x6ca   :  { %v703_v30 = vadd.f32 %v702_v26, %v619_v29 }
 0x6cb   :  { %v712_v31 = vadd.f32 %v10570_v13, %v708_v28 }
 0x6cc   :  { %v711_v32 = vadd.f32 %v10570_v13, %v703_v30 }
 0x6cd   :  { %9740 = vtanh.f32 %v712_v31  ;;  %v7896_v35 = vmul.f32 -1.442695, %v712_v31 }
 0x6ce   :  { %9742 = vtanh.f32 %v711_v32  ;;  %v7895_v36 = vmul.f32 -1.442695, %v711_v32 }
 0x6cf   :  { %9744 = vpow2.f32 %v7896_v35 }
 0x6d0   :  { %9746 = vpow2.f32 %v7895_v36 }
 0x6d7   :  { %v9741_v33 = vpop.eup %9740 }
 0x6d8   :  { %v9743_v34 = vpop.eup %9742  ;;  %733 = vrot.lane.b32.xlu1 %v9741_v33, %s10386_s21 }
 0x6d9   :  { %731 = vrot.lane.b32.xlu0 %v9743_v34, %s10386_s21  ;;  %v9745_v37 = vpop.eup %9744 }
 0x6da   :  { %v9747_v38 = vpop.eup %9746  ;;  %v720_v39 = vadd.f32 1.0, %v9745_v37 }
 0x6db   :  { %v719_v40 = vadd.f32 1.0, %v9747_v38 }
 0x6dc   :  { %9748 = vrcp.f32 %v720_v39 }
 0x6dd   :  { %9750 = vrcp.f32 %v719_v40 }
 0x6e6   :  { %v9749_v41 = vpop.eup %9748 }
 0x6e7   :  { %v9751_v43 = vpop.eup %9750  ;;  %v728_v49 = vmul.f32 %v9749_v41, %v10611_v11 }
 0x6e8   :  { %v727_v51 = vmul.f32 %v9751_v43, %v10613_v14 }
 0x74a   :  { %v734_v42 = vpop.permute.xlu1 %733 }
 0x74b   :  { %v738_v44 = vmul.f32 %v9749_v41, %v734_v42  ;;  %v732_v47 = vpop.permute.xlu0 %731 }
 0x74c   :  { %v737_v48 = vmul.f32 %v9751_v43, %v732_v47 }
 0x74d   :  { %743 = vrot.lane.b32.xlu1 %v738_v44, %s10386_s21 }
 0x74e   :  { %741 = vrot.lane.b32.xlu0 %v737_v48, %s10386_s21 }
 0x7bf   :  { %v744_v50 = vpop.permute.xlu1 %743 }
 0x7c0   :  { %v748_v52 = vadd.f32 %v744_v50, %v728_v49  ;;  %v742_v53 = vpop.permute.xlu0 %741 }
 0x7c1   :  { %v747_v54 = vadd.f32 %v742_v53, %v727_v51 }
 0x7c2   :  { %9752 = vtanh.f32 %v748_v52 }
 0x7c3   :  { %9754 = vtanh.f32 %v747_v54 }
 0x7cc   :  { %v9753_v55 = vpop.eup %9752 }
 0x7cd   :  { %v9755_v56 = vpop.eup %9754  ;;  %755 = vrot.lane.b32.xlu1 %v9753_v55, %s10386_s21 }
 0x7ce   :  { %753 = vrot.lane.b32.xlu0 %v9755_v56, %s10386_s21 }
 0x83f   :  { %v756_v57 = vpop.permute.xlu1 %755 }
 0x840   :  { %v10653_v58 = vmul.f32 %v9749_v41, %v756_v57  ;;  %v754_v59 = vpop.permute.xlu0 %753 }
 0x841   :  { %v10655_v60 = vmul.f32 %v9751_v43, %v754_v59 }
 0x842   :  { %11795 = vst [vmem:[#allocation18_spill] sm:$0xff] %v10653_v58  ;;  %765 = vrot.lane.b32.xlu1 %v10653_v58, %s10387_s22  ;;  %v7329_v58 = vld [vmem:[#allocation9 + $0xa0] sm:$0xff] }
 0x843   :  { %763 = vrot.lane.b32.xlu0 %v10655_v60, %s10387_s22 }
 0x846   :  { %848 = vrot.lane.b32.xlu1 %v10546_v9, %s10390_s25 }
 0x847   :  { %846 = vrot.lane.b32.xlu0 %v10538_v7, %s10390_s25  ;;  %s10409_s25 = smov 36  }
 0x8b4   :  { %v766_v62 = vpop.permute.xlu1 %765 }
 0x8b5   :  { %v764_v61 = vpop.permute.xlu0 %763 }
 0x8b6   :  { %8618 = vmatprep.mubr.msk.f32.mxu1 %vm104_vm2, %v764_v61 }
 0x8b7   :  { %8619 = vmatmul.mubr.msk.f32.vlgmr.msra.gmra.mrb[6].mxu1 %vm104_vm2, %v766_v62 }
 0x8b8   :  { %8622 = vmatpush3.msk.msra.mxu1 %vm190_vm0, %v10536_v6  ;;  %v849_v0 = vpop.permute.xlu1 %848 }
 0x8b9   :  { %v847_v63 = vpop.permute.xlu0 %846  ;;  %9150 = vmatprep.subr.bf16.mxu1 %v10534_v4 }
 0x8ba   :  { %8623 = vmatprep.mubr.msk.f32.mxu1 %vm183_vm1, %v847_v63 }
 0x8bf   :  { %8624 = vmatmul.mubr.msk.f32.vlgmr.msra.gmra.mrb[6].mxu1 %vm183_vm1, %v849_v0 }
 0x8c0   :  { %9152 = vmatpush3.bf16.msra.mxu1 %v10534_v4 }
 0x8c1   :  { %9154 = vmatprep.subr.bf16.mxu1 %v10540_v8 }
 0x8c4   :  { %9156 = vmatpush3.bf16.msra.mxu1 %v10540_v8 }
 0x8c5   :  { %8653 = vmatprep.subr.msk.mxu1 %vm190_vm0, %v10536_v6 }
 0x992   :  { %v8625_v1 = vpop.f32.mrb[6].mxu1 }
 0x993   :  { %v930_v2 = vadd.f32 %v8625_v1, %v10570_v13  ;;  %v920_v3 = vpop.f32.mrb[7].mxu1 }
 0x994   :  { %v929_v5 = vadd.f32 %v10570_v13, %v920_v3 }
 0x995   :  { %9756 = vtanh.f32 %v930_v2  ;;  %v7903_v12 = vmul.f32 -1.442695, %v930_v2 }
 0x996   :  { %9758 = vtanh.f32 %v929_v5  ;;  %v7902_v14 = vmul.f32 -1.442695, %v929_v5 }
 0x997   :  { %9760 = vpow2.f32 %v7903_v12 }
 0x998   :  { %9762 = vpow2.f32 %v7902_v14 }
 0x99f   :  { %v9757_v10 = vpop.eup %9756 }
 0x9a0   :  { %v9759_v11 = vpop.eup %9758  ;;  %951 = vrot.lane.b32.xlu1 %v9757_v10, %s10386_s21 }
 0x9a1   :  { %949 = vrot.lane.b32.xlu0 %v9759_v11, %s10386_s21  ;;  %v9761_v15 = vpop.eup %9760 }
 0x9a2   :  { %v9763_v16 = vpop.eup %9762  ;;  %v938_v17 = vadd.f32 1.0, %v9761_v15 }
 0x9a3   :  { %v937_v18 = vadd.f32 1.0, %v9763_v16 }
 0x9a4   :  { %9764 = vrcp.f32 %v938_v17 }
 0x9a5   :  { %9766 = vrcp.f32 %v937_v18 }
 0x9ae   :  { %v9765_v20 = vpop.eup %9764 }
 0x9af   :  { %v9767_v23 = vpop.eup %9766  ;;  %v946_v27 = vmul.f32 %v9765_v20, %v748_v52 }
 0x9b0   :  { %v945_v29 = vmul.f32 %v9767_v23, %v747_v54 }
 0xa12   :  { %v952_v22 = vpop.permute.xlu1 %951 }
 0xa13   :  { %v956_v24 = vmul.f32 %v9765_v20, %v952_v22  ;;  %v950_v25 = vpop.permute.xlu0 %949 }
 0xa14   :  { %v955_v26 = vmul.f32 %v9767_v23, %v950_v25 }
 0xa15   :  { %961 = vrot.lane.b32.xlu1 %v956_v24, %s10386_s21 }
 0xa16   :  { %959 = vrot.lane.b32.xlu0 %v955_v26, %s10386_s21 }
 0xa87   :  { %v962_v28 = vpop.permute.xlu1 %961 }
 0xa88   :  { %v966_v30 = vadd.f32 %v962_v28, %v946_v27  ;;  %v960_v31 = vpop.permute.xlu0 %959 }
 0xa89   :  { %v965_v32 = vadd.f32 %v960_v31, %v945_v29 }
 0xa8a   :  { %9768 = vtanh.f32 %v966_v30 }
 0xa8b   :  { %9770 = vtanh.f32 %v965_v32 }
 0xa94   :  { %v9769_v33 = vpop.eup %9768 }
 0xa95   :  { %v9771_v34 = vpop.eup %9770  ;;  %973 = vrot.lane.b32.xlu1 %v9769_v33, %s10386_s21 }
 0xa96   :  { %971 = vrot.lane.b32.xlu0 %v9771_v34, %s10386_s21 }
 0xb07   :  { %v974_v35 = vpop.permute.xlu1 %973 }
 0xb08   :  { %v10683_v36 = vmul.f32 %v9765_v20, %v974_v35  ;;  %v972_v37 = vpop.permute.xlu0 %971 }
 0xb09   :  { %v10685_v38 = vmul.f32 %v9767_v23, %v972_v37 }
 0xb0a   :  { %1009 = vrot.lane.b32.xlu1 %v10683_v36, %s10387_s22 }
 0xb0b   :  { %1007 = vrot.lane.b32.xlu0 %v10685_v38, %s10387_s22 }
 0xb0e   :  { %1094 = vrot.lane.b32.xlu1 %v10546_v9, %s10391_s26 }
 0xb0f   :  { %1092 = vrot.lane.b32.xlu0 %v10538_v7, %s10391_s26  ;;  %s10410_s26 = smov 28  }
 0xb7c   :  { %v1010_v40 = vpop.permute.xlu1 %1009 }
 0xb7d   :  { %v1008_v39 = vpop.permute.xlu0 %1007 }
 0xb7e   :  { %8634 = vmatprep.mubr.msk.f32.mxu0 %vm104_vm2, %v1008_v39 }
 0xb7f   :  { %8635 = vmatmul.mubr.msk.f32.vlgmr.msra.gmra.mrb[4].mxu0 %vm104_vm2, %v1010_v40 }
 0xb80   :  { %8638 = vmatpush3.msk.msra.mxu0 %vm190_vm0, %v10536_v6  ;;  %v1095_v42 = vpop.permute.xlu1 %1094 }
 0xb81   :  { %v1093_v41 = vpop.permute.xlu0 %1092  ;;  %9158 = vmatprep.subr.bf16.mxu0 %v10534_v4 }
 0xb82   :  { %8639 = vmatprep.mubr.msk.f32.mxu0 %vm183_vm1, %v1093_v41 }
 0xb87   :  { %8640 = vmatmul.mubr.msk.f32.vlgmr.msra.gmra.mrb[4].mxu0 %vm183_vm1, %v1095_v42 }
 0xb88   :  { %9160 = vmatpush3.bf16.msra.mxu0 %v10534_v4 }
 0xb89   :  { %9162 = vmatprep.subr.bf16.mxu0 %v10540_v8 }
 0xb8c   :  { %9164 = vmatpush3.bf16.msra.mxu0 %v10540_v8 }
 0xb8d   :  { %8669 = vmatprep.subr.msk.mxu0 %vm190_vm0, %v10536_v6 }
 0xc5a   :  { %v8641_v43 = vpop.f32.mrb[4].mxu0 }
 0xc5b   :  { %v1176_v44 = vadd.f32 %v8641_v43, %v10570_v13  ;;  %v1166_v47 = vpop.f32.mrb[5].mxu0 }
 0xc5c   :  { %v1175_v48 = vadd.f32 %v10570_v13, %v1166_v47 }
 0xc5d   :  { %9772 = vtanh.f32 %v1176_v44  ;;  %v7910_v51 = vmul.f32 -1.442695, %v1176_v44 }
 0xc5e   :  { %9774 = vtanh.f32 %v1175_v48  ;;  %v7909_v52 = vmul.f32 -1.442695, %v1175_v48 }
 0xc5f   :  { %9776 = vpow2.f32 %v7910_v51 }
 0xc60   :  { %9778 = vpow2.f32 %v7909_v52 }
 0xc67   :  { %v9773_v49 = vpop.eup %9772 }
 0xc68   :  { %v9775_v50 = vpop.eup %9774  ;;  %1197 = vrot.lane.b32.xlu1 %v9773_v49, %s10386_s21 }
 0xc69   :  { %1195 = vrot.lane.b32.xlu0 %v9775_v50, %s10386_s21  ;;  %v9777_v53 = vpop.eup %9776 }
 0xc6a   :  { %v9779_v54 = vpop.eup %9778  ;;  %v1184_v55 = vadd.f32 1.0, %v9777_v53 }
 0xc6b   :  { %v1183_v56 = vadd.f32 1.0, %v9779_v54 }
 0xc6c   :  { %9780 = vrcp.f32 %v1184_v55 }
 0xc6d   :  { %9782 = vrcp.f32 %v1183_v56 }
 0xc76   :  { %v9781_v57 = vpop.eup %9780 }
 0xc77   :  { %v9783_v61 = vpop.eup %9782  ;;  %v1192_v1 = vmul.f32 %v9781_v57, %v966_v30 }
 0xc78   :  { %v1191_v3 = vmul.f32 %v9783_v61, %v965_v32 }
 0xcda   :  { %v1198_v59 = vpop.permute.xlu1 %1197 }
 0xcdb   :  { %v1202_v62 = vmul.f32 %v9781_v57, %v1198_v59  ;;  %v1196_v63 = vpop.permute.xlu0 %1195 }
 0xcdc   :  { %v1201_v0 = vmul.f32 %v9783_v61, %v1196_v63 }
 0xcdd   :  { %1207 = vrot.lane.b32.xlu1 %v1202_v62, %s10386_s21 }
 0xcde   :  { %1205 = vrot.lane.b32.xlu0 %v1201_v0, %s10386_s21 }
 0xd4f   :  { %v1208_v2 = vpop.permute.xlu1 %1207 }
 0xd50   :  { %v1212_v5 = vadd.f32 %v1208_v2, %v1192_v1  ;;  %v1206_v10 = vpop.permute.xlu0 %1205 }
 0xd51   :  { %v1211_v11 = vadd.f32 %v1206_v10, %v1191_v3 }
 0xd52   :  { %9784 = vtanh.f32 %v1212_v5 }
 0xd53   :  { %9786 = vtanh.f32 %v1211_v11 }
 0xd5c   :  { %v9785_v12 = vpop.eup %9784 }
 0xd5d   :  { %v9787_v14 = vpop.eup %9786  ;;  %1219 = vrot.lane.b32.xlu1 %v9785_v12, %s10386_s21 }
 0xd5e   :  { %1217 = vrot.lane.b32.xlu0 %v9787_v14, %s10386_s21 }
 0xdcf   :  { %v1220_v15 = vpop.permute.xlu1 %1219 }
 0xdd0   :  { %v1224_v16 = vmul.f32 %v9781_v57, %v1220_v15  ;;  %v1218_v17 = vpop.permute.xlu0 %1217 }
 0xdd1   :  { %v1223_v18 = vmul.f32 %v9783_v61, %v1218_v17 }
 0xdd2   :  { %1229 = vrot.lane.b32.xlu1 %v1224_v16, %s10387_s22 }
 0xdd3   :  { %1227 = vrot.lane.b32.xlu0 %v1223_v18, %s10387_s22 }
 0xdd6   :  { %1312 = vrot.lane.b32.xlu1 %v10546_v9, %s10392_s27 }
 0xdd7   :  { %1310 = vrot.lane.b32.xlu0 %v10538_v7, %s10392_s27  ;;  %s10411_s27 = smov 24  }
 0xe44   :  { %v10719_v22 = vpop.permute.xlu1 %1229 }
 0xe45   :  { %v10717_v20 = vpop.permute.xlu0 %1227  ;;  %11796 = vst [vmem:[#allocation19_spill] sm:$0xff] %v10719_v22 }
 0xe46   :  { %8650 = vmatprep.mubr.msk.f32.mxu1 %vm104_vm2, %v10717_v20 }
 0xe47   :  { %8651 = vmatmul.mubr.msk.f32.vlgmr.msra.gmra.mrb[8].mxu1 %vm104_vm2, %v10719_v22  ;;  %v7359_v22 = vld [vmem:[#allocation9 + $0x190] sm:$0xff] }
 0xe48   :  { %8654 = vmatpush3.msk.msra.mxu1 %vm190_vm0, %v10536_v6  ;;  %v1313_v24 = vpop.permute.xlu1 %1312 }
 0xe49   :  { %v1311_v23 = vpop.permute.xlu0 %1310  ;;  %9166 = vmatprep.subr.bf16.mxu1 %v10534_v4 }
 0xe4a   :  { %8655 = vmatprep.mubr.msk.f32.mxu1 %vm183_vm1, %v1311_v23 }
 0xe4f   :  { %8656 = vmatmul.mubr.msk.f32.vlgmr.msra.gmra.mrb[8].mxu1 %vm183_vm1, %v1313_v24 }
 0xe50   :  { %9168 = vmatpush3.bf16.msra.mxu1 %v10534_v4 }
 0xe51   :  { %9170 = vmatprep.subr.bf16.mxu1 %v10540_v8 }
 0xe54   :  { %9172 = vmatpush3.bf16.msra.mxu1 %v10540_v8 }
 0xe55   :  { %8685 = vmatprep.subr.msk.mxu1 %vm190_vm0, %v10536_v6 }
 0xf22   :  { %v8657_v25 = vpop.f32.mrb[8].mxu1 }
 0xf23   :  { %v1394_v26 = vadd.f32 %v8657_v25, %v10570_v13  ;;  %v1384_v27 = vpop.f32.mrb[9].mxu1 }
 0xf24   :  { %v1393_v28 = vadd.f32 %v10570_v13, %v1384_v27 }
 0xf25   :  { %9788 = vtanh.f32 %v1394_v26  ;;  %v7917_v31 = vmul.f32 -1.442695, %v1394_v26 }
 0xf26   :  { %9790 = vtanh.f32 %v1393_v28  ;;  %v7916_v32 = vmul.f32 -1.442695, %v1393_v28 }
 0xf27   :  { %9792 = vpow2.f32 %v7917_v31 }
 0xf28   :  { %9794 = vpow2.f32 %v7916_v32 }
 0xf2f   :  { %v9789_v29 = vpop.eup %9788 }
 0xf30   :  { %v9791_v30 = vpop.eup %9790  ;;  %1415 = vrot.lane.b32.xlu1 %v9789_v29, %s10386_s21 }
 0xf31   :  { %1413 = vrot.lane.b32.xlu0 %v9791_v30, %s10386_s21  ;;  %v9793_v33 = vpop.eup %9792 }
 0xf32   :  { %v9795_v34 = vpop.eup %9794  ;;  %v1402_v35 = vadd.f32 1.0, %v9793_v33 }
 0xf33   :  { %v1401_v37 = vadd.f32 1.0, %v9795_v34 }
 0xf34   :  { %9796 = vrcp.f32 %v1402_v35 }
 0xf35   :  { %9798 = vrcp.f32 %v1401_v37 }
 0xf3e   :  { %v9797_v39 = vpop.eup %9796 }
 0xf3f   :  { %v9799_v41 = vpop.eup %9798  ;;  %v1410_v47 = vmul.f32 %v9797_v39, %v1212_v5 }
 0xf40   :  { %v1409_v49 = vmul.f32 %v9799_v41, %v1211_v11 }
 0xfa2   :  { %v1416_v40 = vpop.permute.xlu1 %1415 }
 0xfa3   :  { %v1420_v42 = vmul.f32 %v9797_v39, %v1416_v40  ;;  %v1414_v43 = vpop.permute.xlu0 %1413 }
 0xfa4   :  { %v1419_v44 = vmul.f32 %v9799_v41, %v1414_v43 }
 0xfa5   :  { %1425 = vrot.lane.b32.xlu1 %v1420_v42, %s10386_s21 }
 0xfa6   :  { %1423 = vrot.lane.b32.xlu0 %v1419_v44, %s10386_s21 }
0x1017   :  { %v1426_v48 = vpop.permute.xlu1 %1425 }
0x1018   :  { %v1430_v50 = vadd.f32 %v1426_v48, %v1410_v47  ;;  %v1424_v51 = vpop.permute.xlu0 %1423 }
0x1019   :  { %v1429_v52 = vadd.f32 %v1424_v51, %v1409_v49 }
0x101a   :  { %9800 = vtanh.f32 %v1430_v50 }
0x101b   :  { %9802 = vtanh.f32 %v1429_v52 }
0x1024   :  { %v9801_v53 = vpop.eup %9800 }
0x1025   :  { %v9803_v54 = vpop.eup %9802  ;;  %1437 = vrot.lane.b32.xlu1 %v9801_v53, %s10386_s21 }
0x1026   :  { %1435 = vrot.lane.b32.xlu0 %v9803_v54, %s10386_s21 }
0x1097   :  { %v1438_v55 = vpop.permute.xlu1 %1437 }
0x1098   :  { %v10743_v56 = vmul.f32 %v9797_v39, %v1438_v55  ;;  %v1436_v57 = vpop.permute.xlu0 %1435 }
0x1099   :  { %v10745_v59 = vmul.f32 %v9799_v41, %v1436_v57 }
0x109a   :  { %1447 = vrot.lane.b32.xlu1 %v10743_v56, %s10387_s22 }
0x109b   :  { %1445 = vrot.lane.b32.xlu0 %v10745_v59, %s10387_s22 }
0x109e   :  { %1530 = vrot.lane.b32.xlu1 %v10546_v9, %s10393_s1 }
0x109f   :  { %1528 = vrot.lane.b32.xlu0 %v10538_v7, %s10393_s1 }
0x110c   :  { %v1448_v62 = vpop.permute.xlu1 %1447 }
0x110d   :  { %v1446_v61 = vpop.permute.xlu0 %1445 }
0x110e   :  { %8666 = vmatprep.mubr.msk.f32.mxu0 %vm104_vm2, %v1446_v61 }
0x110f   :  { %8667 = vmatmul.mubr.msk.f32.vlgmr.msra.gmra.mrb[6].mxu0 %vm104_vm2, %v1448_v62 }
0x1110   :  { %8670 = vmatpush3.msk.msra.mxu0 %vm190_vm0, %v10536_v6  ;;  %v1531_v0 = vpop.permute.xlu1 %1530 }
0x1111   :  { %v1529_v63 = vpop.permute.xlu0 %1528  ;;  %9174 = vmatprep.subr.bf16.mxu0 %v10534_v4 }
0x1112   :  { %8671 = vmatprep.mubr.msk.f32.mxu0 %vm183_vm1, %v1529_v63 }
0x1117   :  { %8672 = vmatmul.mubr.msk.f32.vlgmr.msra.gmra.mrb[6].mxu0 %vm183_vm1, %v1531_v0 }
0x1118   :  { %9176 = vmatpush3.bf16.msra.mxu0 %v10534_v4 }
0x1119   :  { %9178 = vmatprep.subr.bf16.mxu0 %v10540_v8 }
0x111c   :  { %9180 = vmatpush3.bf16.msra.mxu0 %v10540_v8 }
0x111d   :  { %8701 = vmatprep.subr.msk.mxu0 %vm190_vm0, %v10536_v6 }
0x11ea   :  { %v8673_v1 = vpop.f32.mrb[6].mxu0 }
0x11eb   :  { %v1612_v2 = vadd.f32 %v8673_v1, %v10570_v13  ;;  %v1602_v3 = vpop.f32.mrb[7].mxu0 }
0x11ec   :  { %v1611_v5 = vadd.f32 %v10570_v13, %v1602_v3 }
0x11ed   :  { %9804 = vtanh.f32 %v1612_v2  ;;  %v7924_v12 = vmul.f32 -1.442695, %v1612_v2 }
0x11ee   :  { %9806 = vtanh.f32 %v1611_v5  ;;  %v7923_v14 = vmul.f32 -1.442695, %v1611_v5 }
0x11ef   :  { %9808 = vpow2.f32 %v7924_v12 }
0x11f0   :  { %9810 = vpow2.f32 %v7923_v14 }
0x11f7   :  { %v9805_v10 = vpop.eup %9804 }
0x11f8   :  { %v9807_v11 = vpop.eup %9806  ;;  %1633 = vrot.lane.b32.xlu1 %v9805_v10, %s10386_s21 }
0x11f9   :  { %1631 = vrot.lane.b32.xlu0 %v9807_v11, %s10386_s21  ;;  %v9809_v15 = vpop.eup %9808 }
0x11fa   :  { %v9811_v16 = vpop.eup %9810  ;;  %v1620_v17 = vadd.f32 1.0, %v9809_v15 }
0x11fb   :  { %v1619_v18 = vadd.f32 1.0, %v9811_v16 }
0x11fc   :  { %9812 = vrcp.f32 %v1620_v17 }
0x11fd   :  { %9814 = vrcp.f32 %v1619_v18 }
0x1206   :  { %v9813_v23 = vpop.eup %9812 }
0x1207   :  { %v9815_v25 = vpop.eup %9814  ;;  %v1628_v29 = vmul.f32 %v9813_v23, %v1430_v50 }
0x1208   :  { %v1627_v31 = vmul.f32 %v9815_v25, %v1429_v52 }
0x126a   :  { %v1634_v24 = vpop.permute.xlu1 %1633 }
0x126b   :  { %v1638_v26 = vmul.f32 %v9813_v23, %v1634_v24  ;;  %v1632_v27 = vpop.permute.xlu0 %1631 }
0x126c   :  { %v1637_v28 = vmul.f32 %v9815_v25, %v1632_v27 }
0x126d   :  { %1643 = vrot.lane.b32.xlu1 %v1638_v26, %s10386_s21  ;;  %v10821_v26 = vld [vmem:[#allocation3] sm:$0xff] }
0x126e   :  { %1641 = vrot.lane.b32.xlu0 %v1637_v28, %s10386_s21 }
0x12df   :  { %v1644_v30 = vpop.permute.xlu1 %1643 }
0x12e0   :  { %v1648_v32 = vadd.f32 %v1644_v30, %v1628_v29  ;;  %v1642_v33 = vpop.permute.xlu0 %1641  ;;  %v10827_v29 = vld [vmem:[#allocation6] sm:$0xf] }
0x12e1   :  { %v1647_v34 = vadd.f32 %v1642_v33, %v1627_v31  ;;  %v10842_v33 = vld [vmem:[%s11761_s3] ss:$0 sm:$0xff] }
0x12e2   :  { %9816 = vtanh.f32 %v1648_v32 }
0x12e3   :  { %9818 = vtanh.f32 %v1647_v34 }
0x12ec   :  { %v9817_v35 = vpop.eup %9816 }
0x12ed   :  { %v9819_v37 = vpop.eup %9818  ;;  %1655 = vrot.lane.b32.xlu1 %v9817_v35, %s10386_s21 }
0x12ee   :  { %1653 = vrot.lane.b32.xlu0 %v9819_v37, %s10386_s21 }
0x135f   :  { %v1656_v39 = vpop.permute.xlu1 %1655 }
0x1360   :  { %v10773_v40 = vmul.f32 %v9813_v23, %v1656_v39  ;;  %v1654_v41 = vpop.permute.xlu0 %1653 }
0x1361   :  { %v10775_v42 = vmul.f32 %v9815_v25, %v1654_v41  ;;  %v10817_v25 = vld [vmem:[#allocation3 + $0x8] sm:$0xff] }
0x1362   :  { %11797 = vst [vmem:[#allocation20_spill] sm:$0xff] %v10773_v40  ;;  %1665 = vrot.lane.b32.xlu1 %v10773_v40, %s10387_s22  ;;  %v7330_v40 = vld [vmem:[#allocation9 + $0xa8] sm:$0xff] }
0x1363   :  { %1663 = vrot.lane.b32.xlu0 %v10775_v42, %s10387_s22 }
0x1366   :  { %1748 = vrot.lane.b32.xlu1 %v10546_v9, %s10394_s30 }
0x1367   :  { %1746 = vrot.lane.b32.xlu0 %v10538_v7, %s10394_s30 }
0x13d4   :  { %v1666_v44 = vpop.permute.xlu1 %1665 }
0x13d5   :  { %v1664_v43 = vpop.permute.xlu0 %1663 }
0x13d6   :  { %8682 = vmatprep.mubr.msk.f32.mxu1 %vm104_vm2, %v1664_v43 }
0x13d7   :  { %8683 = vmatmul.mubr.msk.f32.vlgmr.msra.gmra.mrb[10].mxu1 %vm104_vm2, %v1666_v44 }
0x13d8   :  { %8686 = vmatpush3.msk.msra.mxu1 %vm190_vm0, %v10536_v6  ;;  %v1749_v48 = vpop.permute.xlu1 %1748 }
0x13d9   :  { %v1747_v47 = vpop.permute.xlu0 %1746  ;;  %9182 = vmatprep.subr.bf16.mxu1 %v10534_v4 }
0x13da   :  { %8687 = vmatprep.mubr.msk.f32.mxu1 %vm183_vm1, %v1747_v47 }
0x13df   :  { %8688 = vmatmul.mubr.msk.f32.vlgmr.msra.gmra.mrb[10].mxu1 %vm183_vm1, %v1749_v48 }
0x13e0   :  { %9184 = vmatpush3.bf16.msra.mxu1 %v10534_v4 }
0x13e1   :  { %9186 = vmatprep.subr.bf16.mxu1 %v10540_v8 }
0x13e4   :  { %9188 = vmatpush3.bf16.msra.mxu1 %v10540_v8 }
0x13e5   :  { %8717 = vmatprep.subr.msk.mxu1 %vm190_vm0, %v10536_v6 }
0x14b2   :  { %v8689_v7 = vpop.f32.mrb[10].mxu1 }
0x14b3   :  { %v1830_v9 = vadd.f32 %v8689_v7, %v10570_v13  ;;  %v1820_v49 = vpop.f32.mrb[11].mxu1 }
0x14b4   :  { %v1829_v50 = vadd.f32 %v10570_v13, %v1820_v49 }
0x14b5   :  { %9820 = vtanh.f32 %v1830_v9  ;;  %v7931_v53 = vmul.f32 -1.442695, %v1830_v9 }
0x14b6   :  { %9822 = vtanh.f32 %v1829_v50  ;;  %v7930_v54 = vmul.f32 -1.442695, %v1829_v50 }
0x14b7   :  { %9824 = vpow2.f32 %v7931_v53 }
0x14b8   :  { %9826 = vpow2.f32 %v7930_v54 }
0x14bf   :  { %v9821_v51 = vpop.eup %9820 }
0x14c0   :  { %v9823_v52 = vpop.eup %9822  ;;  %1851 = vrot.lane.b32.xlu1 %v9821_v51, %s10386_s21 }
0x14c1   :  { %1849 = vrot.lane.b32.xlu0 %v9823_v52, %s10386_s21  ;;  %v9825_v55 = vpop.eup %9824 }
0x14c2   :  { %v9827_v6 = vpop.eup %9826  ;;  %v1838_v57 = vadd.f32 1.0, %v9825_v55 }
0x14c3   :  { %v1837_v61 = vadd.f32 1.0, %v9827_v6 }
0x14c4   :  { %9828 = vrcp.f32 %v1838_v57 }
0x14c5   :  { %9830 = vrcp.f32 %v1837_v61 }
0x14ce   :  { %v9829_v62 = vpop.eup %9828 }
0x14cf   :  { %v9831_v63 = vpop.eup %9830  ;;  %v1846_v3 = vmul.f32 %v9829_v62, %v1648_v32 }
0x14d0   :  { %v1845_v10 = vmul.f32 %v9831_v63, %v1647_v34 }
0x1532   :  { %v1852_v13 = vpop.permute.xlu1 %1851 }
0x1533   :  { %v1856_v0 = vmul.f32 %v9829_v62, %v1852_v13  ;;  %v1850_v1 = vpop.permute.xlu0 %1849 }
0x1534   :  { %v1855_v2 = vmul.f32 %v9831_v63, %v1850_v1 }
0x1535   :  { %1861 = vrot.lane.b32.xlu1 %v1856_v0, %s10386_s21 }
0x1536   :  { %1859 = vrot.lane.b32.xlu0 %v1855_v2, %s10386_s21 }
0x15a7   :  { %v1862_v5 = vpop.permute.xlu1 %1861 }
0x15a8   :  { %v10801_v11 = vadd.f32 %v1862_v5, %v1846_v3  ;;  %v1860_v12 = vpop.permute.xlu0 %1859 }
0x15a9   :  { %v10803_v14 = vadd.f32 %v1860_v12, %v1845_v10 }
0x15aa   :  { %9832 = vtanh.f32 %v10801_v11 }
0x15ab   :  { %9834 = vtanh.f32 %v10803_v14 }
0x15b4   :  { %v9833_v15 = vpop.eup %9832 }
0x15b5   :  { %v9835_v16 = vpop.eup %9834  ;;  %1873 = vrot.lane.b32.xlu1 %v9833_v15, %s10386_s21 }
0x15b6   :  { %1871 = vrot.lane.b32.xlu0 %v9835_v16, %s10386_s21 }
0x1627   :  { %v1874_v17 = vpop.permute.xlu1 %1873 }
0x1628   :  { %v10809_v18 = vmul.f32 %v9829_v62, %v1874_v17  ;;  %v1872_v23 = vpop.permute.xlu0 %1871 }
0x1629   :  { %v10811_v24 = vmul.f32 %v9831_v63, %v1872_v23 }
0x162a   :  { %1907 = vrot.lane.b32.xlu1 %v10809_v18, %s10387_s22 }
0x162b   :  { %1905 = vrot.lane.b32.xlu0 %v10811_v24, %s10387_s22 }
0x162e   :  { %1992 = vrot.lane.b32.xlu1 %v10817_v25, %s10395_s9 }
0x162f   :  { %1990 = vrot.lane.b32.xlu0 %v10821_v26, %s10395_s9 }
0x169c   :  { %v1908_v28 = vpop.permute.xlu1 %1907 }
0x169d   :  { %v1906_v27 = vpop.permute.xlu0 %1905 }
0x169e   :  { %8698 = vmatprep.mubr.msk.f32.mxu0 %vm104_vm2, %v1906_v27 }
0x169f   :  { %8699 = vmatmul.mubr.msk.f32.vlgmr.msra.gmra.mrb[8].mxu0 %vm104_vm2, %v1908_v28 }
0x16a0   :  { %8702 = vmatpush3.msk.msra.mxu0 %vm190_vm0, %v10827_v29  ;;  %v1993_v31 = vpop.permute.xlu1 %1992 }
0x16a1   :  { %v1991_v30 = vpop.permute.xlu0 %1990  ;;  %9190 = vmatprep.subr.bf16.mxu0 %v10534_v4 }
0x16a2   :  { %8703 = vmatprep.mubr.msk.f32.mxu0 %vm183_vm1, %v1991_v30 }
0x16a7   :  { %8704 = vmatmul.mubr.msk.f32.vlgmr.msra.gmra.mrb[8].mxu0 %vm183_vm1, %v1993_v31 }
0x16a8   :  { %9192 = vmatpush3.bf16.msra.mxu0 %v10534_v4 }
0x16a9   :  { %9194 = vmatprep.subr.bf16.mxu0 %v10540_v8 }
0x16ac   :  { %9196 = vmatpush3.bf16.msra.mxu0 %v10540_v8 }
0x16ad   :  { %8733 = vmatprep.subr.msk.mxu0 %vm190_vm0, %v10827_v29 }
0x177a   :  { %v8705_v32 = vpop.f32.mrb[8].mxu0 }
0x177b   :  { %v2074_v34 = vadd.f32 %v10842_v33, %v8705_v32  ;;  %v2064_v35 = vpop.f32.mrb[9].mxu0 }
0x177c   :  { %v2073_v37 = vadd.f32 %v10842_v33, %v2064_v35 }
0x177d   :  { %9836 = vtanh.f32 %v2074_v34  ;;  %v7938_v43 = vmul.f32 -1.442695, %v2074_v34 }
0x177e   :  { %9838 = vtanh.f32 %v2073_v37  ;;  %v7937_v44 = vmul.f32 -1.442695, %v2073_v37 }
0x177f   :  { %9840 = vpow2.f32 %v7938_v43 }
0x1780   :  { %9842 = vpow2.f32 %v7937_v44 }
0x1787   :  { %v9837_v39 = vpop.eup %9836 }
0x1788   :  { %v9839_v41 = vpop.eup %9838  ;;  %2095 = vrot.lane.b32.xlu1 %v9837_v39, %s10386_s21 }
0x1789   :  { %2093 = vrot.lane.b32.xlu0 %v9839_v41, %s10386_s21  ;;  %v9841_v47 = vpop.eup %9840 }
0x178a   :  { %v9843_v48 = vpop.eup %9842  ;;  %v2082_v7 = vadd.f32 1.0, %v9841_v47 }
0x178b   :  { %v2081_v9 = vadd.f32 1.0, %v9843_v48 }
0x178c   :  { %9844 = vrcp.f32 %v2082_v7 }
0x178d   :  { %9846 = vrcp.f32 %v2081_v9 }
0x1796   :  { %v9845_v49 = vpop.eup %9844 }
0x1797   :  { %v9847_v51 = vpop.eup %9846  ;;  %v2090_v55 = vmul.f32 %v9845_v49, %v10801_v11 }
0x1798   :  { %v2089_v57 = vmul.f32 %v9847_v51, %v10803_v14 }
0x17fa   :  { %v2096_v50 = vpop.permute.xlu1 %2095 }
0x17fb   :  { %v2100_v52 = vmul.f32 %v9845_v49, %v2096_v50  ;;  %v2094_v53 = vpop.permute.xlu0 %2093 }
0x17fc   :  { %v2099_v54 = vmul.f32 %v9847_v51, %v2094_v53 }
0x17fd   :  { %2105 = vrot.lane.b32.xlu1 %v2100_v52, %s10386_s21 }
0x17fe   :  { %2103 = vrot.lane.b32.xlu0 %v2099_v54, %s10386_s21 }
0x186f   :  { %v2106_v6 = vpop.permute.xlu1 %2105 }
0x1870   :  { %v2110_v61 = vadd.f32 %v2106_v6, %v2090_v55  ;;  %v2104_v62 = vpop.permute.xlu0 %2103 }
0x1871   :  { %v2109_v13 = vadd.f32 %v2104_v62, %v2089_v57 }
0x1872   :  { %9848 = vtanh.f32 %v2110_v61 }
0x1873   :  { %9850 = vtanh.f32 %v2109_v13 }
0x187c   :  { %v9849_v63 = vpop.eup %9848 }
0x187d   :  { %v9851_v0 = vpop.eup %9850  ;;  %2117 = vrot.lane.b32.xlu1 %v9849_v63, %s10386_s21 }
0x187e   :  { %2115 = vrot.lane.b32.xlu0 %v9851_v0, %s10386_s21 }
0x18ef   :  { %v2118_v1 = vpop.permute.xlu1 %2117 }
0x18f0   :  { %v2122_v2 = vmul.f32 %v9845_v49, %v2118_v1  ;;  %v2116_v3 = vpop.permute.xlu0 %2115 }
0x18f1   :  { %v2121_v5 = vmul.f32 %v9847_v51, %v2116_v3 }
0x18f2   :  { %2127 = vrot.lane.b32.xlu1 %v2122_v2, %s10387_s22 }
0x18f3   :  { %2125 = vrot.lane.b32.xlu0 %v2121_v5, %s10387_s22 }
0x18f6   :  { %2210 = vrot.lane.b32.xlu1 %v10817_v25, %s10396_s10 }
0x18f7   :  { %2208 = vrot.lane.b32.xlu0 %v10821_v26, %s10396_s10  ;;  %s10415_s10 = smov 4  }
0x1964   :  { %v10860_v11 = vpop.permute.xlu1 %2127 }
0x1965   :  { %v10858_v10 = vpop.permute.xlu0 %2125  ;;  %11798 = vst [vmem:[#allocation21_spill] sm:$0xff] %v10860_v11 }
0x1966   :  { %8714 = vmatprep.mubr.msk.f32.mxu1 %vm104_vm2, %v10858_v10 }
0x1967   :  { %8715 = vmatmul.mubr.msk.f32.vlgmr.msra.gmra.mrb[12].mxu1 %vm104_vm2, %v10860_v11 }
0x1968   :  { %8718 = vmatpush3.msk.msra.mxu1 %vm190_vm0, %v10827_v29  ;;  %v2211_v14 = vpop.permute.xlu1 %2210 }
0x1969   :  { %v2209_v12 = vpop.permute.xlu0 %2208  ;;  %9198 = vmatprep.subr.bf16.mxu1 %v10534_v4 }
0x196a   :  { %8719 = vmatprep.mubr.msk.f32.mxu1 %vm183_vm1, %v2209_v12 }
0x196f   :  { %8720 = vmatmul.mubr.msk.f32.vlgmr.msra.gmra.mrb[12].mxu1 %vm183_vm1, %v2211_v14 }
0x1970   :  { %9200 = vmatpush3.bf16.msra.mxu1 %v10534_v4 }
0x1971   :  { %9202 = vmatprep.subr.bf16.mxu1 %v10540_v8 }
0x1974   :  { %9204 = vmatpush3.bf16.msra.mxu1 %v10540_v8 }
0x1975   :  { %8749 = vmatprep.subr.msk.mxu1 %vm190_vm0, %v10827_v29 }
0x1a42   :  { %v8721_v15 = vpop.f32.mrb[12].mxu1 }
0x1a43   :  { %v2292_v16 = vadd.f32 %v10842_v33, %v8721_v15  ;;  %v2282_v17 = vpop.f32.mrb[13].mxu1 }
0x1a44   :  { %v2291_v23 = vadd.f32 %v10842_v33, %v2282_v17 }
0x1a45   :  { %9852 = vtanh.f32 %v2292_v16  ;;  %v7945_v30 = vmul.f32 -1.442695, %v2292_v16 }
0x1a46   :  { %9854 = vtanh.f32 %v2291_v23  ;;  %v7944_v31 = vmul.f32 -1.442695, %v2291_v23 }
0x1a47   :  { %9856 = vpow2.f32 %v7945_v30 }
0x1a48   :  { %9858 = vpow2.f32 %v7944_v31 }
0x1a4f   :  { %v9853_v27 = vpop.eup %9852 }
0x1a50   :  { %v9855_v28 = vpop.eup %9854  ;;  %2313 = vrot.lane.b32.xlu1 %v9853_v27, %s10386_s21 }
0x1a51   :  { %2311 = vrot.lane.b32.xlu0 %v9855_v28, %s10386_s21  ;;  %v9857_v32 = vpop.eup %9856 }
0x1a52   :  { %v9859_v34 = vpop.eup %9858  ;;  %v2300_v35 = vadd.f32 1.0, %v9857_v32 }
0x1a53   :  { %v2299_v37 = vadd.f32 1.0, %v9859_v34 }
0x1a54   :  { %9860 = vrcp.f32 %v2300_v35 }
0x1a55   :  { %9862 = vrcp.f32 %v2299_v37 }
0x1a5e   :  { %v9861_v39 = vpop.eup %9860 }
0x1a5f   :  { %v9863_v43 = vpop.eup %9862  ;;  %v2308_v7 = vmul.f32 %v9861_v39, %v2110_v61 }
0x1a60   :  { %v2307_v49 = vmul.f32 %v9863_v43, %v2109_v13 }
0x1ac2   :  { %v2314_v41 = vpop.permute.xlu1 %2313 }
0x1ac3   :  { %v2318_v44 = vmul.f32 %v9861_v39, %v2314_v41  ;;  %v2312_v47 = vpop.permute.xlu0 %2311 }
0x1ac4   :  { %v2317_v48 = vmul.f32 %v9863_v43, %v2312_v47 }
0x1ac5   :  { %2323 = vrot.lane.b32.xlu1 %v2318_v44, %s10386_s21 }
0x1ac6   :  { %2321 = vrot.lane.b32.xlu0 %v2317_v48, %s10386_s21 }
0x1b37   :  { %v2324_v9 = vpop.permute.xlu1 %2323 }
0x1b38   :  { %v2328_v50 = vadd.f32 %v2324_v9, %v2308_v7  ;;  %v2322_v51 = vpop.permute.xlu0 %2321 }
0x1b39   :  { %v2327_v52 = vadd.f32 %v2322_v51, %v2307_v49 }
0x1b3a   :  { %9864 = vtanh.f32 %v2328_v50 }
0x1b3b   :  { %9866 = vtanh.f32 %v2327_v52 }
0x1b44   :  { %v9865_v53 = vpop.eup %9864 }
0x1b45   :  { %v9867_v54 = vpop.eup %9866  ;;  %2335 = vrot.lane.b32.xlu1 %v9865_v53, %s10386_s21 }
0x1b46   :  { %2333 = vrot.lane.b32.xlu0 %v9867_v54, %s10386_s21 }
0x1bb7   :  { %v2336_v55 = vpop.permute.xlu1 %2335 }
0x1bb8   :  { %v10884_v6 = vmul.f32 %v9861_v39, %v2336_v55  ;;  %v2334_v57 = vpop.permute.xlu0 %2333 }
0x1bb9   :  { %v10886_v62 = vmul.f32 %v9863_v43, %v2334_v57 }
0x1bba   :  { %2345 = vrot.lane.b32.xlu1 %v10884_v6, %s10387_s22 }
0x1bbb   :  { %2343 = vrot.lane.b32.xlu0 %v10886_v62, %s10387_s22 }
0x1bbe   :  { %2428 = vrot.lane.b32.xlu1 %v10817_v25, %s10397_s11 }
0x1bbf   :  { %2426 = vrot.lane.b32.xlu0 %v10821_v26, %s10397_s11  ;;  %s10416_s11 = smov [#allocation12]  }
0x1c2c   :  { %v2346_v13 = vpop.permute.xlu1 %2345 }
0x1c2d   :  { %v2344_v61 = vpop.permute.xlu0 %2343 }
0x1c2e   :  { %8730 = vmatprep.mubr.msk.f32.mxu0 %vm104_vm2, %v2344_v61 }
0x1c2f   :  { %8731 = vmatmul.mubr.msk.f32.vlgmr.msra.gmra.mrb[10].mxu0 %vm104_vm2, %v2346_v13 }
0x1c30   :  { %8734 = vmatpush3.msk.msra.mxu0 %vm190_vm0, %v10827_v29  ;;  %v2429_v0 = vpop.permute.xlu1 %2428 }
0x1c31   :  { %v2427_v63 = vpop.permute.xlu0 %2426  ;;  %9206 = vmatprep.subr.bf16.mxu0 %v10534_v4 }
0x1c32   :  { %8735 = vmatprep.mubr.msk.f32.mxu0 %vm183_vm1, %v2427_v63 }
0x1c37   :  { %8736 = vmatmul.mubr.msk.f32.vlgmr.msra.gmra.mrb[10].mxu0 %vm183_vm1, %v2429_v0 }
0x1c38   :  { %9208 = vmatpush3.bf16.msra.mxu0 %v10534_v4 }
0x1c39   :  { %9210 = vmatprep.subr.bf16.mxu0 %v10540_v8 }
0x1c3c   :  { %9212 = vmatpush3.bf16.msra.mxu0 %v10540_v8 }
0x1c3d   :  { %8765 = vmatprep.subr.msk.mxu0 %vm190_vm0, %v10827_v29 }
0x1d0a   :  { %v8737_v1 = vpop.f32.mrb[10].mxu0 }
0x1d0b   :  { %v2510_v2 = vadd.f32 %v10842_v33, %v8737_v1  ;;  %v2500_v3 = vpop.f32.mrb[11].mxu0 }
0x1d0c   :  { %v2509_v5 = vadd.f32 %v10842_v33, %v2500_v3 }
0x1d0d   :  { %9868 = vtanh.f32 %v2510_v2  ;;  %v7952_v15 = vmul.f32 -1.442695, %v2510_v2 }
0x1d0e   :  { %9870 = vtanh.f32 %v2509_v5  ;;  %v7951_v16 = vmul.f32 -1.442695, %v2509_v5 }
0x1d0f   :  { %9872 = vpow2.f32 %v7952_v15 }
0x1d10   :  { %9874 = vpow2.f32 %v7951_v16 }
0x1d17   :  { %v9869_v12 = vpop.eup %9868 }
0x1d18   :  { %v9871_v14 = vpop.eup %9870  ;;  %2531 = vrot.lane.b32.xlu1 %v9869_v12, %s10386_s21 }
0x1d19   :  { %2529 = vrot.lane.b32.xlu0 %v9871_v14, %s10386_s21  ;;  %v9873_v17 = vpop.eup %9872 }
0x1d1a   :  { %v9875_v23 = vpop.eup %9874  ;;  %v2518_v27 = vadd.f32 1.0, %v9873_v17 }
0x1d1b   :  { %v2517_v28 = vadd.f32 1.0, %v9875_v23 }
0x1d1c   :  { %9876 = vrcp.f32 %v2518_v27 }
0x1d1d   :  { %9878 = vrcp.f32 %v2517_v28 }
0x1d26   :  { %v9877_v30 = vpop.eup %9876 }
0x1d27   :  { %v9879_v32 = vpop.eup %9878  ;;  %v2526_v39 = vmul.f32 %v9877_v30, %v2328_v50 }
0x1d28   :  { %v2525_v43 = vmul.f32 %v9879_v32, %v2327_v52 }
0x1d8a   :  { %v2532_v31 = vpop.permute.xlu1 %2531 }
0x1d8b   :  { %v2536_v34 = vmul.f32 %v9877_v30, %v2532_v31  ;;  %v2530_v35 = vpop.permute.xlu0 %2529 }
0x1d8c   :  { %v2535_v37 = vmul.f32 %v9879_v32, %v2530_v35 }
0x1d8d   :  { %2541 = vrot.lane.b32.xlu1 %v2536_v34, %s10386_s21 }
0x1d8e   :  { %2539 = vrot.lane.b32.xlu0 %v2535_v37, %s10386_s21 }
0x1dff   :  { %v2542_v41 = vpop.permute.xlu1 %2541 }
0x1e00   :  { %v2546_v44 = vadd.f32 %v2542_v41, %v2526_v39  ;;  %v2540_v47 = vpop.permute.xlu0 %2539 }
0x1e01   :  { %v2545_v48 = vadd.f32 %v2540_v47, %v2525_v43 }
0x1e02   :  { %9880 = vtanh.f32 %v2546_v44 }
0x1e03   :  { %9882 = vtanh.f32 %v2545_v48 }
0x1e0c   :  { %v9881_v7 = vpop.eup %9880 }
0x1e0d   :  { %v9883_v9 = vpop.eup %9882  ;;  %2553 = vrot.lane.b32.xlu1 %v9881_v7, %s10386_s21 }
0x1e0e   :  { %2551 = vrot.lane.b32.xlu0 %v9883_v9, %s10386_s21 }
0x1e7f   :  { %v2554_v49 = vpop.permute.xlu1 %2553 }
0x1e80   :  { %v10914_v51 = vmul.f32 %v9877_v30, %v2554_v49  ;;  %v2552_v53 = vpop.permute.xlu0 %2551 }
0x1e81   :  { %v10916_v54 = vmul.f32 %v9879_v32, %v2552_v53 }
0x1e82   :  { %11799 = vst [vmem:[#allocation22_spill] sm:$0xff] %v10914_v51  ;;  %2563 = vrot.lane.b32.xlu1 %v10914_v51, %s10387_s22 }
0x1e83   :  { %11800 = vst [vmem:[#allocation23_spill] sm:$0xff] %v10916_v54  ;;  %2561 = vrot.lane.b32.xlu0 %v10916_v54, %s10387_s22 }
0x1e86   :  { %2646 = vrot.lane.b32.xlu1 %v10817_v25, %s10398_s12 }
0x1e87   :  { %2644 = vrot.lane.b32.xlu0 %v10821_v26, %s10398_s12  ;;  %s7863_s12 = sshll.u32 %s10416_s11, 4  ;;  %s7864_s12 = int_to_ptr.vmem [resolvable:$true] %s7863_s12 }
0x1e88   :  { %p10353_p13 = scmp.lt.s32.totalorder %s7864_s12, %s7864_s12 }
0x1ef4   :  { %v2564_v52 = vpop.permute.xlu1 %2563 }
0x1ef5   :  { %v2562_v50 = vpop.permute.xlu0 %2561 }
0x1ef6   :  { %8746 = vmatprep.mubr.msk.f32.mxu1 %vm104_vm2, %v2562_v50 }
0x1ef7   :  { %8747 = vmatmul.mubr.msk.f32.vlgmr.msra.gmra.mrb[14].mxu1 %vm104_vm2, %v2564_v52 }
0x1ef8   :  { %8750 = vmatpush3.msk.msra.mxu1 %vm190_vm0, %v10827_v29  ;;  %v2647_v57 = vpop.permute.xlu1 %2646 }
0x1ef9   :  { %v2645_v55 = vpop.permute.xlu0 %2644  ;;  %9214 = vmatprep.subr.bf16.mxu1 %v10534_v4 }
0x1efa   :  { %8751 = vmatprep.mubr.msk.f32.mxu1 %vm183_vm1, %v2645_v55 }
0x1eff   :  { %8752 = vmatmul.mubr.msk.f32.vlgmr.msra.gmra.mrb[14].mxu1 %vm183_vm1, %v2647_v57 }
0x1f00   :  { %9216 = vmatpush3.bf16.msra.mxu1 %v10534_v4 }
0x1f01   :  { %9218 = vmatprep.subr.bf16.mxu1 %v10540_v8 }
0x1f04   :  { %9220 = vmatpush3.bf16.msra.mxu1 %v10540_v8 }
0x1f05   :  { %8781 = vmatprep.subr.msk.mxu1 %vm190_vm0, %v10827_v29 }
0x1fd2   :  { %v8753_v25 = vpop.f32.mrb[14].mxu1 }
0x1fd3   :  { %v2728_v26 = vadd.f32 %v10842_v33, %v8753_v25  ;;  %v2718_v61 = vpop.f32.mrb[15].mxu1 }
0x1fd4   :  { %v2727_v13 = vadd.f32 %v10842_v33, %v2718_v61 }
0x1fd5   :  { %9884 = vtanh.f32 %v2728_v26  ;;  %v7959_v1 = vmul.f32 -1.442695, %v2728_v26 }
0x1fd6   :  { %9886 = vtanh.f32 %v2727_v13  ;;  %v7958_v2 = vmul.f32 -1.442695, %v2727_v13 }
0x1fd7   :  { %9888 = vpow2.f32 %v7959_v1 }
0x1fd8   :  { %9890 = vpow2.f32 %v7958_v2 }
0x1fdf   :  { %v9885_v63 = vpop.eup %9884 }
0x1fe0   :  { %v9887_v0 = vpop.eup %9886  ;;  %2749 = vrot.lane.b32.xlu1 %v9885_v63, %s10386_s21 }
0x1fe1   :  { %2747 = vrot.lane.b32.xlu0 %v9887_v0, %s10386_s21  ;;  %v9889_v3 = vpop.eup %9888 }
0x1fe2   :  { %v9891_v5 = vpop.eup %9890  ;;  %v2736_v12 = vadd.f32 1.0, %v9889_v3 }
0x1fe3   :  { %v2735_v14 = vadd.f32 1.0, %v9891_v5 }
0x1fe4   :  { %9892 = vrcp.f32 %v2736_v12 }
0x1fe5   :  { %9894 = vrcp.f32 %v2735_v14 }
0x1fee   :  { %v9893_v15 = vpop.eup %9892 }
0x1fef   :  { %v9895_v17 = vpop.eup %9894  ;;  %v2744_v30 = vmul.f32 %v9893_v15, %v2546_v44  ;;  %v10952_v44 = vld [vmem:[#allocation3 + $0x8] sm:$0xff] }
0x1ff0   :  { %v2743_v32 = vmul.f32 %v9895_v17, %v2545_v48  ;;  %v10954_v48 = vld [vmem:[#allocation3] sm:$0xff] }
0x2052   :  { %v2750_v16 = vpop.permute.xlu1 %2749 }
0x2053   :  { %v2754_v23 = vmul.f32 %v9893_v15, %v2750_v16  ;;  %v2748_v27 = vpop.permute.xlu0 %2747 }
0x2054   :  { %v2753_v28 = vmul.f32 %v9895_v17, %v2748_v27 }
0x2055   :  { %2759 = vrot.lane.b32.xlu1 %v2754_v23, %s10386_s21 }
0x2056   :  { %2757 = vrot.lane.b32.xlu0 %v2753_v28, %s10386_s21 }
0x20c7   :  { %v2760_v31 = vpop.permute.xlu1 %2759 }
0x20c8   :  { %v2764_v34 = vadd.f32 %v2760_v31, %v2744_v30  ;;  %v2758_v35 = vpop.permute.xlu0 %2757 }
0x20c9   :  { %v2763_v37 = vadd.f32 %v2758_v35, %v2743_v32 }
0x20ca   :  { %9896 = vtanh.f32 %v2764_v34 }
0x20cb   :  { %9898 = vtanh.f32 %v2763_v37 }
0x20d4   :  { %v9897_v39 = vpop.eup %9896 }
0x20d5   :  { %v9899_v41 = vpop.eup %9898  ;;  %2771 = vrot.lane.b32.xlu1 %v9897_v39, %s10386_s21 }
0x20d6   :  { %2769 = vrot.lane.b32.xlu0 %v9899_v41, %s10386_s21 }
0x2147   :  { %v2772_v43 = vpop.permute.xlu1 %2771 }
0x2148   :  { %v10944_v47 = vmul.f32 %v9893_v15, %v2772_v43  ;;  %v2770_v7 = vpop.permute.xlu0 %2769 }
0x2149   :  { %v10946_v9 = vmul.f32 %v9895_v17, %v2770_v7 }
0x214a   :  { %2805 = vrot.lane.b32.xlu1 %v10944_v47, %s10387_s22 }
0x214b   :  { %2803 = vrot.lane.b32.xlu0 %v10946_v9, %s10387_s22 }
0x214e   :  { %2890 = vrot.lane.b32.xlu1 %v10952_v44, %s10399_s13 }
0x214f   :  { %2888 = vrot.lane.b32.xlu0 %v10954_v48, %s10399_s13  ;;  %s10348_s13 = scalar_lea.vmem %s7864_s12, 256 }
0x2150   :  { %p10349_p12 = scmp.ne.s32.totalorder %s7864_s12, %s10348_s13  ;;  %p10354_p0 = scmp.lt.s32.totalorder %s10348_s13, %s10348_s13 }
0x2152   :  { %p10355_p1 = por %p10354_p0, %p10353_p13 }
0x2154   :  { %p10356_p2 = pnand %p10355_p1, %p10349_p12 }
0x21bc   :  { %v2806_v53 = vpop.permute.xlu1 %2805 }
0x21bd   :  { %v2804_v49 = vpop.permute.xlu0 %2803 }
0x21be   :  { %8762 = vmatprep.mubr.msk.f32.mxu0 %vm104_vm2, %v2804_v49 }
0x21bf   :  { %8763 = vmatmul.mubr.msk.f32.vlgmr.msra.gmra.mrb[12].mxu0 %vm104_vm2, %v2806_v53 }
0x21c0   :  { %8766 = vmatpush3.msk.msra.mxu0 %vm190_vm0, %v10827_v29  ;;  %v2891_v52 = vpop.permute.xlu1 %2890 }
0x21c1   :  { %v2889_v50 = vpop.permute.xlu0 %2888  ;;  %9222 = vmatprep.subr.bf16.mxu0 %v10534_v4 }
0x21c2   :  { %8767 = vmatprep.mubr.msk.f32.mxu0 %vm183_vm1, %v2889_v50 }
0x21c7   :  { %8768 = vmatmul.mubr.msk.f32.vlgmr.msra.gmra.mrb[12].mxu0 %vm183_vm1, %v2891_v52 }
0x21c8   :  { %9224 = vmatpush3.bf16.msra.mxu0 %v10534_v4 }
0x21c9   :  { %9226 = vmatprep.subr.bf16.mxu0 %v10540_v8 }
0x21cc   :  { %9228 = vmatpush3.bf16.msra.mxu0 %v10540_v8 }
0x21cd   :  { %8797 = vmatprep.subr.msk.mxu0 %vm190_vm0, %v10827_v29 }
0x229a   :  { %v8769_v55 = vpop.f32.mrb[12].mxu0 }
0x229b   :  { %v2972_v57 = vadd.f32 %v10842_v33, %v8769_v55  ;;  %v2962_v25 = vpop.f32.mrb[13].mxu0 }
0x229c   :  { %v2971_v26 = vadd.f32 %v10842_v33, %v2962_v25 }
0x229d   :  { %9900 = vtanh.f32 %v2972_v57  ;;  %v7966_v63 = vmul.f32 -1.442695, %v2972_v57 }
0x229e   :  { %9902 = vtanh.f32 %v2971_v26  ;;  %v7965_v0 = vmul.f32 -1.442695, %v2971_v26 }
0x229f   :  { %9904 = vpow2.f32 %v7966_v63 }
0x22a0   :  { %9906 = vpow2.f32 %v7965_v0 }
0x22a7   :  { %v9901_v61 = vpop.eup %9900 }
0x22a8   :  { %v9903_v13 = vpop.eup %9902  ;;  %2993 = vrot.lane.b32.xlu1 %v9901_v61, %s10386_s21 }
0x22a9   :  { %2991 = vrot.lane.b32.xlu0 %v9903_v13, %s10386_s21  ;;  %v9905_v1 = vpop.eup %9904 }
0x22aa   :  { %v9907_v2 = vpop.eup %9906  ;;  %v2980_v3 = vadd.f32 1.0, %v9905_v1 }
0x22ab   :  { %v2979_v5 = vadd.f32 1.0, %v9907_v2 }
0x22ac   :  { %9908 = vrcp.f32 %v2980_v3 }
0x22ad   :  { %9910 = vrcp.f32 %v2979_v5 }
0x22b6   :  { %v9909_v12 = vpop.eup %9908 }
0x22b7   :  { %v9911_v15 = vpop.eup %9910  ;;  %v2988_v27 = vmul.f32 %v9909_v12, %v2764_v34 }
0x22b8   :  { %v2987_v30 = vmul.f32 %v9911_v15, %v2763_v37 }
0x231a   :  { %v2994_v14 = vpop.permute.xlu1 %2993 }
0x231b   :  { %v2998_v16 = vmul.f32 %v9909_v12, %v2994_v14  ;;  %v2992_v17 = vpop.permute.xlu0 %2991 }
0x231c   :  { %v2997_v23 = vmul.f32 %v9911_v15, %v2992_v17 }
0x231d   :  { %3003 = vrot.lane.b32.xlu1 %v2998_v16, %s10386_s21 }
0x231e   :  { %3001 = vrot.lane.b32.xlu0 %v2997_v23, %s10386_s21 }
0x238f   :  { %v3004_v28 = vpop.permute.xlu1 %3003 }
0x2390   :  { %v3008_v31 = vadd.f32 %v3004_v28, %v2988_v27  ;;  %v3002_v32 = vpop.permute.xlu0 %3001 }
0x2391   :  { %v3007_v35 = vadd.f32 %v3002_v32, %v2987_v30 }
0x2392   :  { %9912 = vtanh.f32 %v3008_v31 }
0x2393   :  { %9914 = vtanh.f32 %v3007_v35 }
0x239c   :  { %v9913_v39 = vpop.eup %9912 }
0x239d   :  { %v9915_v41 = vpop.eup %9914  ;;  %3015 = vrot.lane.b32.xlu1 %v9913_v39, %s10386_s21 }
0x239e   :  { %3013 = vrot.lane.b32.xlu0 %v9915_v41, %s10386_s21 }
0x240f   :  { %v3016_v43 = vpop.permute.xlu1 %3015 }
0x2410   :  { %v3020_v7 = vmul.f32 %v9909_v12, %v3016_v43  ;;  %v3014_v49 = vpop.permute.xlu0 %3013 }
0x2411   :  { %v3019_v53 = vmul.f32 %v9911_v15, %v3014_v49 }
0x2412   :  { %3025 = vrot.lane.b32.xlu1 %v3020_v7, %s10387_s22 }
0x2413   :  { %3023 = vrot.lane.b32.xlu0 %v3019_v53, %s10387_s22 }
0x2416   :  { %3108 = vrot.lane.b32.xlu1 %v10952_v44, %s10400_s14 }
0x2417   :  { %3106 = vrot.lane.b32.xlu0 %v10954_v48, %s10400_s14 }
0x2484   :  { %v10984_v37 = vpop.permute.xlu1 %3025 }
0x2485   :  { %v10982_v34 = vpop.permute.xlu0 %3023  ;;  %11802 = vst [vmem:[#allocation25_spill] sm:$0xff] %v10984_v37 }
0x2486   :  { %11801 = vst [vmem:[#allocation24_spill] sm:$0xff] %v10982_v34  ;;  %8778 = vmatprep.mubr.msk.f32.mxu1 %vm104_vm2, %v10982_v34 }
0x2487   :  { %8779 = vmatmul.mubr.msk.f32.vlgmr.msra.gmra.mrb[16].mxu1 %vm104_vm2, %v10984_v37 }
0x2488   :  { %8782 = vmatpush3.msk.msra.mxu1 %vm190_vm0, %v10827_v29  ;;  %v3109_v52 = vpop.permute.xlu1 %3108 }
0x2489   :  { %v3107_v50 = vpop.permute.xlu0 %3106  ;;  %9230 = vmatprep.subr.bf16.mxu1 %v10534_v4 }
0x248a   :  { %8783 = vmatprep.mubr.msk.f32.mxu1 %vm183_vm1, %v3107_v50 }
0x248f   :  { %8784 = vmatmul.mubr.msk.f32.vlgmr.msra.gmra.mrb[16].mxu1 %vm183_vm1, %v3109_v52 }
0x2490   :  { %9232 = vmatpush3.bf16.msra.mxu1 %v10534_v4 }
0x2491   :  { %9234 = vmatprep.subr.bf16.mxu1 %v10540_v8 }
0x2494   :  { %9236 = vmatpush3.bf16.msra.mxu1 %v10540_v8 }
0x2495   :  { %8813 = vmatprep.subr.msk.mxu1 %vm190_vm0, %v10827_v29 }
0x2562   :  { %v8785_v55 = vpop.f32.mrb[16].mxu1 }
0x2563   :  { %v3190_v57 = vadd.f32 %v10842_v33, %v8785_v55  ;;  %v3180_v25 = vpop.f32.mrb[17].mxu1 }
0x2564   :  { %v3189_v26 = vadd.f32 %v10842_v33, %v3180_v25 }
0x2565   :  { %9916 = vtanh.f32 %v3190_v57  ;;  %v7973_v63 = vmul.f32 -1.442695, %v3190_v57 }
0x2566   :  { %9918 = vtanh.f32 %v3189_v26  ;;  %v7972_v0 = vmul.f32 -1.442695, %v3189_v26 }
0x2567   :  { %9920 = vpow2.f32 %v7973_v63 }
0x2568   :  { %9922 = vpow2.f32 %v7972_v0 }
0x256f   :  { %v9917_v61 = vpop.eup %9916 }
0x2570   :  { %v9919_v13 = vpop.eup %9918  ;;  %3211 = vrot.lane.b32.xlu1 %v9917_v61, %s10386_s21 }
0x2571   :  { %3209 = vrot.lane.b32.xlu0 %v9919_v13, %s10386_s21  ;;  %v9921_v1 = vpop.eup %9920 }
0x2572   :  { %v9923_v2 = vpop.eup %9922  ;;  %v3198_v3 = vadd.f32 1.0, %v9921_v1 }
0x2573   :  { %v3197_v5 = vadd.f32 1.0, %v9923_v2 }
0x2574   :  { %9924 = vrcp.f32 %v3198_v3 }
0x2575   :  { %9926 = vrcp.f32 %v3197_v5 }
0x257e   :  { %v9925_v12 = vpop.eup %9924 }
0x257f   :  { %v9927_v15 = vpop.eup %9926  ;;  %v3206_v27 = vmul.f32 %v9925_v12, %v3008_v31 }
0x2580   :  { %v3205_v30 = vmul.f32 %v9927_v15, %v3007_v35 }
0x25e2   :  { %v3212_v14 = vpop.permute.xlu1 %3211 }
0x25e3   :  { %v3216_v16 = vmul.f32 %v9925_v12, %v3212_v14  ;;  %v3210_v17 = vpop.permute.xlu0 %3209 }
0x25e4   :  { %v3215_v23 = vmul.f32 %v9927_v15, %v3210_v17 }
0x25e5   :  { %3221 = vrot.lane.b32.xlu1 %v3216_v16, %s10386_s21 }
0x25e6   :  { %3219 = vrot.lane.b32.xlu0 %v3215_v23, %s10386_s21 }
0x2657   :  { %v3222_v28 = vpop.permute.xlu1 %3221 }
0x2658   :  { %v3226_v32 = vadd.f32 %v3222_v28, %v3206_v27  ;;  %v3220_v39 = vpop.permute.xlu0 %3219 }
0x2659   :  { %v3225_v41 = vadd.f32 %v3220_v39, %v3205_v30 }
0x265a   :  { %9928 = vtanh.f32 %v3226_v32 }
0x265b   :  { %9930 = vtanh.f32 %v3225_v41 }
0x2664   :  { %v9929_v43 = vpop.eup %9928 }
0x2665   :  { %v9931_v7 = vpop.eup %9930  ;;  %3233 = vrot.lane.b32.xlu1 %v9929_v43, %s10386_s21 }
0x2666   :  { %3231 = vrot.lane.b32.xlu0 %v9931_v7, %s10386_s21 }
0x26d7   :  { %v3234_v49 = vpop.permute.xlu1 %3233 }
0x26d8   :  { %v11008_v53 = vmul.f32 %v9925_v12, %v3234_v49  ;;  %v3232_v50 = vpop.permute.xlu0 %3231 }
0x26d9   :  { %v11010_v52 = vmul.f32 %v9927_v15, %v3232_v50 }
0x26da   :  { %3243 = vrot.lane.b32.xlu1 %v11008_v53, %s10387_s22 }
0x26db   :  { %3241 = vrot.lane.b32.xlu0 %v11010_v52, %s10387_s22 }
0x26de   :  { %3326 = vrot.lane.b32.xlu1 %v10952_v44, %s10401_s15 }
0x26df   :  { %3324 = vrot.lane.b32.xlu0 %v10954_v48, %s10401_s15 }
0x274c   :  { %v3244_v35 = vpop.permute.xlu1 %3243 }
0x274d   :  { %v3242_v31 = vpop.permute.xlu0 %3241 }
0x274e   :  { %8794 = vmatprep.mubr.msk.f32.mxu0 %vm104_vm2, %v3242_v31 }
0x274f   :  { %8795 = vmatmul.mubr.msk.f32.vlgmr.msra.gmra.mrb[14].mxu0 %vm104_vm2, %v3244_v35 }
0x2750   :  { %8798 = vmatpush3.msk.msra.mxu0 %vm190_vm0, %v10827_v29  ;;  %v3327_v57 = vpop.permute.xlu1 %3326 }
0x2751   :  { %v3325_v55 = vpop.permute.xlu0 %3324  ;;  %9238 = vmatprep.subr.bf16.mxu0 %v10534_v4 }
0x2752   :  { %8799 = vmatprep.mubr.msk.f32.mxu0 %vm183_vm1, %v3325_v55 }
0x2757   :  { %8800 = vmatmul.mubr.msk.f32.vlgmr.msra.gmra.mrb[14].mxu0 %vm183_vm1, %v3327_v57 }
0x2758   :  { %9240 = vmatpush3.bf16.msra.mxu0 %v10534_v4 }
0x2759   :  { %9242 = vmatprep.subr.bf16.mxu0 %v10540_v8 }
0x275c   :  { %9244 = vmatpush3.bf16.msra.mxu0 %v10540_v8 }
0x275d   :  { %8829 = vmatprep.subr.msk.mxu0 %vm190_vm0, %v10827_v29 }
0x282a   :  { %v8801_v25 = vpop.f32.mrb[14].mxu0 }
0x282b   :  { %v3408_v26 = vadd.f32 %v10842_v33, %v8801_v25  ;;  %v3398_v61 = vpop.f32.mrb[15].mxu0 }
0x282c   :  { %v3407_v13 = vadd.f32 %v10842_v33, %v3398_v61 }
0x282d   :  { %9932 = vtanh.f32 %v3408_v26  ;;  %v7980_v1 = vmul.f32 -1.442695, %v3408_v26 }
0x282e   :  { %9934 = vtanh.f32 %v3407_v13  ;;  %v7979_v2 = vmul.f32 -1.442695, %v3407_v13 }
0x282f   :  { %9936 = vpow2.f32 %v7980_v1 }
0x2830   :  { %9938 = vpow2.f32 %v7979_v2 }
0x2837   :  { %v9933_v63 = vpop.eup %9932 }
0x2838   :  { %v9935_v0 = vpop.eup %9934  ;;  %3429 = vrot.lane.b32.xlu1 %v9933_v63, %s10386_s21 }
0x2839   :  { %3427 = vrot.lane.b32.xlu0 %v9935_v0, %s10386_s21  ;;  %v9937_v3 = vpop.eup %9936 }
0x283a   :  { %v9939_v5 = vpop.eup %9938  ;;  %v3416_v12 = vadd.f32 1.0, %v9937_v3 }
0x283b   :  { %v3415_v14 = vadd.f32 1.0, %v9939_v5 }
0x283c   :  { %9940 = vrcp.f32 %v3416_v12 }
0x283d   :  { %9942 = vrcp.f32 %v3415_v14 }
0x2846   :  { %v9941_v15 = vpop.eup %9940 }
0x2847   :  { %v9943_v17 = vpop.eup %9942  ;;  %v3424_v30 = vmul.f32 %v9941_v15, %v3226_v32 }
0x2848   :  { %v3423_v43 = vmul.f32 %v9943_v17, %v3225_v41 }
0x28aa   :  { %v3430_v16 = vpop.permute.xlu1 %3429 }
0x28ab   :  { %v3434_v23 = vmul.f32 %v9941_v15, %v3430_v16  ;;  %v3428_v27 = vpop.permute.xlu0 %3427 }
0x28ac   :  { %v3433_v28 = vmul.f32 %v9943_v17, %v3428_v27 }
0x28ad   :  { %3439 = vrot.lane.b32.xlu1 %v3434_v23, %s10386_s21 }
0x28ae   :  { %3437 = vrot.lane.b32.xlu0 %v3433_v28, %s10386_s21 }
0x291f   :  { %v3440_v39 = vpop.permute.xlu1 %3439 }
0x2920   :  { %v3444_v7 = vadd.f32 %v3440_v39, %v3424_v30  ;;  %v3438_v49 = vpop.permute.xlu0 %3437 }
0x2921   :  { %v3443_v50 = vadd.f32 %v3438_v49, %v3423_v43 }
0x2922   :  { %9944 = vtanh.f32 %v3444_v7 }
0x2923   :  { %9946 = vtanh.f32 %v3443_v50 }
0x292c   :  { %v9945_v31 = vpop.eup %9944 }
0x292d   :  { %v9947_v35 = vpop.eup %9946  ;;  %3451 = vrot.lane.b32.xlu1 %v9945_v31, %s10386_s21 }
0x292e   :  { %3449 = vrot.lane.b32.xlu0 %v9947_v35, %s10386_s21 }
0x299f   :  { %v3452_v55 = vpop.permute.xlu1 %3451 }
0x29a0   :  { %v11038_v57 = vmul.f32 %v9941_v15, %v3452_v55  ;;  %v3450_v25 = vpop.permute.xlu0 %3449 }
0x29a1   :  { %v11040_v26 = vmul.f32 %v9943_v17, %v3450_v25 }
0x29a2   :  { %11803 = vst [vmem:[#allocation26_spill] sm:$0xff] %v11038_v57  ;;  %3461 = vrot.lane.b32.xlu1 %v11038_v57, %s10387_s22 }
0x29a3   :  { %11804 = vst [vmem:[#allocation27_spill] sm:$0xff] %v11040_v26  ;;  %3459 = vrot.lane.b32.xlu0 %v11040_v26, %s10387_s22  ;;  %v7332_v26 = vld [vmem:[#allocation9 + $0xb8] sm:$0xff] }
0x29a6   :  { %3544 = vrot.lane.b32.xlu1 %v10952_v44, %s10402_s16 }
0x29a7   :  { %3542 = vrot.lane.b32.xlu0 %v10954_v48, %s10402_s16 }
0x2a14   :  { %v3462_v41 = vpop.permute.xlu1 %3461 }
0x2a15   :  { %v3460_v32 = vpop.permute.xlu0 %3459 }
0x2a16   :  { %8810 = vmatprep.mubr.msk.f32.mxu1 %vm104_vm2, %v3460_v32 }
0x2a17   :  { %8811 = vmatmul.mubr.msk.f32.vlgmr.msra.gmra.mrb[18].mxu1 %vm104_vm2, %v3462_v41 }
0x2a18   :  { %8814 = vmatpush3.msk.msra.mxu1 %vm190_vm0, %v10827_v29  ;;  %v3545_v13 = vpop.permute.xlu1 %3544 }
0x2a19   :  { %v3543_v61 = vpop.permute.xlu0 %3542  ;;  %9246 = vmatprep.subr.bf16.mxu1 %v10534_v4 }
0x2a1a   :  { %8815 = vmatprep.mubr.msk.f32.mxu1 %vm183_vm1, %v3543_v61 }
0x2a1f   :  { %8816 = vmatmul.mubr.msk.f32.vlgmr.msra.gmra.mrb[18].mxu1 %vm183_vm1, %v3545_v13 }
0x2a20   :  { %9248 = vmatpush3.bf16.msra.mxu1 %v10534_v4 }
0x2a21   :  { %9250 = vmatprep.subr.bf16.mxu1 %v10540_v8 }
0x2a24   :  { %9252 = vmatpush3.bf16.msra.mxu1 %v10540_v8 }
0x2a25   :  { %8845 = vmatprep.subr.msk.mxu1 %vm190_vm0, %v10827_v29 }
0x2af2   :  { %v8817_v63 = vpop.f32.mrb[18].mxu1 }
0x2af3   :  { %v3626_v0 = vadd.f32 %v10842_v33, %v8817_v63  ;;  %v3616_v1 = vpop.f32.mrb[19].mxu1 }
0x2af4   :  { %v3625_v2 = vadd.f32 %v10842_v33, %v3616_v1 }
0x2af5   :  { %9948 = vtanh.f32 %v3626_v0  ;;  %v7987_v12 = vmul.f32 -1.442695, %v3626_v0 }
0x2af6   :  { %9950 = vtanh.f32 %v3625_v2  ;;  %v7986_v14 = vmul.f32 -1.442695, %v3625_v2 }
0x2af7   :  { %9952 = vpow2.f32 %v7987_v12  ;;  %v11090_v12 = vld [vmem:[#allocation6] sm:$0xf] }
0x2af8   :  { %9954 = vpow2.f32 %v7986_v14 }
0x2aff   :  { %v9949_v3 = vpop.eup %9948 }
0x2b00   :  { %v9951_v5 = vpop.eup %9950  ;;  %3647 = vrot.lane.b32.xlu1 %v9949_v3, %s10386_s21 }
0x2b01   :  { %3645 = vrot.lane.b32.xlu0 %v9951_v5, %s10386_s21  ;;  %v9953_v15 = vpop.eup %9952 }
0x2b02   :  { %v9955_v16 = vpop.eup %9954  ;;  %v3634_v17 = vadd.f32 1.0, %v9953_v15 }
0x2b03   :  { %v3633_v23 = vadd.f32 1.0, %v9955_v16 }
0x2b04   :  { %9956 = vrcp.f32 %v3634_v17 }
0x2b05   :  { %9958 = vrcp.f32 %v3633_v23 }
0x2b0e   :  { %v9957_v27 = vpop.eup %9956 }
0x2b0f   :  { %v9959_v30 = vpop.eup %9958  ;;  %v3642_v31 = vmul.f32 %v9957_v27, %v3444_v7 }
0x2b10   :  { %v3641_v55 = vmul.f32 %v9959_v30, %v3443_v50 }
0x2b72   :  { %v3648_v28 = vpop.permute.xlu1 %3647 }
0x2b73   :  { %v3652_v39 = vmul.f32 %v9957_v27, %v3648_v28  ;;  %v3646_v43 = vpop.permute.xlu0 %3645 }
0x2b74   :  { %v3651_v49 = vmul.f32 %v9959_v30, %v3646_v43 }
0x2b75   :  { %3657 = vrot.lane.b32.xlu1 %v3652_v39, %s10386_s21 }
0x2b76   :  { %3655 = vrot.lane.b32.xlu0 %v3651_v49, %s10386_s21 }
0x2be7   :  { %v3658_v35 = vpop.permute.xlu1 %3657 }
0x2be8   :  { %v3662_v25 = vadd.f32 %v3658_v35, %v3642_v31  ;;  %v3656_v32 = vpop.permute.xlu0 %3655 }
0x2be9   :  { %v3661_v41 = vadd.f32 %v3656_v32, %v3641_v55 }
0x2bea   :  { %9960 = vtanh.f32 %v3662_v25 }
0x2beb   :  { %9962 = vtanh.f32 %v3661_v41 }
0x2bf4   :  { %v9961_v61 = vpop.eup %9960 }
0x2bf5   :  { %v9963_v13 = vpop.eup %9962  ;;  %3669 = vrot.lane.b32.xlu1 %v9961_v61, %s10386_s21 }
0x2bf6   :  { %3667 = vrot.lane.b32.xlu0 %v9963_v13, %s10386_s21 }
0x2c67   :  { %v3670_v63 = vpop.permute.xlu1 %3669 }
0x2c68   :  { %v11068_v0 = vmul.f32 %v9957_v27, %v3670_v63  ;;  %v3668_v1 = vpop.permute.xlu0 %3667 }
0x2c69   :  { %v11070_v2 = vmul.f32 %v9959_v30, %v3668_v1 }
0x2c6a   :  { %3703 = vrot.lane.b32.xlu1 %v11068_v0, %s10387_s22 }
0x2c6b   :  { %3701 = vrot.lane.b32.xlu0 %v11070_v2, %s10387_s22 }
0x2c6e   :  { %3788 = vrot.lane.b32.xlu1 %v10952_v44, %s10387_s22 }
0x2c6f   :  { %3786 = vrot.lane.b32.xlu0 %v10954_v48, %s10387_s22 }
0x2cdc   :  { %v3704_v50 = vpop.permute.xlu1 %3703 }
0x2cdd   :  { %v3702_v7 = vpop.permute.xlu0 %3701 }
0x2cde   :  { %8826 = vmatprep.mubr.msk.f32.mxu0 %vm104_vm2, %v3702_v7 }
0x2cdf   :  { %8827 = vmatmul.mubr.msk.f32.vlgmr.msra.gmra.mrb[16].mxu0 %vm104_vm2, %v3704_v50 }
0x2ce0   :  { %8830 = vmatpush3.msk.msra.mxu0 %vm190_vm0, %v10827_v29  ;;  %v3789_v5 = vpop.permute.xlu1 %3788 }
0x2ce1   :  { %v3787_v3 = vpop.permute.xlu0 %3786  ;;  %9254 = vmatprep.subr.bf16.mxu0 %v10534_v4 }
0x2ce2   :  { %8831 = vmatprep.mubr.msk.f32.mxu0 %vm183_vm1, %v3787_v3 }
0x2ce7   :  { %8832 = vmatmul.mubr.msk.f32.vlgmr.msra.gmra.mrb[16].mxu0 %vm183_vm1, %v3789_v5 }
0x2ce8   :  { %9256 = vmatpush3.bf16.msra.mxu0 %v10534_v4 }
0x2ce9   :  { %9258 = vmatprep.subr.bf16.mxu0 %v10540_v8 }
0x2cec   :  { %9260 = vmatpush3.bf16.msra.mxu0 %v10540_v8 }
0x2ced   :  { %8861 = vmatprep.subr.msk.mxu0 %vm190_vm0, %v11090_v12 }
0x2dba   :  { %v8833_v29 = vpop.f32.mrb[16].mxu0 }
0x2dbb   :  { %v3870_v14 = vadd.f32 %v10842_v33, %v8833_v29  ;;  %v3860_v15 = vpop.f32.mrb[17].mxu0 }
0x2dbc   :  { %v3869_v16 = vadd.f32 %v10842_v33, %v3860_v15 }
0x2dbd   :  { %9964 = vtanh.f32 %v3870_v14  ;;  %v7994_v27 = vmul.f32 -1.442695, %v3870_v14 }
0x2dbe   :  { %9966 = vtanh.f32 %v3869_v16  ;;  %v7993_v28 = vmul.f32 -1.442695, %v3869_v16 }
0x2dbf   :  { %9968 = vpow2.f32 %v7994_v27 }
0x2dc0   :  { %9970 = vpow2.f32 %v7993_v28 }
0x2dc7   :  { %v9965_v17 = vpop.eup %9964 }
0x2dc8   :  { %v9967_v23 = vpop.eup %9966  ;;  %3891 = vrot.lane.b32.xlu1 %v9965_v17, %s10386_s21 }
0x2dc9   :  { %3889 = vrot.lane.b32.xlu0 %v9967_v23, %s10386_s21  ;;  %v9969_v30 = vpop.eup %9968 }
0x2dca   :  { %v9971_v39 = vpop.eup %9970  ;;  %v3878_v43 = vadd.f32 1.0, %v9969_v30  ;;  %v11127_v30 = vld [vmem:[%s11761_s3] ss:$0 sm:$0xff] }
0x2dcb   :  { %v3877_v49 = vadd.f32 1.0, %v9971_v39 }
0x2dcc   :  { %9972 = vrcp.f32 %v3878_v43 }
0x2dcd   :  { %9974 = vrcp.f32 %v3877_v49 }
0x2dd6   :  { %v9973_v31 = vpop.eup %9972 }
0x2dd7   :  { %v9975_v35 = vpop.eup %9974  ;;  %v3886_v13 = vmul.f32 %v9973_v31, %v3662_v25 }
0x2dd8   :  { %v3885_v1 = vmul.f32 %v9975_v35, %v3661_v41 }
0x2e3a   :  { %v3892_v33 = vpop.permute.xlu1 %3891 }
0x2e3b   :  { %v3896_v55 = vmul.f32 %v9973_v31, %v3892_v33  ;;  %v3890_v32 = vpop.permute.xlu0 %3889 }
0x2e3c   :  { %v3895_v61 = vmul.f32 %v9975_v35, %v3890_v32 }
0x2e3d   :  { %3901 = vrot.lane.b32.xlu1 %v3896_v55, %s10386_s21 }
0x2e3e   :  { %3899 = vrot.lane.b32.xlu0 %v3895_v61, %s10386_s21 }
0x2eaf   :  { %v3902_v63 = vpop.permute.xlu1 %3901 }
0x2eb0   :  { %v3906_v7 = vadd.f32 %v3902_v63, %v3886_v13  ;;  %v3900_v50 = vpop.permute.xlu0 %3899 }
0x2eb1   :  { %v3905_v3 = vadd.f32 %v3900_v50, %v3885_v1 }
0x2eb2   :  { %9976 = vtanh.f32 %v3906_v7 }
0x2eb3   :  { %9978 = vtanh.f32 %v3905_v3 }
0x2ebc   :  { %v9977_v5 = vpop.eup %9976 }
0x2ebd   :  { %v9979_v29 = vpop.eup %9978  ;;  %3913 = vrot.lane.b32.xlu1 %v9977_v5, %s10386_s21 }
0x2ebe   :  { %3911 = vrot.lane.b32.xlu0 %v9979_v29, %s10386_s21 }
0x2f2f   :  { %v3914_v14 = vpop.permute.xlu1 %3913 }
0x2f30   :  { %v3918_v15 = vmul.f32 %v9973_v31, %v3914_v14  ;;  %v3912_v16 = vpop.permute.xlu0 %3911 }
0x2f31   :  { %v3917_v17 = vmul.f32 %v9975_v35, %v3912_v16 }
0x2f32   :  { %3923 = vrot.lane.b32.xlu1 %v3918_v15, %s10387_s22 }
0x2f33   :  { %3921 = vrot.lane.b32.xlu0 %v3917_v17, %s10387_s22 }
0x2f36   :  { %4006 = vrot.lane.b32.xlu1 %v10952_v44, %s10403_s17 }
0x2f37   :  { %4004 = vrot.lane.b32.xlu0 %v10954_v48, %s10403_s17 }
0x2fa4   :  { %v11108_v41 = vpop.permute.xlu1 %3923 }
0x2fa5   :  { %v11106_v25 = vpop.permute.xlu0 %3921  ;;  %11806 = vst [vmem:[#allocation29_spill] sm:$0xff] %v11108_v41 }
0x2fa6   :  { %11805 = vst [vmem:[#allocation28_spill] sm:$0xff] %v11106_v25  ;;  %8842 = vmatprep.mubr.msk.f32.mxu1 %vm104_vm2, %v11106_v25 }
0x2fa7   :  { %8843 = vmatmul.mubr.msk.f32.vlgmr.msra.gmra.mrb[20].mxu1 %vm104_vm2, %v11108_v41 }
0x2fa8   :  { %8846 = vmatpush3.msk.msra.mxu1 %vm190_vm0, %v11090_v12  ;;  %v4007_v27 = vpop.permute.xlu1 %4006 }
0x2fa9   :  { %v4005_v23 = vpop.permute.xlu0 %4004  ;;  %9262 = vmatprep.subr.bf16.mxu1 %v10534_v4 }
0x2faa   :  { %8847 = vmatprep.mubr.msk.f32.mxu1 %vm183_vm1, %v4005_v23 }
0x2faf   :  { %8848 = vmatmul.mubr.msk.f32.vlgmr.msra.gmra.mrb[20].mxu1 %vm183_vm1, %v4007_v27 }
0x2fb0   :  { %9264 = vmatpush3.bf16.msra.mxu1 %v10534_v4 }
0x2fb1   :  { %9266 = vmatprep.subr.bf16.mxu1 %v10540_v8 }
0x2fb4   :  { %9268 = vmatpush3.bf16.msra.mxu1 %v10540_v8 }
0x2fb5   :  { %8877 = vmatprep.subr.msk.mxu1 %vm190_vm0, %v11090_v12 }
0x3082   :  { %v8849_v28 = vpop.f32.mrb[20].mxu1 }
0x3083   :  { %v4088_v39 = vadd.f32 %v11127_v30, %v8849_v28  ;;  %v4078_v43 = vpop.f32.mrb[21].mxu1 }
0x3084   :  { %v4087_v49 = vadd.f32 %v11127_v30, %v4078_v43 }
0x3085   :  { %9980 = vtanh.f32 %v4088_v39  ;;  %v8001_v35 = vmul.f32 -1.442695, %v4088_v39 }
0x3086   :  { %9982 = vtanh.f32 %v4087_v49  ;;  %v8000_v55 = vmul.f32 -1.442695, %v4087_v49 }
0x3087   :  { %9984 = vpow2.f32 %v8001_v35 }
0x3088   :  { %9986 = vpow2.f32 %v8000_v55 }
0x308f   :  { %v9981_v31 = vpop.eup %9980 }
0x3090   :  { %v9983_v33 = vpop.eup %9982  ;;  %4109 = vrot.lane.b32.xlu1 %v9981_v31, %s10386_s21 }
0x3091   :  { %4107 = vrot.lane.b32.xlu0 %v9983_v33, %s10386_s21  ;;  %v9985_v32 = vpop.eup %9984 }
0x3092   :  { %v9987_v61 = vpop.eup %9986  ;;  %v4096_v13 = vadd.f32 1.0, %v9985_v32 }
0x3093   :  { %v4095_v63 = vadd.f32 1.0, %v9987_v61 }
0x3094   :  { %9988 = vrcp.f32 %v4096_v13 }
0x3095   :  { %9990 = vrcp.f32 %v4095_v63 }
0x309e   :  { %v9989_v1 = vpop.eup %9988 }
0x309f   :  { %v9991_v5 = vpop.eup %9990  ;;  %v4104_v16 = vmul.f32 %v9989_v1, %v3906_v7 }
0x30a0   :  { %v4103_v23 = vmul.f32 %v9991_v5, %v3905_v3 }
0x3102   :  { %v4110_v50 = vpop.permute.xlu1 %4109 }
0x3103   :  { %v4114_v29 = vmul.f32 %v9989_v1, %v4110_v50  ;;  %v4108_v14 = vpop.permute.xlu0 %4107 }
0x3104   :  { %v4113_v15 = vmul.f32 %v9991_v5, %v4108_v14 }
0x3105   :  { %4119 = vrot.lane.b32.xlu1 %v4114_v29, %s10386_s21 }
0x3106   :  { %4117 = vrot.lane.b32.xlu0 %v4113_v15, %s10386_s21 }
0x3177   :  { %v4120_v17 = vpop.permute.xlu1 %4119 }
0x3178   :  { %v4124_v27 = vadd.f32 %v4120_v17, %v4104_v16  ;;  %v4118_v28 = vpop.permute.xlu0 %4117 }
0x3179   :  { %v4123_v39 = vadd.f32 %v4118_v28, %v4103_v23 }
0x317a   :  { %9992 = vtanh.f32 %v4124_v27 }
0x317b   :  { %9994 = vtanh.f32 %v4123_v39 }
0x3184   :  { %v9993_v43 = vpop.eup %9992 }
0x3185   :  { %v9995_v49 = vpop.eup %9994  ;;  %4131 = vrot.lane.b32.xlu1 %v9993_v43, %s10386_s21 }
0x3186   :  { %4129 = vrot.lane.b32.xlu0 %v9995_v49, %s10386_s21 }
0x31f7   :  { %v4132_v31 = vpop.permute.xlu1 %4131 }
0x31f8   :  { %v11137_v33 = vmul.f32 %v9989_v1, %v4132_v31  ;;  %v4130_v35 = vpop.permute.xlu0 %4129 }
0x31f9   :  { %v11139_v55 = vmul.f32 %v9991_v5, %v4130_v35 }
0x31fa   :  { %4141 = vrot.lane.b32.xlu1 %v11137_v33, %s10387_s22 }
0x31fb   :  { %4139 = vrot.lane.b32.xlu0 %v11139_v55, %s10387_s22 }
0x31fe   :  { %4224 = vrot.lane.b32.xlu1 %v10952_v44, %s10404_s18 }
0x31ff   :  { %4222 = vrot.lane.b32.xlu0 %v10954_v48, %s10404_s18 }
0x326c   :  { %v4142_v3 = vpop.permute.xlu1 %4141 }
0x326d   :  { %v4140_v7 = vpop.permute.xlu0 %4139 }
0x326e   :  { %8858 = vmatprep.mubr.msk.f32.mxu0 %vm104_vm2, %v4140_v7 }
0x326f   :  { %8859 = vmatmul.mubr.msk.f32.vlgmr.msra.gmra.mrb[18].mxu0 %vm104_vm2, %v4142_v3 }
0x3270   :  { %8862 = vmatpush3.msk.msra.mxu0 %vm190_vm0, %v11090_v12  ;;  %v4225_v61 = vpop.permute.xlu1 %4224 }
0x3271   :  { %v4223_v32 = vpop.permute.xlu0 %4222  ;;  %9270 = vmatprep.subr.bf16.mxu0 %v10534_v4 }
0x3272   :  { %8863 = vmatprep.mubr.msk.f32.mxu0 %vm183_vm1, %v4223_v32 }
0x3277   :  { %8864 = vmatmul.mubr.msk.f32.vlgmr.msra.gmra.mrb[18].mxu0 %vm183_vm1, %v4225_v61 }
0x3278   :  { %9272 = vmatpush3.bf16.msra.mxu0 %v10534_v4 }
0x3279   :  { %9274 = vmatprep.subr.bf16.mxu0 %v10540_v8 }
0x327c   :  { %9276 = vmatpush3.bf16.msra.mxu0 %v10540_v8 }
0x327d   :  { %8893 = vmatprep.subr.msk.mxu0 %vm190_vm0, %v11090_v12 }
0x334a   :  { %v8865_v13 = vpop.f32.mrb[18].mxu0 }
0x334b   :  { %v4306_v63 = vadd.f32 %v11127_v30, %v8865_v13  ;;  %v4296_v1 = vpop.f32.mrb[19].mxu0 }
0x334c   :  { %v4305_v50 = vadd.f32 %v11127_v30, %v4296_v1 }
0x334d   :  { %9996 = vtanh.f32 %v4306_v63  ;;  %v8008_v14 = vmul.f32 -1.442695, %v4306_v63 }
0x334e   :  { %9998 = vtanh.f32 %v4305_v50  ;;  %v8007_v15 = vmul.f32 -1.442695, %v4305_v50 }
0x334f   :  { %10000 = vpow2.f32 %v8008_v14 }
0x3350   :  { %10002 = vpow2.f32 %v8007_v15 }
0x3357   :  { %v9997_v5 = vpop.eup %9996 }
0x3358   :  { %v9999_v29 = vpop.eup %9998  ;;  %4327 = vrot.lane.b32.xlu1 %v9997_v5, %s10386_s21 }
0x3359   :  { %4325 = vrot.lane.b32.xlu0 %v9999_v29, %s10386_s21  ;;  %v10001_v16 = vpop.eup %10000 }
0x335a   :  { %v10003_v17 = vpop.eup %10002  ;;  %v4314_v23 = vadd.f32 1.0, %v10001_v16 }
0x335b   :  { %v4313_v28 = vadd.f32 1.0, %v10003_v17 }
0x335c   :  { %10004 = vrcp.f32 %v4314_v23 }
0x335d   :  { %10006 = vrcp.f32 %v4313_v28 }
0x3366   :  { %v10005_v43 = vpop.eup %10004 }
0x3367   :  { %v10007_v31 = vpop.eup %10006  ;;  %v4322_v32 = vmul.f32 %v10005_v43, %v4124_v27 }
0x3368   :  { %v4321_v13 = vmul.f32 %v10007_v31, %v4123_v39 }
0x33ca   :  { %v4328_v49 = vpop.permute.xlu1 %4327 }
0x33cb   :  { %v4332_v35 = vmul.f32 %v10005_v43, %v4328_v49  ;;  %v4326_v7 = vpop.permute.xlu0 %4325 }
0x33cc   :  { %v4331_v3 = vmul.f32 %v10007_v31, %v4326_v7 }
0x33cd   :  { %4337 = vrot.lane.b32.xlu1 %v4332_v35, %s10386_s21 }
0x33ce   :  { %4335 = vrot.lane.b32.xlu0 %v4331_v3, %s10386_s21 }
0x343f   :  { %v4338_v61 = vpop.permute.xlu1 %4337 }
0x3440   :  { %v4342_v63 = vadd.f32 %v4338_v61, %v4322_v32  ;;  %v4336_v1 = vpop.permute.xlu0 %4335 }
0x3441   :  { %v4341_v50 = vadd.f32 %v4336_v1, %v4321_v13 }
0x3442   :  { %10008 = vtanh.f32 %v4342_v63 }
0x3443   :  { %10010 = vtanh.f32 %v4341_v50 }
0x344c   :  { %v10009_v5 = vpop.eup %10008 }
0x344d   :  { %v10011_v29 = vpop.eup %10010  ;;  %4349 = vrot.lane.b32.xlu1 %v10009_v5, %s10386_s21 }
0x344e   :  { %4347 = vrot.lane.b32.xlu0 %v10011_v29, %s10386_s21 }
0x34bf   :  { %v4350_v14 = vpop.permute.xlu1 %4349 }
0x34c0   :  { %v11167_v15 = vmul.f32 %v10005_v43, %v4350_v14  ;;  %v4348_v16 = vpop.permute.xlu0 %4347 }
0x34c1   :  { %v11169_v17 = vmul.f32 %v10007_v31, %v4348_v16 }
0x34c2   :  { %11807 = vst [vmem:[#allocation30_spill] sm:$0xff] %v11167_v15  ;;  %4359 = vrot.lane.b32.xlu1 %v11167_v15, %s10387_s22 }
0x34c3   :  { %11808 = vst [vmem:[#allocation31_spill] sm:$0xff] %v11169_v17  ;;  %4357 = vrot.lane.b32.xlu0 %v11169_v17, %s10387_s22 }
0x34c6   :  { %4442 = vrot.lane.b32.xlu1 %v10952_v44, %s10405_s6 }
0x34c7   :  { %4440 = vrot.lane.b32.xlu0 %v10954_v48, %s10405_s6 }
0x3534   :  { %v4360_v39 = vpop.permute.xlu1 %4359 }
0x3535   :  { %v4358_v27 = vpop.permute.xlu0 %4357 }
0x3536   :  { %8874 = vmatprep.mubr.msk.f32.mxu1 %vm104_vm2, %v4358_v27 }
0x3537   :  { %8875 = vmatmul.mubr.msk.f32.vlgmr.msra.gmra.mrb[22].mxu1 %vm104_vm2, %v4360_v39 }
0x3538   :  { %8878 = vmatpush3.msk.msra.mxu1 %vm190_vm0, %v11090_v12  ;;  %v4443_v28 = vpop.permute.xlu1 %4442 }
0x3539   :  { %v4441_v23 = vpop.permute.xlu0 %4440  ;;  %9278 = vmatprep.subr.bf16.mxu1 %v10534_v4 }
0x353a   :  { %8879 = vmatprep.mubr.msk.f32.mxu1 %vm183_vm1, %v4441_v23 }
0x353f   :  { %8880 = vmatmul.mubr.msk.f32.vlgmr.msra.gmra.mrb[22].mxu1 %vm183_vm1, %v4443_v28 }
0x3540   :  { %9280 = vmatpush3.bf16.msra.mxu1 %v10534_v4 }
0x3541   :  { %9282 = vmatprep.subr.bf16.mxu1 %v10540_v8 }
0x3544   :  { %9284 = vmatpush3.bf16.msra.mxu1 %v10540_v8 }
0x3545   :  { %8909 = vmatprep.subr.msk.mxu1 %vm190_vm0, %v11090_v12 }
0x3612   :  { %v8881_v43 = vpop.f32.mrb[22].mxu1 }
0x3613   :  { %v4524_v49 = vadd.f32 %v11127_v30, %v8881_v43  ;;  %v4514_v31 = vpop.f32.mrb[23].mxu1 }
0x3614   :  { %v4523_v35 = vadd.f32 %v11127_v30, %v4514_v31 }
0x3615   :  { %10012 = vtanh.f32 %v4524_v49  ;;  %v8015_v32 = vmul.f32 -1.442695, %v4524_v49 }
0x3616   :  { %10014 = vtanh.f32 %v4523_v35  ;;  %v8014_v61 = vmul.f32 -1.442695, %v4523_v35 }
0x3617   :  { %10016 = vpow2.f32 %v8015_v32 }
0x3618   :  { %10018 = vpow2.f32 %v8014_v61 }
0x361f   :  { %v10013_v7 = vpop.eup %10012 }
0x3620   :  { %v10015_v3 = vpop.eup %10014  ;;  %4545 = vrot.lane.b32.xlu1 %v10013_v7, %s10386_s21 }
0x3621   :  { %4543 = vrot.lane.b32.xlu0 %v10015_v3, %s10386_s21  ;;  %v10017_v13 = vpop.eup %10016 }
0x3622   :  { %v10019_v1 = vpop.eup %10018  ;;  %v4532_v5 = vadd.f32 1.0, %v10017_v13 }
0x3623   :  { %v4531_v29 = vadd.f32 1.0, %v10019_v1 }
0x3624   :  { %10020 = vrcp.f32 %v4532_v5 }
0x3625   :  { %10022 = vrcp.f32 %v4531_v29 }
0x362e   :  { %v10021_v14 = vpop.eup %10020 }
0x362f   :  { %v10023_v27 = vpop.eup %10022  ;;  %v4540_v43 = vmul.f32 %v10021_v14, %v4342_v63 }
0x3630   :  { %v4539_v31 = vmul.f32 %v10023_v27, %v4341_v50 }
0x3692   :  { %v4546_v16 = vpop.permute.xlu1 %4545 }
0x3693   :  { %v4550_v39 = vmul.f32 %v10021_v14, %v4546_v16  ;;  %v4544_v23 = vpop.permute.xlu0 %4543 }
0x3694   :  { %v4549_v28 = vmul.f32 %v10023_v27, %v4544_v23 }
0x3695   :  { %4555 = vrot.lane.b32.xlu1 %v4550_v39, %s10386_s21 }
0x3696   :  { %4553 = vrot.lane.b32.xlu0 %v4549_v28, %s10386_s21 }
0x3707   :  { %v4556_v49 = vpop.permute.xlu1 %4555 }
0x3708   :  { %v4560_v35 = vadd.f32 %v4556_v49, %v4540_v43  ;;  %v4554_v7 = vpop.permute.xlu0 %4553 }
0x3709   :  { %v4559_v3 = vadd.f32 %v4554_v7, %v4539_v31 }
0x370a   :  { %10024 = vtanh.f32 %v4560_v35 }
0x370b   :  { %10026 = vtanh.f32 %v4559_v3 }
0x3714   :  { %v10025_v32 = vpop.eup %10024 }
0x3715   :  { %v10027_v61 = vpop.eup %10026  ;;  %4567 = vrot.lane.b32.xlu1 %v10025_v32, %s10386_s21 }
0x3716   :  { %4565 = vrot.lane.b32.xlu0 %v10027_v61, %s10386_s21 }
0x3787   :  { %v4568_v13 = vpop.permute.xlu1 %4567 }
0x3788   :  { %v11197_v1 = vmul.f32 %v10021_v14, %v4568_v13  ;;  %v4566_v5 = vpop.permute.xlu0 %4565 }
0x3789   :  { %v11199_v29 = vmul.f32 %v10023_v27, %v4566_v5 }
0x378a   :  { %4601 = vrot.lane.b32.xlu1 %v11197_v1, %s10387_s22 }
0x378b   :  { %4599 = vrot.lane.b32.xlu0 %v11199_v29, %s10387_s22 }
0x378e   :  { %4686 = vrot.lane.b32.xlu1 %v10952_v44, %s10406_s19 }
0x378f   :  { %4684 = vrot.lane.b32.xlu0 %v10954_v48, %s10406_s19 }
0x37fc   :  { %v4602_v50 = vpop.permute.xlu1 %4601 }
0x37fd   :  { %v4600_v63 = vpop.permute.xlu0 %4599 }
0x37fe   :  { %8890 = vmatprep.mubr.msk.f32.mxu0 %vm104_vm2, %v4600_v63 }
0x37ff   :  { %8891 = vmatmul.mubr.msk.f32.vlgmr.msra.gmra.mrb[20].mxu0 %vm104_vm2, %v4602_v50 }
0x3800   :  { %8894 = vmatpush3.msk.msra.mxu0 %vm190_vm0, %v11090_v12  ;;  %v4687_v16 = vpop.permute.xlu1 %4686 }
0x3801   :  { %v4685_v14 = vpop.permute.xlu0 %4684  ;;  %9286 = vmatprep.subr.bf16.mxu0 %v10534_v4 }
0x3802   :  { %8895 = vmatprep.mubr.msk.f32.mxu0 %vm183_vm1, %v4685_v14 }
0x3807   :  { %8896 = vmatmul.mubr.msk.f32.vlgmr.msra.gmra.mrb[20].mxu0 %vm183_vm1, %v4687_v16 }
0x3808   :  { %9288 = vmatpush3.bf16.msra.mxu0 %v10534_v4 }
0x3809   :  { %9290 = vmatprep.subr.bf16.mxu0 %v10540_v8 }
0x380c   :  { %9292 = vmatpush3.bf16.msra.mxu0 %v10540_v8 }
0x380d   :  { %8925 = vmatprep.subr.msk.mxu0 %vm190_vm0, %v11090_v12 }
0x38da   :  { %v8897_v44 = vpop.f32.mrb[20].mxu0 }
0x38db   :  { %v4768_v48 = vadd.f32 %v11127_v30, %v8897_v44  ;;  %v4758_v27 = vpop.f32.mrb[21].mxu0 }
0x38dc   :  { %v4767_v39 = vadd.f32 %v11127_v30, %v4758_v27 }
0x38dd   :  { %10028 = vtanh.f32 %v4768_v48  ;;  %v8022_v43 = vmul.f32 -1.442695, %v4768_v48 }
0x38de   :  { %10030 = vtanh.f32 %v4767_v39  ;;  %v8021_v49 = vmul.f32 -1.442695, %v4767_v39 }
0x38df   :  { %10032 = vpow2.f32 %v8022_v43 }
0x38e0   :  { %10034 = vpow2.f32 %v8021_v49 }
0x38e7   :  { %v10029_v23 = vpop.eup %10028 }
0x38e8   :  { %v10031_v28 = vpop.eup %10030  ;;  %4789 = vrot.lane.b32.xlu1 %v10029_v23, %s10386_s21 }
0x38e9   :  { %4787 = vrot.lane.b32.xlu0 %v10031_v28, %s10386_s21  ;;  %v10033_v31 = vpop.eup %10032 }
0x38ea   :  { %v10035_v7 = vpop.eup %10034  ;;  %v4776_v32 = vadd.f32 1.0, %v10033_v31 }
0x38eb   :  { %v4775_v61 = vadd.f32 1.0, %v10035_v7 }
0x38ec   :  { %10036 = vrcp.f32 %v4776_v32 }
0x38ed   :  { %10038 = vrcp.f32 %v4775_v61 }
0x38f6   :  { %v10037_v13 = vpop.eup %10036 }
0x38f7   :  { %v10039_v63 = vpop.eup %10038  ;;  %v4784_v44 = vmul.f32 %v10037_v13, %v4560_v35  ;;  %v11229_v35 = vld [vmem:[#allocation3 + $0x8] sm:$0xff] }
0x38f8   :  { %v4783_v27 = vmul.f32 %v10039_v63, %v4559_v3  ;;  %v11232_v3 = vld [vmem:[#allocation3] sm:$0xff] }
0x395a   :  { %v4790_v5 = vpop.permute.xlu1 %4789 }
0x395b   :  { %v4794_v50 = vmul.f32 %v10037_v13, %v4790_v5  ;;  %v4788_v14 = vpop.permute.xlu0 %4787 }
0x395c   :  { %v4793_v16 = vmul.f32 %v10039_v63, %v4788_v14 }
0x395d   :  { %4799 = vrot.lane.b32.xlu1 %v4794_v50, %s10386_s21 }
0x395e   :  { %4797 = vrot.lane.b32.xlu0 %v4793_v16, %s10386_s21 }
0x39cf   :  { %v4800_v48 = vpop.permute.xlu1 %4799 }
0x39d0   :  { %v4804_v39 = vadd.f32 %v4800_v48, %v4784_v44  ;;  %v4798_v23 = vpop.permute.xlu0 %4797 }
0x39d1   :  { %v4803_v28 = vadd.f32 %v4798_v23, %v4783_v27 }
0x39d2   :  { %10040 = vtanh.f32 %v4804_v39 }
0x39d3   :  { %10042 = vtanh.f32 %v4803_v28 }
0x39dc   :  { %v10041_v43 = vpop.eup %10040 }
0x39dd   :  { %v10043_v49 = vpop.eup %10042  ;;  %4811 = vrot.lane.b32.xlu1 %v10041_v43, %s10386_s21 }
0x39de   :  { %4809 = vrot.lane.b32.xlu0 %v10043_v49, %s10386_s21 }
0x3a4f   :  { %v4812_v31 = vpop.permute.xlu1 %4811 }
0x3a50   :  { %v4816_v7 = vmul.f32 %v10037_v13, %v4812_v31  ;;  %v4810_v32 = vpop.permute.xlu0 %4809 }
0x3a51   :  { %v4815_v61 = vmul.f32 %v10039_v63, %v4810_v32 }
0x3a52   :  { %4821 = vrot.lane.b32.xlu1 %v4816_v7, %s10387_s22 }
0x3a53   :  { %4819 = vrot.lane.b32.xlu0 %v4815_v61, %s10387_s22 }
0x3a56   :  { %4904 = vrot.lane.b32.xlu1 %v11229_v35, %s10407_s23 }
0x3a57   :  { %4902 = vrot.lane.b32.xlu0 %v11232_v3, %s10407_s23 }
0x3ac4   :  { %v11237_v50 = vpop.permute.xlu1 %4821 }
0x3ac5   :  { %v11235_v5 = vpop.permute.xlu0 %4819  ;;  %11810 = vst [vmem:[#allocation33_spill] sm:$0xff] %v11237_v50 }
0x3ac6   :  { %11809 = vst [vmem:[#allocation32_spill] sm:$0xff] %v11235_v5  ;;  %8906 = vmatprep.mubr.msk.f32.mxu1 %vm104_vm2, %v11235_v5 }
0x3ac7   :  { %8907 = vmatmul.mubr.msk.f32.vlgmr.msra.gmra.mrb[24].mxu1 %vm104_vm2, %v11237_v50 }
0x3ac8   :  { %8910 = vmatpush3.msk.msra.mxu1 %vm190_vm0, %v11090_v12  ;;  %v4905_v63 = vpop.permute.xlu1 %4904 }
0x3ac9   :  { %v4903_v13 = vpop.permute.xlu0 %4902  ;;  %9294 = vmatprep.subr.bf16.mxu1 %v10534_v4 }
0x3aca   :  { %8911 = vmatprep.mubr.msk.f32.mxu1 %vm183_vm1, %v4903_v13 }
0x3acf   :  { %8912 = vmatmul.mubr.msk.f32.vlgmr.msra.gmra.mrb[24].mxu1 %vm183_vm1, %v4905_v63 }
0x3ad0   :  { %9296 = vmatpush3.bf16.msra.mxu1 %v10534_v4 }
0x3ad1   :  { %9298 = vmatprep.subr.bf16.mxu1 %v10540_v8 }
0x3ad4   :  { %9300 = vmatpush3.bf16.msra.mxu1 %v10540_v8 }
0x3ad5   :  { %8941 = vmatprep.subr.msk.mxu1 %vm190_vm0, %v11090_v12 }
0x3ba2   :  { %v8913_v14 = vpop.f32.mrb[24].mxu1 }
0x3ba3   :  { %v4986_v16 = vadd.f32 %v11127_v30, %v8913_v14  ;;  %v4976_v44 = vpop.f32.mrb[25].mxu1 }
0x3ba4   :  { %v4985_v48 = vadd.f32 %v11127_v30, %v4976_v44 }
0x3ba5   :  { %10044 = vtanh.f32 %v4986_v16  ;;  %v8029_v43 = vmul.f32 -1.442695, %v4986_v16 }
0x3ba6   :  { %10046 = vtanh.f32 %v4985_v48  ;;  %v8028_v49 = vmul.f32 -1.442695, %v4985_v48 }
0x3ba7   :  { %10048 = vpow2.f32 %v8029_v43 }
0x3ba8   :  { %10050 = vpow2.f32 %v8028_v49 }
0x3baf   :  { %v10045_v27 = vpop.eup %10044 }
0x3bb0   :  { %v10047_v23 = vpop.eup %10046  ;;  %5007 = vrot.lane.b32.xlu1 %v10045_v27, %s10386_s21 }
0x3bb1   :  { %5005 = vrot.lane.b32.xlu0 %v10047_v23, %s10386_s21  ;;  %v10049_v31 = vpop.eup %10048 }
0x3bb2   :  { %v10051_v7 = vpop.eup %10050  ;;  %v4994_v32 = vadd.f32 1.0, %v10049_v31 }
0x3bb3   :  { %v4993_v61 = vadd.f32 1.0, %v10051_v7 }
0x3bb4   :  { %10052 = vrcp.f32 %v4994_v32 }
0x3bb5   :  { %10054 = vrcp.f32 %v4993_v61 }
0x3bbe   :  { %v10053_v13 = vpop.eup %10052 }
0x3bbf   :  { %v10055_v14 = vpop.eup %10054  ;;  %v5002_v16 = vmul.f32 %v10053_v13, %v4804_v39 }
0x3bc0   :  { %v5001_v27 = vmul.f32 %v10055_v14, %v4803_v28 }
0x3c22   :  { %v5008_v63 = vpop.permute.xlu1 %5007 }
0x3c23   :  { %v5012_v44 = vmul.f32 %v10053_v13, %v5008_v63  ;;  %v5006_v15 = vpop.permute.xlu0 %5005 }
0x3c24   :  { %v5011_v41 = vmul.f32 %v10055_v14, %v5006_v15 }
0x3c25   :  { %5017 = vrot.lane.b32.xlu1 %v5012_v44, %s10386_s21 }
0x3c26   :  { %5015 = vrot.lane.b32.xlu0 %v5011_v41, %s10386_s21 }
0x3c97   :  { %v5018_v48 = vpop.permute.xlu1 %5017 }
0x3c98   :  { %v5022_v23 = vadd.f32 %v5018_v48, %v5002_v16  ;;  %v5016_v43 = vpop.permute.xlu0 %5015 }
0x3c99   :  { %v5021_v49 = vadd.f32 %v5016_v43, %v5001_v27 }
0x3c9a   :  { %10056 = vtanh.f32 %v5022_v23 }
0x3c9b   :  { %10058 = vtanh.f32 %v5021_v49 }
0x3ca4   :  { %v10057_v31 = vpop.eup %10056 }
0x3ca5   :  { %v10059_v7 = vpop.eup %10058  ;;  %5029 = vrot.lane.b32.xlu1 %v10057_v31, %s10386_s21 }
0x3ca6   :  { %5027 = vrot.lane.b32.xlu0 %v10059_v7, %s10386_s21 }
0x3d17   :  { %v5030_v32 = vpop.permute.xlu1 %5029 }
0x3d18   :  { %v11261_v15 = vmul.f32 %v10053_v13, %v5030_v32  ;;  %v5028_v61 = vpop.permute.xlu0 %5027 }
0x3d19   :  { %v11263_v63 = vmul.f32 %v10055_v14, %v5028_v61 }
0x3d1a   :  { %5039 = vrot.lane.b32.xlu1 %v11261_v15, %s10387_s22 }
0x3d1b   :  { %5037 = vrot.lane.b32.xlu0 %v11263_v63, %s10387_s22 }
0x3d1e   :  { %5122 = vrot.lane.b32.xlu1 %v11229_v35, %s10408_s24 }
0x3d1f   :  { %5120 = vrot.lane.b32.xlu0 %v11232_v3, %s10408_s24 }
0x3d8c   :  { %v5040_v39 = vpop.permute.xlu1 %5039 }
0x3d8d   :  { %v5038_v41 = vpop.permute.xlu0 %5037 }
0x3d8e   :  { %8922 = vmatprep.mubr.msk.f32.mxu0 %vm104_vm2, %v5038_v41 }
0x3d8f   :  { %8923 = vmatmul.mubr.msk.f32.vlgmr.msra.gmra.mrb[22].mxu0 %vm104_vm2, %v5040_v39 }
0x3d90   :  { %8926 = vmatpush3.msk.msra.mxu0 %vm190_vm0, %v11090_v12  ;;  %v5123_v13 = vpop.permute.xlu1 %5122 }
0x3d91   :  { %v5121_v28 = vpop.permute.xlu0 %5120  ;;  %9302 = vmatprep.subr.bf16.mxu0 %v10534_v4 }
0x3d92   :  { %8927 = vmatprep.mubr.msk.f32.mxu0 %vm183_vm1, %v5121_v28 }
0x3d97   :  { %8928 = vmatmul.mubr.msk.f32.vlgmr.msra.gmra.mrb[22].mxu0 %vm183_vm1, %v5123_v13 }
0x3d98   :  { %9304 = vmatpush3.bf16.msra.mxu0 %v10534_v4 }
0x3d99   :  { %9306 = vmatprep.subr.bf16.mxu0 %v10540_v8 }
0x3d9c   :  { %9308 = vmatpush3.bf16.msra.mxu0 %v10540_v8 }
0x3d9d   :  { %8957 = vmatprep.subr.msk.mxu0 %vm190_vm0, %v11090_v12 }
0x3e6a   :  { %v8929_v14 = vpop.f32.mrb[22].mxu0 }
0x3e6b   :  { %v5204_v44 = vadd.f32 %v11127_v30, %v8929_v14  ;;  %v5194_v16 = vpop.f32.mrb[23].mxu0 }
0x3e6c   :  { %v5203_v48 = vadd.f32 %v11127_v30, %v5194_v16 }
0x3e6d   :  { %10060 = vtanh.f32 %v5204_v44  ;;  %v8036_v31 = vmul.f32 -1.442695, %v5204_v44 }
0x3e6e   :  { %10062 = vtanh.f32 %v5203_v48  ;;  %v8035_v7 = vmul.f32 -1.442695, %v5203_v48 }
0x3e6f   :  { %10064 = vpow2.f32 %v8036_v31 }
0x3e70   :  { %10066 = vpow2.f32 %v8035_v7 }
0x3e77   :  { %v10061_v27 = vpop.eup %10060 }
0x3e78   :  { %v10063_v43 = vpop.eup %10062  ;;  %5225 = vrot.lane.b32.xlu1 %v10061_v27, %s10386_s21 }
0x3e79   :  { %5223 = vrot.lane.b32.xlu0 %v10063_v43, %s10386_s21  ;;  %v10065_v32 = vpop.eup %10064 }
0x3e7a   :  { %v10067_v61 = vpop.eup %10066  ;;  %v5212_v41 = vadd.f32 1.0, %v10065_v32 }
0x3e7b   :  { %v5211_v39 = vadd.f32 1.0, %v10067_v61 }
0x3e7c   :  { %10068 = vrcp.f32 %v5212_v41 }
0x3e7d   :  { %10070 = vrcp.f32 %v5211_v39 }
0x3e86   :  { %v10069_v28 = vpop.eup %10068 }
0x3e87   :  { %v10071_v14 = vpop.eup %10070  ;;  %v5220_v44 = vmul.f32 %v10069_v28, %v5022_v23 }
0x3e88   :  { %v5219_v27 = vmul.f32 %v10071_v14, %v5021_v49 }
0x3eea   :  { %v5226_v13 = vpop.permute.xlu1 %5225 }
0x3eeb   :  { %v5230_v16 = vmul.f32 %v10069_v28, %v5226_v13  ;;  %v5224_v50 = vpop.permute.xlu0 %5223 }
0x3eec   :  { %v5229_v17 = vmul.f32 %v10071_v14, %v5224_v50 }
0x3eed   :  { %5235 = vrot.lane.b32.xlu1 %v5230_v16, %s10386_s21 }
0x3eee   :  { %5233 = vrot.lane.b32.xlu0 %v5229_v17, %s10386_s21 }
0x3f5f   :  { %v5236_v48 = vpop.permute.xlu1 %5235 }
0x3f60   :  { %v5240_v43 = vadd.f32 %v5236_v48, %v5220_v44  ;;  %v5234_v31 = vpop.permute.xlu0 %5233 }
0x3f61   :  { %v5239_v7 = vadd.f32 %v5234_v31, %v5219_v27 }
0x3f62   :  { %10072 = vtanh.f32 %v5240_v43 }
0x3f63   :  { %10074 = vtanh.f32 %v5239_v7 }
0x3f6c   :  { %v10073_v32 = vpop.eup %10072 }
0x3f6d   :  { %v10075_v61 = vpop.eup %10074  ;;  %5247 = vrot.lane.b32.xlu1 %v10073_v32, %s10386_s21 }
0x3f6e   :  { %5245 = vrot.lane.b32.xlu0 %v10075_v61, %s10386_s21 }
0x3fdf   :  { %v5248_v41 = vpop.permute.xlu1 %5247 }
0x3fe0   :  { %v11291_v50 = vmul.f32 %v10069_v28, %v5248_v41  ;;  %v5246_v39 = vpop.permute.xlu0 %5245 }
0x3fe1   :  { %v11293_v13 = vmul.f32 %v10071_v14, %v5246_v39 }
0x3fe2   :  { %11811 = vst [vmem:[#allocation34_spill] sm:$0xff] %v11291_v50  ;;  %5257 = vrot.lane.b32.xlu1 %v11291_v50, %s10387_s22 }
0x3fe3   :  { %11812 = vst [vmem:[#allocation35_spill] sm:$0xff] %v11293_v13  ;;  %5255 = vrot.lane.b32.xlu0 %v11293_v13, %s10387_s22 }
0x3fe6   :  { %5340 = vrot.lane.b32.xlu1 %v11229_v35, %s10409_s25 }
0x3fe7   :  { %5338 = vrot.lane.b32.xlu0 %v11232_v3, %s10409_s25 }
0x4054   :  { %v5258_v23 = vpop.permute.xlu1 %5257 }
0x4055   :  { %v5256_v17 = vpop.permute.xlu0 %5255 }
0x4056   :  { %8938 = vmatprep.mubr.msk.f32.mxu1 %vm104_vm2, %v5256_v17 }
0x4057   :  { %8939 = vmatmul.mubr.msk.f32.vlgmr.msra.gmra.mrb[26].mxu1 %vm104_vm2, %v5258_v23 }
0x4058   :  { %8942 = vmatpush3.msk.msra.mxu1 %vm190_vm0, %v11090_v12  ;;  %v5341_v28 = vpop.permute.xlu1 %5340 }
0x4059   :  { %v5339_v49 = vpop.permute.xlu0 %5338  ;;  %9310 = vmatprep.subr.bf16.mxu1 %v10534_v4 }
0x405a   :  { %8943 = vmatprep.mubr.msk.f32.mxu1 %vm183_vm1, %v5339_v49 }
0x405f   :  { %8944 = vmatmul.mubr.msk.f32.vlgmr.msra.gmra.mrb[26].mxu1 %vm183_vm1, %v5341_v28 }
0x4060   :  { %9312 = vmatpush3.bf16.msra.mxu1 %v10534_v4 }
0x4061   :  { %9314 = vmatprep.subr.bf16.mxu1 %v10540_v8 }
0x4064   :  { %9316 = vmatpush3.bf16.msra.mxu1 %v10540_v8 }
0x4065   :  { %8973 = vmatprep.subr.msk.mxu1 %vm190_vm0, %v11090_v12 }
0x4132   :  { %v8945_v35 = vpop.f32.mrb[26].mxu1 }
0x4133   :  { %v5422_v3 = vadd.f32 %v11127_v30, %v8945_v35  ;;  %v5412_v14 = vpop.f32.mrb[27].mxu1 }
0x4134   :  { %v5421_v16 = vadd.f32 %v11127_v30, %v5412_v14 }
0x4135   :  { %10076 = vtanh.f32 %v5422_v3  ;;  %v8043_v27 = vmul.f32 -1.442695, %v5422_v3 }
0x4136   :  { %10078 = vtanh.f32 %v5421_v16  ;;  %v8042_v31 = vmul.f32 -1.442695, %v5421_v16 }
0x4137   :  { %10080 = vpow2.f32 %v8043_v27 }
0x4138   :  { %10082 = vpow2.f32 %v8042_v31 }
0x413f   :  { %v10077_v44 = vpop.eup %10076 }
0x4140   :  { %v10079_v48 = vpop.eup %10078  ;;  %5443 = vrot.lane.b32.xlu1 %v10077_v44, %s10386_s21 }
0x4141   :  { %5441 = vrot.lane.b32.xlu0 %v10079_v48, %s10386_s21  ;;  %v10081_v32 = vpop.eup %10080 }
0x4142   :  { %v10083_v61 = vpop.eup %10082  ;;  %v5430_v41 = vadd.f32 1.0, %v10081_v32 }
0x4143   :  { %v5429_v39 = vadd.f32 1.0, %v10083_v61 }
0x4144   :  { %10084 = vrcp.f32 %v5430_v41 }
0x4145   :  { %10086 = vrcp.f32 %v5429_v39 }
0x414e   :  { %v10085_v17 = vpop.eup %10084 }
0x414f   :  { %v10087_v49 = vpop.eup %10086  ;;  %v5438_v3 = vmul.f32 %v10085_v17, %v5240_v43  ;;  %v11329_v43 = vld [vmem:[#allocation3 + $0x8] sm:$0xff] }
0x4150   :  { %v5437_v44 = vmul.f32 %v10087_v49, %v5239_v7  ;;  %v11331_v7 = vld [vmem:[#allocation3] sm:$0xff] }
0x41b2   :  { %v5444_v23 = vpop.permute.xlu1 %5443 }
0x41b3   :  { %v5448_v28 = vmul.f32 %v10085_v17, %v5444_v23  ;;  %v5442_v35 = vpop.permute.xlu0 %5441 }
0x41b4   :  { %v5447_v14 = vmul.f32 %v10087_v49, %v5442_v35 }
0x41b5   :  { %5453 = vrot.lane.b32.xlu1 %v5448_v28, %s10386_s21 }
0x41b6   :  { %5451 = vrot.lane.b32.xlu0 %v5447_v14, %s10386_s21 }
0x4227   :  { %v5454_v16 = vpop.permute.xlu1 %5453 }
0x4228   :  { %v5458_v48 = vadd.f32 %v5454_v16, %v5438_v3  ;;  %v5452_v27 = vpop.permute.xlu0 %5451 }
0x4229   :  { %v5457_v31 = vadd.f32 %v5452_v27, %v5437_v44 }
0x422a   :  { %10088 = vtanh.f32 %v5458_v48 }
0x422b   :  { %10090 = vtanh.f32 %v5457_v31 }
0x4234   :  { %v10089_v32 = vpop.eup %10088 }
0x4235   :  { %v10091_v61 = vpop.eup %10090  ;;  %5465 = vrot.lane.b32.xlu1 %v10089_v32, %s10386_s21 }
0x4236   :  { %5463 = vrot.lane.b32.xlu0 %v10091_v61, %s10386_s21 }
0x42a7   :  { %v5466_v41 = vpop.permute.xlu1 %5465 }
0x42a8   :  { %v11321_v39 = vmul.f32 %v10085_v17, %v5466_v41  ;;  %v5464_v23 = vpop.permute.xlu0 %5463 }
0x42a9   :  { %v11323_v28 = vmul.f32 %v10087_v49, %v5464_v23 }
0x42aa   :  { %5499 = vrot.lane.b32.xlu1 %v11321_v39, %s10387_s22 }
0x42ab   :  { %5497 = vrot.lane.b32.xlu0 %v11323_v28, %s10387_s22 }
0x42ae   :  { %5584 = vrot.lane.b32.xlu1 %v11329_v43, %s10386_s21 }
0x42af   :  { %5582 = vrot.lane.b32.xlu0 %v11331_v7, %s10386_s21 }
0x431c   :  { %v5500_v35 = vpop.permute.xlu1 %5499 }
0x431d   :  { %v5498_v17 = vpop.permute.xlu0 %5497 }
0x431e   :  { %8954 = vmatprep.mubr.msk.f32.mxu0 %vm104_vm2, %v5498_v17 }
0x431f   :  { %8955 = vmatmul.mubr.msk.f32.vlgmr.msra.gmra.mrb[24].mxu0 %vm104_vm2, %v5500_v35 }
0x4320   :  { %8958 = vmatpush3.msk.msra.mxu0 %vm190_vm0, %v11090_v12  ;;  %v5585_v14 = vpop.permute.xlu1 %5584 }
0x4321   :  { %v5583_v49 = vpop.permute.xlu0 %5582  ;;  %9318 = vmatprep.subr.bf16.mxu0 %v10534_v4 }
0x4322   :  { %8959 = vmatprep.mubr.msk.f32.mxu0 %vm183_vm1, %v5583_v49 }
0x4327   :  { %8960 = vmatmul.mubr.msk.f32.vlgmr.msra.gmra.mrb[24].mxu0 %vm183_vm1, %v5585_v14 }
0x4328   :  { %9320 = vmatpush3.bf16.msra.mxu0 %v10534_v4 }
0x4329   :  { %9322 = vmatprep.subr.bf16.mxu0 %v10540_v8 }
0x432c   :  { %9324 = vmatpush3.bf16.msra.mxu0 %v10540_v8 }
0x432d   :  { %8989 = vmatprep.subr.msk.mxu0 %vm190_vm0, %v11090_v12 }
0x43fa   :  { %v8961_v3 = vpop.f32.mrb[24].mxu0 }
0x43fb   :  { %v5666_v16 = vadd.f32 %v11127_v30, %v8961_v3  ;;  %v5656_v44 = vpop.f32.mrb[25].mxu0 }
0x43fc   :  { %v5665_v27 = vadd.f32 %v11127_v30, %v5656_v44 }
0x43fd   :  { %10092 = vtanh.f32 %v5666_v16  ;;  %v8050_v41 = vmul.f32 -1.442695, %v5666_v16 }
0x43fe   :  { %10094 = vtanh.f32 %v5665_v27  ;;  %v8049_v23 = vmul.f32 -1.442695, %v5665_v27 }
0x43ff   :  { %10096 = vpow2.f32 %v8050_v41 }
0x4400   :  { %10098 = vpow2.f32 %v8049_v23 }
0x4407   :  { %v10093_v32 = vpop.eup %10092 }
0x4408   :  { %v10095_v61 = vpop.eup %10094  ;;  %5687 = vrot.lane.b32.xlu1 %v10093_v32, %s10386_s21 }
0x4409   :  { %5685 = vrot.lane.b32.xlu0 %v10095_v61, %s10386_s21  ;;  %v10097_v17 = vpop.eup %10096 }
0x440a   :  { %v10099_v12 = vpop.eup %10098  ;;  %v5674_v35 = vadd.f32 1.0, %v10097_v17 }
0x440b   :  { %v5673_v49 = vadd.f32 1.0, %v10099_v12 }
0x440c   :  { %10100 = vrcp.f32 %v5674_v35 }
0x440d   :  { %10102 = vrcp.f32 %v5673_v49 }
0x4416   :  { %v10101_v14 = vpop.eup %10100 }
0x4417   :  { %v10103_v44 = vpop.eup %10102  ;;  %v5682_v16 = vmul.f32 %v10101_v14, %v5458_v48 }
0x4418   :  { %v5681_v32 = vmul.f32 %v10103_v44, %v5457_v31  ;;  %v11369_v31 = vld [vmem:[#allocation6] sm:$0xf] }
0x447a   :  { %v5688_v3 = vpop.permute.xlu1 %5687 }
0x447b   :  { %v5692_v50 = vmul.f32 %v10101_v14, %v5688_v3  ;;  %v5686_v25 = vpop.permute.xlu0 %5685 }
0x447c   :  { %v5691_v13 = vmul.f32 %v10103_v44, %v5686_v25 }
0x447d   :  { %5697 = vrot.lane.b32.xlu1 %v5692_v50, %s10386_s21 }
0x447e   :  { %5695 = vrot.lane.b32.xlu0 %v5691_v13, %s10386_s21 }
0x44ef   :  { %v5698_v27 = vpop.permute.xlu1 %5697 }
0x44f0   :  { %v5702_v61 = vadd.f32 %v5698_v27, %v5682_v16  ;;  %v5696_v41 = vpop.permute.xlu0 %5695 }
0x44f1   :  { %v5701_v23 = vadd.f32 %v5696_v41, %v5681_v32 }
0x44f2   :  { %10104 = vtanh.f32 %v5702_v61 }
0x44f3   :  { %10106 = vtanh.f32 %v5701_v23 }
0x44fc   :  { %v10105_v17 = vpop.eup %10104 }
0x44fd   :  { %v10107_v12 = vpop.eup %10106  ;;  %5709 = vrot.lane.b32.xlu1 %v10105_v17, %s10386_s21 }
0x44fe   :  { %5707 = vrot.lane.b32.xlu0 %v10107_v12, %s10386_s21 }
0x456f   :  { %v5710_v35 = vpop.permute.xlu1 %5709 }
0x4570   :  { %v5714_v25 = vmul.f32 %v10101_v14, %v5710_v35  ;;  %v5708_v49 = vpop.permute.xlu0 %5707 }
0x4571   :  { %v5713_v50 = vmul.f32 %v10103_v44, %v5708_v49 }
0x4572   :  { %5719 = vrot.lane.b32.xlu1 %v5714_v25, %s10387_s22 }
0x4573   :  { %5717 = vrot.lane.b32.xlu0 %v5713_v50, %s10387_s22 }
0x4576   :  { %5802 = vrot.lane.b32.xlu1 %v11329_v43, %s10410_s26 }
0x4577   :  { %5800 = vrot.lane.b32.xlu0 %v11331_v7, %s10410_s26 }
0x45e4   :  { %v11363_v48 = vpop.permute.xlu1 %5719 }
0x45e5   :  { %v11361_v13 = vpop.permute.xlu0 %5717  ;;  %11814 = vst [vmem:[#allocation37_spill] sm:$0xff] %v11363_v48 }
0x45e6   :  { %11813 = vst [vmem:[#allocation36_spill] sm:$0xff] %v11361_v13  ;;  %8970 = vmatprep.mubr.msk.f32.mxu1 %vm104_vm2, %v11361_v13 }
0x45e7   :  { %8971 = vmatmul.mubr.msk.f32.vlgmr.msra.gmra.mrb[28].mxu1 %vm104_vm2, %v11363_v48 }
0x45e8   :  { %8974 = vmatpush3.msk.msra.mxu1 %vm190_vm0, %v11369_v31  ;;  %v5803_v3 = vpop.permute.xlu1 %5802 }
0x45e9   :  { %v5801_v14 = vpop.permute.xlu0 %5800  ;;  %9326 = vmatprep.subr.bf16.mxu1 %v10534_v4 }
0x45ea   :  { %8975 = vmatprep.mubr.msk.f32.mxu1 %vm183_vm1, %v5801_v14 }
0x45ef   :  { %8976 = vmatmul.mubr.msk.f32.vlgmr.msra.gmra.mrb[28].mxu1 %vm183_vm1, %v5803_v3 }
0x45f0   :  { %9328 = vmatpush3.bf16.msra.mxu1 %v10534_v4 }
0x45f1   :  { %9330 = vmatprep.subr.bf16.mxu1 %v10540_v8 }
0x45f4   :  { %9332 = vmatpush3.bf16.msra.mxu1 %v10540_v8 }
0x45f5   :  { %9005 = vmatprep.subr.msk.mxu1 %vm190_vm0, %v11369_v31 }
0x46c2   :  { %v8977_v44 = vpop.f32.mrb[28].mxu1 }
0x46c3   :  { %v5884_v16 = vadd.f32 %v11127_v30, %v8977_v44  ;;  %v5874_v27 = vpop.f32.mrb[29].mxu1 }
0x46c4   :  { %v5883_v32 = vadd.f32 %v11127_v30, %v5874_v27 }
0x46c5   :  { %10108 = vtanh.f32 %v5884_v16  ;;  %v8057_v12 = vmul.f32 -1.442695, %v5884_v16 }
0x46c6   :  { %10110 = vtanh.f32 %v5883_v32  ;;  %v8056_v35 = vmul.f32 -1.442695, %v5883_v32 }
0x46c7   :  { %10112 = vpow2.f32 %v8057_v12 }
0x46c8   :  { %10114 = vpow2.f32 %v8056_v35 }
0x46cf   :  { %v10109_v41 = vpop.eup %10108 }
0x46d0   :  { %v10111_v17 = vpop.eup %10110  ;;  %5905 = vrot.lane.b32.xlu1 %v10109_v41, %s10386_s21 }
0x46d1   :  { %5903 = vrot.lane.b32.xlu0 %v10111_v17, %s10386_s21  ;;  %v10113_v25 = vpop.eup %10112 }
0x46d2   :  { %v10115_v49 = vpop.eup %10114  ;;  %v5892_v50 = vadd.f32 1.0, %v10113_v25 }
0x46d3   :  { %v5891_v14 = vadd.f32 1.0, %v10115_v49 }
0x46d4   :  { %10116 = vrcp.f32 %v5892_v50 }
0x46d5   :  { %10118 = vrcp.f32 %v5891_v14 }
0x46de   :  { %v10117_v3 = vpop.eup %10116 }
0x46df   :  { %v10119_v44 = vpop.eup %10118  ;;  %v5900_v16 = vmul.f32 %v10117_v3, %v5702_v61 }
0x46e0   :  { %v5899_v41 = vmul.f32 %v10119_v44, %v5701_v23 }
0x4742   :  { %v5906_v30 = vpop.permute.xlu1 %5905 }
0x4743   :  { %v5910_v27 = vmul.f32 %v10117_v3, %v5906_v30  ;;  %v5904_v48 = vpop.permute.xlu0 %5903 }
0x4744   :  { %v5909_v13 = vmul.f32 %v10119_v44, %v5904_v48 }
0x4745   :  { %5915 = vrot.lane.b32.xlu1 %v5910_v27, %s10386_s21  ;;  %v11414_v27 = vld [vmem:[%s11761_s3] ss:$0 sm:$0xff]  ;;  %s10412_s3 = smov 20  }
0x4746   :  { %5913 = vrot.lane.b32.xlu0 %v5909_v13, %s10386_s21 }
0x47b7   :  { %v5916_v32 = vpop.permute.xlu1 %5915 }
0x47b8   :  { %v5920_v17 = vadd.f32 %v5916_v32, %v5900_v16  ;;  %v5914_v12 = vpop.permute.xlu0 %5913 }
0x47b9   :  { %v5919_v35 = vadd.f32 %v5914_v12, %v5899_v41 }
0x47ba   :  { %10120 = vtanh.f32 %v5920_v17 }
0x47bb   :  { %10122 = vtanh.f32 %v5919_v35 }
0x47c4   :  { %v10121_v25 = vpop.eup %10120 }
0x47c5   :  { %v10123_v49 = vpop.eup %10122  ;;  %5927 = vrot.lane.b32.xlu1 %v10121_v25, %s10386_s21 }
0x47c6   :  { %5925 = vrot.lane.b32.xlu0 %v10123_v49, %s10386_s21 }
0x4837   :  { %v5928_v50 = vpop.permute.xlu1 %5927 }
0x4838   :  { %v11389_v48 = vmul.f32 %v10117_v3, %v5928_v50  ;;  %v5926_v14 = vpop.permute.xlu0 %5925 }
0x4839   :  { %v11391_v30 = vmul.f32 %v10119_v44, %v5926_v14 }
0x483a   :  { %5937 = vrot.lane.b32.xlu1 %v11389_v48, %s10387_s22 }
0x483b   :  { %5935 = vrot.lane.b32.xlu0 %v11391_v30, %s10387_s22 }
0x483e   :  { %6020 = vrot.lane.b32.xlu1 %v11329_v43, %s10411_s27 }
0x483f   :  { %6018 = vrot.lane.b32.xlu0 %v11331_v7, %s10411_s27 }
0x48ac   :  { %v5938_v23 = vpop.permute.xlu1 %5937 }
0x48ad   :  { %v5936_v61 = vpop.permute.xlu0 %5935 }
0x48ae   :  { %8986 = vmatprep.mubr.msk.f32.mxu0 %vm104_vm2, %v5936_v61 }
0x48af   :  { %8987 = vmatmul.mubr.msk.f32.vlgmr.msra.gmra.mrb[26].mxu0 %vm104_vm2, %v5938_v23 }
0x48b0   :  { %8990 = vmatpush3.msk.msra.mxu0 %vm190_vm0, %v11369_v31  ;;  %v6021_v3 = vpop.permute.xlu1 %6020 }
0x48b1   :  { %v6019_v13 = vpop.permute.xlu0 %6018  ;;  %9334 = vmatprep.subr.bf16.mxu0 %v10534_v4 }
0x48b2   :  { %8991 = vmatprep.mubr.msk.f32.mxu0 %vm183_vm1, %v6019_v13 }
0x48b7   :  { %8992 = vmatmul.mubr.msk.f32.vlgmr.msra.gmra.mrb[26].mxu0 %vm183_vm1, %v6021_v3 }
0x48b8   :  { %9336 = vmatpush3.bf16.msra.mxu0 %v10534_v4 }
0x48b9   :  { %9338 = vmatprep.subr.bf16.mxu0 %v10540_v8 }
0x48bc   :  { %9340 = vmatpush3.bf16.msra.mxu0 %v10540_v8 }
0x48bd   :  { %9021 = vmatprep.subr.msk.mxu0 %vm190_vm0, %v11369_v31 }
0x498a   :  { %v8993_v44 = vpop.f32.mrb[26].mxu0 }
0x498b   :  { %v6102_v16 = vadd.f32 %v11414_v27, %v8993_v44  ;;  %v6092_v32 = vpop.f32.mrb[27].mxu0 }
0x498c   :  { %v6101_v41 = vadd.f32 %v11414_v27, %v6092_v32 }
0x498d   :  { %10124 = vtanh.f32 %v6102_v16  ;;  %v8064_v49 = vmul.f32 -1.442695, %v6102_v16 }
0x498e   :  { %10126 = vtanh.f32 %v6101_v41  ;;  %v8063_v50 = vmul.f32 -1.442695, %v6101_v41 }
0x498f   :  { %10128 = vpow2.f32 %v8064_v49 }
0x4990   :  { %10130 = vpow2.f32 %v8063_v50 }
0x4997   :  { %v10125_v12 = vpop.eup %10124 }
0x4998   :  { %v10127_v25 = vpop.eup %10126  ;;  %6123 = vrot.lane.b32.xlu1 %v10125_v12, %s10386_s21 }
0x4999   :  { %6121 = vrot.lane.b32.xlu0 %v10127_v25, %s10386_s21  ;;  %v10129_v14 = vpop.eup %10128 }
0x499a   :  { %v10131_v61 = vpop.eup %10130  ;;  %v6110_v23 = vadd.f32 1.0, %v10129_v14 }
0x499b   :  { %v6109_v13 = vadd.f32 1.0, %v10131_v61 }
0x499c   :  { %10132 = vrcp.f32 %v6110_v23 }
0x499d   :  { %10134 = vrcp.f32 %v6109_v13 }
0x49a6   :  { %v10133_v3 = vpop.eup %10132 }
0x49a7   :  { %v10135_v32 = vpop.eup %10134  ;;  %v6118_v16 = vmul.f32 %v10133_v3, %v5920_v17 }
0x49a8   :  { %v6117_v12 = vmul.f32 %v10135_v32, %v5919_v35 }
0x4a0a   :  { %v6124_v44 = vpop.permute.xlu1 %6123 }
0x4a0b   :  { %v6128_v5 = vmul.f32 %v10133_v3, %v6124_v44  ;;  %v6122_v51 = vpop.permute.xlu0 %6121 }
0x4a0c   :  { %v6127_v57 = vmul.f32 %v10135_v32, %v6122_v51 }
0x4a0d   :  { %6133 = vrot.lane.b32.xlu1 %v6128_v5, %s10386_s21 }
0x4a0e   :  { %6131 = vrot.lane.b32.xlu0 %v6127_v57, %s10386_s21 }
0x4a7f   :  { %v6134_v41 = vpop.permute.xlu1 %6133 }
0x4a80   :  { %v6138_v25 = vadd.f32 %v6134_v41, %v6118_v16  ;;  %v6132_v49 = vpop.permute.xlu0 %6131 }
0x4a81   :  { %v6137_v50 = vadd.f32 %v6132_v49, %v6117_v12 }
0x4a82   :  { %10136 = vtanh.f32 %v6138_v25 }
0x4a83   :  { %10138 = vtanh.f32 %v6137_v50 }
0x4a8c   :  { %v10137_v14 = vpop.eup %10136 }
0x4a8d   :  { %v10139_v61 = vpop.eup %10138  ;;  %6145 = vrot.lane.b32.xlu1 %v10137_v14, %s10386_s21 }
0x4a8e   :  { %6143 = vrot.lane.b32.xlu0 %v10139_v61, %s10386_s21 }
0x4aff   :  { %v6146_v23 = vpop.permute.xlu1 %6145 }
0x4b00   :  { %v11424_v51 = vmul.f32 %v10133_v3, %v6146_v23  ;;  %v6144_v5 = vpop.permute.xlu0 %6143 }
0x4b01   :  { %v11426_v13 = vmul.f32 %v10135_v32, %v6144_v5 }
0x4b02   :  { %11815 = vst [vmem:[#allocation38_spill] sm:$0xff] %v11424_v51  ;;  %6155 = vrot.lane.b32.xlu1 %v11424_v51, %s10387_s22 }
0x4b03   :  { %11816 = vst [vmem:[#allocation39_spill] sm:$0xff] %v11426_v13  ;;  %6153 = vrot.lane.b32.xlu0 %v11426_v13, %s10387_s22 }
0x4b06   :  { %6238 = vrot.lane.b32.xlu1 %v11329_v43, %s10412_s3 }
0x4b07   :  { %6236 = vrot.lane.b32.xlu0 %v11331_v7, %s10412_s3 }
0x4b74   :  { %v6156_v17 = vpop.permute.xlu1 %6155 }
0x4b75   :  { %v6154_v57 = vpop.permute.xlu0 %6153 }
0x4b76   :  { %9002 = vmatprep.mubr.msk.f32.mxu1 %vm104_vm2, %v6154_v57 }
0x4b77   :  { %9003 = vmatmul.mubr.msk.f32.vlgmr.msra.gmra.mrb[30].mxu1 %vm104_vm2, %v6156_v17 }
0x4b78   :  { %9006 = vmatpush3.msk.msra.mxu1 %vm190_vm0, %v11369_v31  ;;  %v6239_v3 = vpop.permute.xlu1 %6238 }
0x4b79   :  { %v6237_v35 = vpop.permute.xlu0 %6236  ;;  %9342 = vmatprep.subr.bf16.mxu1 %v10534_v4 }
0x4b7a   :  { %9007 = vmatprep.mubr.msk.f32.mxu1 %vm183_vm1, %v6237_v35 }
0x4b7f   :  { %9008 = vmatmul.mubr.msk.f32.vlgmr.msra.gmra.mrb[30].mxu1 %vm183_vm1, %v6239_v3 }
0x4b80   :  { %9344 = vmatpush3.bf16.msra.mxu1 %v10534_v4 }
0x4b81   :  { %9346 = vmatprep.subr.bf16.mxu1 %v10540_v8 }
0x4b84   :  { %9348 = vmatpush3.bf16.msra.mxu1 %v10540_v8 }
0x4b85   :  { %9037 = vmatprep.subr.msk.mxu1 %vm190_vm0, %v11369_v31 }
0x4c52   :  { %v9009_v44 = vpop.f32.mrb[30].mxu1 }
0x4c53   :  { %v6320_v32 = vadd.f32 %v11414_v27, %v9009_v44  ;;  %v6310_v16 = vpop.f32.mrb[31].mxu1 }
0x4c54   :  { %v6319_v41 = vadd.f32 %v11414_v27, %v6310_v16 }
0x4c55   :  { %10140 = vtanh.f32 %v6320_v32  ;;  %v8071_v14 = vmul.f32 -1.442695, %v6320_v32 }
0x4c56   :  { %10142 = vtanh.f32 %v6319_v41  ;;  %v8070_v61 = vmul.f32 -1.442695, %v6319_v41 }
0x4c57   :  { %10144 = vpow2.f32 %v8071_v14 }
0x4c58   :  { %10146 = vpow2.f32 %v8070_v61 }
0x4c5f   :  { %v10141_v12 = vpop.eup %10140 }
0x4c60   :  { %v10143_v49 = vpop.eup %10142  ;;  %6341 = vrot.lane.b32.xlu1 %v10141_v12, %s10386_s21 }
0x4c61   :  { %6339 = vrot.lane.b32.xlu0 %v10143_v49, %s10386_s21  ;;  %v10145_v23 = vpop.eup %10144 }
0x4c62   :  { %v10147_v5 = vpop.eup %10146  ;;  %v6328_v57 = vadd.f32 1.0, %v10145_v23 }
0x4c63   :  { %v6327_v17 = vadd.f32 1.0, %v10147_v5 }
0x4c64   :  { %10148 = vrcp.f32 %v6328_v57 }
0x4c65   :  { %10150 = vrcp.f32 %v6327_v17 }
0x4c6e   :  { %v10149_v35 = vpop.eup %10148 }
0x4c6f   :  { %v10151_v44 = vpop.eup %10150  ;;  %v6336_v32 = vmul.f32 %v10149_v35, %v6138_v25 }
0x4c70   :  { %v6335_v12 = vmul.f32 %v10151_v44, %v6137_v50 }
0x4cd2   :  { %v6342_v3 = vpop.permute.xlu1 %6341 }
0x4cd3   :  { %v6346_v16 = vmul.f32 %v10149_v35, %v6342_v3  ;;  %v6340_v51 = vpop.permute.xlu0 %6339 }
0x4cd4   :  { %v6345_v13 = vmul.f32 %v10151_v44, %v6340_v51 }
0x4cd5   :  { %6351 = vrot.lane.b32.xlu1 %v6346_v16, %s10386_s21 }
0x4cd6   :  { %6349 = vrot.lane.b32.xlu0 %v6345_v13, %s10386_s21 }
0x4d47   :  { %v6352_v41 = vpop.permute.xlu1 %6351 }
0x4d48   :  { %v6356_v49 = vadd.f32 %v6352_v41, %v6336_v32  ;;  %v6350_v14 = vpop.permute.xlu0 %6349 }
0x4d49   :  { %v6355_v61 = vadd.f32 %v6350_v14, %v6335_v12 }
0x4d4a   :  { %10152 = vtanh.f32 %v6356_v49 }
0x4d4b   :  { %10154 = vtanh.f32 %v6355_v61 }
0x4d54   :  { %v10153_v23 = vpop.eup %10152 }
0x4d55   :  { %v10155_v5 = vpop.eup %10154  ;;  %6363 = vrot.lane.b32.xlu1 %v10153_v23, %s10386_s21 }
0x4d56   :  { %6361 = vrot.lane.b32.xlu0 %v10155_v5, %s10386_s21 }
0x4dc7   :  { %v6364_v57 = vpop.permute.xlu1 %6363 }
0x4dc8   :  { %v11454_v51 = vmul.f32 %v10149_v35, %v6364_v57  ;;  %v6362_v17 = vpop.permute.xlu0 %6361 }
0x4dc9   :  { %v11456_v3 = vmul.f32 %v10151_v44, %v6362_v17 }
0x4dca   :  { %6397 = vrot.lane.b32.xlu1 %v11454_v51, %s10387_s22 }
0x4dcb   :  { %6395 = vrot.lane.b32.xlu0 %v11456_v3, %s10387_s22 }
0x4dce   :  { %6482 = vrot.lane.b32.xlu1 %v11329_v43, %s10413_s0 }
0x4dcf   :  { %6480 = vrot.lane.b32.xlu0 %v11331_v7, %s10413_s0 }
0x4e3c   :  { %v6398_v50 = vpop.permute.xlu1 %6397 }
0x4e3d   :  { %v6396_v25 = vpop.permute.xlu0 %6395 }
0x4e3e   :  { %9018 = vmatprep.mubr.msk.f32.mxu0 %vm104_vm2, %v6396_v25 }
0x4e3f   :  { %9019 = vmatmul.mubr.msk.f32.vlgmr.msra.gmra.mrb[28].mxu0 %vm104_vm2, %v6398_v50 }
0x4e40   :  { %9022 = vmatpush3.msk.msra.mxu0 %vm190_vm0, %v11369_v31  ;;  %v6483_v35 = vpop.permute.xlu1 %6482 }
0x4e41   :  { %v6481_v13 = vpop.permute.xlu0 %6480  ;;  %9350 = vmatprep.subr.bf16.mxu0 %v10534_v4 }
0x4e42   :  { %9023 = vmatprep.mubr.msk.f32.mxu0 %vm183_vm1, %v6481_v13 }
0x4e47   :  { %9024 = vmatmul.mubr.msk.f32.vlgmr.msra.gmra.mrb[28].mxu0 %vm183_vm1, %v6483_v35 }
0x4e48   :  { %9352 = vmatpush3.bf16.msra.mxu0 %v10534_v4 }
0x4e49   :  { %9354 = vmatprep.subr.bf16.mxu0 %v10540_v8 }
0x4e4c   :  { %9356 = vmatpush3.bf16.msra.mxu0 %v10540_v8 }
0x4e4d   :  { %9053 = vmatprep.subr.msk.mxu0 %vm190_vm0, %v11369_v31 }
0x4f1a   :  { %v9025_v44 = vpop.f32.mrb[28].mxu0 }
0x4f1b   :  { %v6564_v16 = vadd.f32 %v11414_v27, %v9025_v44  ;;  %v6554_v32 = vpop.f32.mrb[29].mxu0 }
0x4f1c   :  { %v6563_v41 = vadd.f32 %v11414_v27, %v6554_v32 }
0x4f1d   :  { %10156 = vtanh.f32 %v6564_v16  ;;  %v8078_v23 = vmul.f32 -1.442695, %v6564_v16 }
0x4f1e   :  { %10158 = vtanh.f32 %v6563_v41  ;;  %v8077_v5 = vmul.f32 -1.442695, %v6563_v41 }
0x4f1f   :  { %10160 = vpow2.f32 %v8078_v23 }
0x4f20   :  { %10162 = vpow2.f32 %v8077_v5 }
0x4f27   :  { %v10157_v12 = vpop.eup %10156 }
0x4f28   :  { %v10159_v14 = vpop.eup %10158  ;;  %6585 = vrot.lane.b32.xlu1 %v10157_v12, %s10386_s21 }
0x4f29   :  { %6583 = vrot.lane.b32.xlu0 %v10159_v14, %s10386_s21  ;;  %v10161_v57 = vpop.eup %10160 }
0x4f2a   :  { %v10163_v17 = vpop.eup %10162  ;;  %v6572_v25 = vadd.f32 1.0, %v10161_v57 }
0x4f2b   :  { %v6571_v50 = vadd.f32 1.0, %v10163_v17 }
0x4f2c   :  { %10164 = vrcp.f32 %v6572_v25 }
0x4f2d   :  { %10166 = vrcp.f32 %v6571_v50 }
0x4f36   :  { %v10165_v13 = vpop.eup %10164 }
0x4f37   :  { %v10167_v44 = vpop.eup %10166  ;;  %v6580_v16 = vmul.f32 %v10165_v13, %v6356_v49 }
0x4f38   :  { %v6579_v12 = vmul.f32 %v10167_v44, %v6355_v61 }
0x4f9a   :  { %v6586_v35 = vpop.permute.xlu1 %6585 }
0x4f9b   :  { %v6590_v32 = vmul.f32 %v10165_v13, %v6586_v35  ;;  %v6584_v11 = vpop.permute.xlu0 %6583 }
0x4f9c   :  { %v6589_v37 = vmul.f32 %v10167_v44, %v6584_v11 }
0x4f9d   :  { %6595 = vrot.lane.b32.xlu1 %v6590_v32, %s10386_s21 }
0x4f9e   :  { %6593 = vrot.lane.b32.xlu0 %v6589_v37, %s10386_s21 }
0x500f   :  { %v6596_v41 = vpop.permute.xlu1 %6595 }
0x5010   :  { %v6600_v14 = vadd.f32 %v6596_v41, %v6580_v16  ;;  %v6594_v23 = vpop.permute.xlu0 %6593 }
0x5011   :  { %v6599_v5 = vadd.f32 %v6594_v23, %v6579_v12 }
0x5012   :  { %10168 = vtanh.f32 %v6600_v14 }
0x5013   :  { %10170 = vtanh.f32 %v6599_v5 }
0x501c   :  { %v10169_v57 = vpop.eup %10168 }
0x501d   :  { %v10171_v17 = vpop.eup %10170  ;;  %6607 = vrot.lane.b32.xlu1 %v10169_v57, %s10386_s21 }
0x501e   :  { %6605 = vrot.lane.b32.xlu0 %v10171_v17, %s10386_s21 }
0x508f   :  { %v6608_v25 = vpop.permute.xlu1 %6607 }
0x5090   :  { %v6612_v11 = vmul.f32 %v10165_v13, %v6608_v25  ;;  %v6606_v50 = vpop.permute.xlu0 %6605 }
0x5091   :  { %v6611_v35 = vmul.f32 %v10167_v44, %v6606_v50 }
0x5092   :  { %6617 = vrot.lane.b32.xlu1 %v6612_v11, %s10387_s22 }
0x5093   :  { %6615 = vrot.lane.b32.xlu0 %v6611_v35, %s10387_s22 }
0x5096   :  { %6700 = vrot.lane.b32.xlu1 %v11329_v43, %s10414_s20 }
0x5097   :  { %6698 = vrot.lane.b32.xlu0 %v11331_v7, %s10414_s20 }
0x5104   :  { %v11490_v49 = vpop.permute.xlu1 %6617 }
0x5105   :  { %v11488_v37 = vpop.permute.xlu0 %6615  ;;  %11818 = vst [vmem:[#allocation41_spill] sm:$0xff] %v11490_v49 }
0x5106   :  { %11817 = vst [vmem:[#allocation40_spill] sm:$0xff] %v11488_v37  ;;  %9034 = vmatprep.mubr.msk.f32.mxu1 %vm104_vm2, %v11488_v37 }
0x5107   :  { %9035 = vmatmul.mubr.msk.f32.vlgmr.msra.gmra.mrb[32].mxu1 %vm104_vm2, %v11490_v49 }
0x5108   :  { %9038 = vmatpush3.msk.msra.mxu1 %vm190_vm0, %v11369_v31  ;;  %v6701_v13 = vpop.permute.xlu1 %6700 }
0x5109   :  { %v6699_v61 = vpop.permute.xlu0 %6698  ;;  %9358 = vmatprep.subr.bf16.mxu1 %v10534_v4 }
0x510a   :  { %9039 = vmatprep.mubr.msk.f32.mxu1 %vm183_vm1, %v6699_v61 }
0x510f   :  { %9040 = vmatmul.mubr.msk.f32.vlgmr.msra.gmra.mrb[32].mxu1 %vm183_vm1, %v6701_v13 }
0x5110   :  { %9360 = vmatpush3.bf16.msra.mxu1 %v10534_v4 }
0x5111   :  { %9362 = vmatprep.subr.bf16.mxu1 %v10540_v8 }
0x5114   :  { %9364 = vmatpush3.bf16.msra.mxu1 %v10540_v8 }
0x5115   :  { %9069 = vmatprep.subr.msk.mxu1 %vm190_vm0, %v11369_v31 }
0x51e2   :  { %v9041_v44 = vpop.f32.mrb[32].mxu1 }
0x51e3   :  { %v6782_v32 = vadd.f32 %v11414_v27, %v9041_v44  ;;  %v6772_v16 = vpop.f32.mrb[33].mxu1 }
0x51e4   :  { %v6781_v41 = vadd.f32 %v11414_v27, %v6772_v16 }
0x51e5   :  { %10172 = vtanh.f32 %v6782_v32  ;;  %v8085_v4 = vmul.f32 -1.442695, %v6782_v32 }
0x51e6   :  { %10174 = vtanh.f32 %v6781_v41  ;;  %v8084_v57 = vmul.f32 -1.442695, %v6781_v41 }
0x51e7   :  { %10176 = vpow2.f32 %v8085_v4 }
0x51e8   :  { %10178 = vpow2.f32 %v8084_v57 }
0x51ef   :  { %v10173_v12 = vpop.eup %10172 }
0x51f0   :  { %v10175_v23 = vpop.eup %10174  ;;  %6803 = vrot.lane.b32.xlu1 %v10173_v12, %s10386_s21 }
0x51f1   :  { %6801 = vrot.lane.b32.xlu0 %v10175_v23, %s10386_s21  ;;  %v10177_v8 = vpop.eup %10176 }
0x51f2   :  { %v10179_v17 = vpop.eup %10178  ;;  %v6790_v25 = vadd.f32 1.0, %v10177_v8 }
0x51f3   :  { %v6789_v11 = vadd.f32 1.0, %v10179_v17 }
0x51f4   :  { %10180 = vrcp.f32 %v6790_v25 }
0x51f5   :  { %10182 = vrcp.f32 %v6789_v11 }
0x51fe   :  { %v10181_v50 = vpop.eup %10180 }
0x51ff   :  { %v10183_v61 = vpop.eup %10182  ;;  %v6798_v32 = vmul.f32 %v10181_v50, %v6600_v14 }
0x5200   :  { %v6797_v12 = vmul.f32 %v10183_v61, %v6599_v5 }
0x5262   :  { %v6804_v35 = vpop.permute.xlu1 %6803 }
0x5263   :  { %v6808_v13 = vmul.f32 %v10181_v50, %v6804_v35  ;;  %v6802_v44 = vpop.permute.xlu0 %6801 }
0x5264   :  { %v6807_v16 = vmul.f32 %v10183_v61, %v6802_v44 }
0x5265   :  { %6813 = vrot.lane.b32.xlu1 %v6808_v13, %s10386_s21 }
0x5266   :  { %6811 = vrot.lane.b32.xlu0 %v6807_v16, %s10386_s21 }
0x52d7   :  { %v6814_v41 = vpop.permute.xlu1 %6813 }
0x52d8   :  { %v6818_v23 = vadd.f32 %v6814_v41, %v6798_v32  ;;  %v6812_v4 = vpop.permute.xlu0 %6811 }
0x52d9   :  { %v6817_v57 = vadd.f32 %v6812_v4, %v6797_v12 }
0x52da   :  { %10184 = vtanh.f32 %v6818_v23 }
0x52db   :  { %10186 = vtanh.f32 %v6817_v57 }
0x52e4   :  { %v10185_v8 = vpop.eup %10184 }
0x52e5   :  { %v10187_v17 = vpop.eup %10186  ;;  %6825 = vrot.lane.b32.xlu1 %v10185_v8, %s10386_s21 }
0x52e6   :  { %6823 = vrot.lane.b32.xlu0 %v10187_v17, %s10386_s21 }
0x5357   :  { %v6826_v25 = vpop.permute.xlu1 %6825 }
0x5358   :  { %v11514_v11 = vmul.f32 %v10181_v50, %v6826_v25  ;;  %v6824_v35 = vpop.permute.xlu0 %6823 }
0x5359   :  { %v11516_v13 = vmul.f32 %v10183_v61, %v6824_v35 }
0x535a   :  { %6835 = vrot.lane.b32.xlu1 %v11514_v11, %s10387_s22 }
0x535b   :  { %6833 = vrot.lane.b32.xlu0 %v11516_v13, %s10387_s22 }
0x535e   :  { %6918 = vrot.lane.b32.xlu1 %v11329_v43, %s10382_s29 }
0x535f   :  { %6916 = vrot.lane.b32.xlu0 %v11331_v7, %s10382_s29 }
0x53cc   :  { %v6836_v5 = vpop.permute.xlu1 %6835 }
0x53cd   :  { %v6834_v14 = vpop.permute.xlu0 %6833 }
0x53ce   :  { %9050 = vmatprep.mubr.msk.f32.mxu0 %vm104_vm2, %v6834_v14 }
0x53cf   :  { %9051 = vmatmul.mubr.msk.f32.vlgmr.msra.gmra.mrb[30].mxu0 %vm104_vm2, %v6836_v5 }
0x53d0   :  { %9054 = vmatpush3.msk.msra.mxu0 %vm190_vm0, %v11369_v31  ;;  %v6919_v61 = vpop.permute.xlu1 %6918 }
0x53d1   :  { %v6917_v50 = vpop.permute.xlu0 %6916 }
0x53d2   :  { %9055 = vmatprep.mubr.msk.f32.mxu0 %vm183_vm1, %v6917_v50 }
0x53d7   :  { %9056 = vmatmul.mubr.msk.f32.vlgmr.msra.gmra.mrb[30].mxu0 %vm183_vm1, %v6919_v61 }
0x54aa   :  { %v9057_v44 = vpop.f32.mrb[30].mxu0 }
0x54ab   :  { %v7000_v16 = vadd.f32 %v11414_v27, %v9057_v44  ;;  %v6990_v32 = vpop.f32.mrb[31].mxu0 }
0x54ac   :  { %v6999_v41 = vadd.f32 %v11414_v27, %v6990_v32 }
0x54ad   :  { %10188 = vtanh.f32 %v7000_v16  ;;  %v8092_v8 = vmul.f32 -1.442695, %v7000_v16 }
0x54ae   :  { %10190 = vtanh.f32 %v6999_v41  ;;  %v8091_v17 = vmul.f32 -1.442695, %v6999_v41 }
0x54af   :  { %10192 = vpow2.f32 %v8092_v8 }
0x54b0   :  { %10194 = vpow2.f32 %v8091_v17 }
0x54b7   :  { %v10189_v12 = vpop.eup %10188 }
0x54b8   :  { %v10191_v4 = vpop.eup %10190  ;;  %7021 = vrot.lane.b32.xlu1 %v10189_v12, %s10386_s21 }
0x54b9   :  { %7019 = vrot.lane.b32.xlu0 %v10191_v4, %s10386_s21  ;;  %v10193_v25 = vpop.eup %10192 }
0x54ba   :  { %v10195_v35 = vpop.eup %10194  ;;  %v7008_v14 = vadd.f32 1.0, %v10193_v25 }
0x54bb   :  { %v7007_v5 = vadd.f32 1.0, %v10195_v35 }
0x54bc   :  { %10196 = vrcp.f32 %v7008_v14 }
0x54bd   :  { %10198 = vrcp.f32 %v7007_v5 }
0x54c6   :  { %v10197_v50 = vpop.eup %10196 }
0x54c7   :  { %v10199_v44 = vpop.eup %10198  ;;  %v7016_v16 = vmul.f32 %v10197_v50, %v6818_v23 }
0x54c8   :  { %v7015_v12 = vmul.f32 %v10199_v44, %v6817_v57 }
0x552a   :  { %v7022_v61 = vpop.permute.xlu1 %7021 }
0x552b   :  { %v7026_v32 = vmul.f32 %v10197_v50, %v7022_v61  ;;  %v7020_v49 = vpop.permute.xlu0 %7019 }
0x552c   :  { %v7025_v37 = vmul.f32 %v10199_v44, %v7020_v49 }
0x552d   :  { %7031 = vrot.lane.b32.xlu1 %v7026_v32, %s10386_s21 }
0x552e   :  { %7029 = vrot.lane.b32.xlu0 %v7025_v37, %s10386_s21 }
0x559f   :  { %v7032_v41 = vpop.permute.xlu1 %7031 }
0x55a0   :  { %v11538_v4 = vadd.f32 %v7032_v41, %v7016_v16  ;;  %v7030_v8 = vpop.permute.xlu0 %7029 }
0x55a1   :  { %v11540_v17 = vadd.f32 %v7030_v8, %v7015_v12 }
0x55a2   :  { %10200 = vtanh.f32 %v11538_v4 }
0x55a3   :  { %10202 = vtanh.f32 %v11540_v17 }
0x55ac   :  { %v10201_v25 = vpop.eup %10200 }
0x55ad   :  { %v10203_v35 = vpop.eup %10202  ;;  %7043 = vrot.lane.b32.xlu1 %v10201_v25, %s10386_s21 }
0x55ae   :  { %7041 = vrot.lane.b32.xlu0 %v10203_v35, %s10386_s21 }
0x561f   :  { %v7044_v49 = vpop.permute.xlu1 %7043 }
0x5620   :  { %v11546_v37 = vmul.f32 %v10197_v50, %v7044_v49  ;;  %v7042_v23 = vpop.permute.xlu0 %7041 }
0x5621   :  { %v11548_v57 = vmul.f32 %v10199_v44, %v7042_v23 }
0x5622   :  { %11819 = vst [vmem:[#allocation42_spill] sm:$0xff] %v11546_v37  ;;  %7053 = vrot.lane.b32.xlu1 %v11546_v37, %s10387_s22  ;;  %v7341_v37 = vld [vmem:[#allocation9 + $0x100] sm:$0xff] }
0x5623   :  { %11820 = vst [vmem:[#allocation43_spill] sm:$0xff] %v11548_v57  ;;  %7051 = vrot.lane.b32.xlu0 %v11548_v57, %s10387_s22 }
0x5626   :  { %7136 = vrot.lane.b32.xlu1 %v11329_v43, %s10415_s10 }
0x5627   :  { %7134 = vrot.lane.b32.xlu0 %v11331_v7, %s10415_s10 }
0x5694   :  { %v7054_v5 = vpop.permute.xlu1 %7053 }
0x5695   :  { %v7052_v14 = vpop.permute.xlu0 %7051 }
0x5696   :  { %9066 = vmatprep.mubr.msk.f32.mxu1 %vm104_vm2, %v7052_v14 }
0x5697   :  { %9067 = vmatmul.mubr.msk.f32.vlgmr.msra.gmra.mrb[34].mxu1 %vm104_vm2, %v7054_v5 }
0x5698   :  { %9070 = vmatpush3.msk.msra.mxu1 %vm190_vm0, %v11369_v31  ;;  %v7137_v61 = vpop.permute.xlu1 %7136 }
0x5699   :  { %v7135_v50 = vpop.permute.xlu0 %7134 }
0x569a   :  { %9071 = vmatprep.mubr.msk.f32.mxu1 %vm183_vm1, %v7135_v50 }
0x569f   :  { %9072 = vmatmul.mubr.msk.f32.vlgmr.msra.gmra.mrb[34].mxu1 %vm183_vm1, %v7137_v61 }
0x5772   :  { %v9073_v44 = vpop.f32.mrb[34].mxu1 }
0x5773   :  { %v7218_v43 = vadd.f32 %v11414_v27, %v9073_v44  ;;  %v7208_v32 = vpop.f32.mrb[35].mxu1  ;;  %v7325_v44 = vld [vmem:[#allocation9 + $0x80] sm:$0xff] }
0x5774   :  { %v7217_v7 = vadd.f32 %v11414_v27, %v7208_v32  ;;  %v7309_v32 = vld [vmem:[#allocation9] sm:$0xff] }
0x5775   :  { %10204 = vtanh.f32 %v7218_v43  ;;  %v8099_v31 = vmul.f32 -1.442695, %v7218_v43  ;;  %v7326_v43 = vld [vmem:[#allocation9 + $0x88] sm:$0xff] }
0x5776   :  { %10206 = vtanh.f32 %v7217_v7  ;;  %v8098_v12 = vmul.f32 -1.442695, %v7217_v7  ;;  %v9365_v7 = vpack.c.bf16 %v7326_v43, %v7325_v44  ;;  %v9373_v44 = vpack.c.bf16 %v7330_v40, %v7329_v58  ;;  %v7314_v43 = vld [vmem:[#allocation9 + $0x28] sm:$0xff]  ;;  %v7315_v58 = vld [vmem:[#allocation9 + $0x30] sm:$0xff]  ;;  %v7316_v40 = vld [vmem:[#allocation9 + $0x38] sm:$0xff] }
0x5777   :  { %10208 = vpow2.f32 %v8099_v31  ;;  %v7328_v31 = vld [vmem:[#allocation9 + $0x98] sm:$0xff] }
0x5778   :  { %10210 = vpow2.f32 %v8098_v12  ;;  %9366 = vmatprep.subr.bf16.mxu0 %v9365_v7  ;;  %v7331_v7 = vld [vmem:[#allocation9 + $0xb0] sm:$0xff] }
0x577f   :  { %v10205_v16 = vpop.eup %10204 }
0x5780   :  { %v10207_v41 = vpop.eup %10206  ;;  %7239 = vrot.lane.b32.xlu1 %v10205_v16, %s10386_s21  ;;  %v7310_v16 = vld [vmem:[#allocation9 + $0x8] sm:$0xff] }
0x5781   :  { %7237 = vrot.lane.b32.xlu0 %v10207_v41, %s10386_s21  ;;  %v10209_v8 = vpop.eup %10208  ;;  %v7327_v41 = vld [vmem:[#allocation9 + $0x90] sm:$0xff]  ;;  %v9367_v12 = vpack.c.bf16 %v7310_v16, %v7309_v32  ;;  %v7360_v32 = vld [vmem:[#allocation9 + $0x198] sm:$0xff] }
0x5782   :  { %v10211_v25 = vpop.eup %10210  ;;  %v7226_v35 = vadd.f32 1.0, %v10209_v8  ;;  %v9369_v8 = vpack.c.bf16 %v7328_v31, %v7327_v41  ;;  %v9401_v16 = vpack.c.bf16 %v7360_v32, %v7359_v22  ;;  %v7343_v41 = vld [vmem:[#allocation9 + $0x110] sm:$0xff]  ;;  %v7344_v31 = vld [vmem:[#allocation9 + $0x118] sm:$0xff]  ;;  %v7334_v22 = vld [vmem:[#allocation9 + $0xc8] sm:$0xff] }
0x5783   :  { %v7225_v49 = vadd.f32 1.0, %v10211_v25  ;;  %v7311_v25 = vld [vmem:[#allocation9 + $0x10] sm:$0xff]  ;;  %9368 = vmatpush3.bf16.msra.mxu0 %v9367_v12  ;;  %v9403_v54 = vpack.c.bf16 %v7344_v31, %v7343_v41  ;;  %v9375_v12 = vpack.c.bf16 %v7314_v43, %v7313_v46  ;;  %v9379_v41 = vpack.c.bf16 %v7316_v40, %v7315_v58  ;;  %v7317_v46 = vld [vmem:[#allocation9 + $0x40] sm:$0xff]  ;;  %v7320_v40 = vld [vmem:[#allocation9 + $0x58] sm:$0xff] }
0x5784   :  { %10212 = vrcp.f32 %v7226_v35  ;;  %v7312_v35 = vld [vmem:[#allocation9 + $0x18] sm:$0xff]  ;;  %9370 = vmatprep.subr.bf16.mxu0 %v9369_v8  ;;  %v9377_v8 = vpack.c.bf16 %v7332_v26, %v7331_v7  ;;  %v7347_v43 = vld [vmem:[#allocation9 + $0x130] sm:$0xff]  ;;  %v7318_v26 = vld [vmem:[#allocation9 + $0x48] sm:$0xff] }
0x5785   :  { %10214 = vrcp.f32 %v7225_v49  ;;  %v7357_v49 = vld [vmem:[#allocation9 + $0x180] sm:$0xff]  ;;  %v7366_v7 = vld [vmem:[#allocation9 + $0x1c8] sm:$0xff]  ;;  %v7319_v58 = vld [vmem:[#allocation9 + $0x50] sm:$0xff] }
0x5786   :  { %v7365_v31 = vld [vmem:[#allocation9 + $0x1c0] sm:$0xff] }
0x578e   :  { %v11566_v23 = vpop.eup %10212 }
0x578f   :  { %v11568_v14 = vpop.eup %10214 }
0x57f2   :  { %v7240_v27 = vpop.permute.xlu1 %7239 }
0x57f3   :  { %v7244_v5 = vmul.f32 %v11566_v23, %v7240_v27  ;;  %v7238_v50 = vpop.permute.xlu0 %7237  ;;  %v7358_v27 = vld [vmem:[#allocation9 + $0x188] sm:$0xff] }
0x57f4   :  { %v7243_v61 = vmul.f32 %v11568_v14, %v7238_v50  ;;  %v7342_v50 = vld [vmem:[#allocation9 + $0x108] sm:$0xff]  ;;  %v9397_v57 = vpack.c.bf16 %v7358_v27, %v7357_v49 }
0x57f5   :  { %7249 = vrot.lane.b32.xlu1 %v7244_v5, %s10386_s21  ;;  %v9371_v5 = vpack.c.bf16 %v7312_v35, %v7311_v25  ;;  %v7362_v25 = vld [vmem:[#allocation9 + $0x1a8] sm:$0xff]  ;;  %v7345_v35 = vld [vmem:[#allocation9 + $0x120] sm:$0xff] }
0x57f6   :  { %7247 = vrot.lane.b32.xlu0 %v7243_v61, %s10386_s21  ;;  %v9399_v61 = vpack.c.bf16 %v7342_v50, %v7341_v37  ;;  %9398 = vmatprep.subr.bf16.mxu1 %v9397_v57  ;;  %v7361_v37 = vld [vmem:[#allocation9 + $0x1a0] sm:$0xff]  ;;  %v7346_v27 = vld [vmem:[#allocation9 + $0x128] sm:$0xff]  ;;  %v7363_v50 = vld [vmem:[#allocation9 + $0x1b0] sm:$0xff] }
0x57f7   :  { %9372 = vmatpush3.bf16.msra.mxu0 %v9371_v5  ;;  %v9405_v49 = vpack.c.bf16 %v7362_v25, %v7361_v37  ;;  %v7333_v57 = vld [vmem:[#allocation9 + $0xc0] sm:$0xff]  ;;  %v9407_v32 = vpack.c.bf16 %v7346_v27, %v7345_v35  ;;  %v7335_v37 = vld [vmem:[#allocation9 + $0xd0] sm:$0xff]  ;;  %v7336_v25 = vld [vmem:[#allocation9 + $0xd8] sm:$0xff]  ;;  %v9413_v35 = vpack.c.bf16 %v7366_v7, %v7365_v31 }
0x57f8   :  { %9400 = vmatpush3.bf16.msra.mxu1 %v9399_v61  ;;  %9374 = vmatprep.subr.bf16.mxu0 %v9373_v44  ;;  %v7364_v61 = vld [vmem:[#allocation9 + $0x1b8] sm:$0xff]  ;;  %v9381_v44 = vpack.c.bf16 %v7334_v22, %v7333_v57  ;;  %v7350_v27 = vld [vmem:[#allocation9 + $0x148] sm:$0xff]  ;;  %v7234_v57 = vmul.f32 %v11566_v23, %v11538_v4 }
0x57f9   :  { %9402 = vmatprep.subr.bf16.mxu1 %v9401_v16  ;;  %v9409_v5 = vpack.c.bf16 %v7364_v61, %v7363_v50  ;;  %v7348_v16 = vld [vmem:[#allocation9 + $0x138] sm:$0xff]  ;;  %v7337_v61 = vld [vmem:[#allocation9 + $0xe0] sm:$0xff] }
0x57fa   :  { %v9411_v34 = vpack.c.bf16 %v7348_v16, %v7347_v43  ;;  %v7321_v43 = vld [vmem:[#allocation9 + $0x60] sm:$0xff]  ;;  %v7322_v16 = vld [vmem:[#allocation9 + $0x68] sm:$0xff]  ;;  %v7368_v7 = vld [vmem:[#allocation9 + $0x1d8] sm:$0xff] }
0x57fb   :  { %9376 = vmatpush3.bf16.msra.mxu0 %v9375_v12  ;;  %v9385_v12 = vpack.c.bf16 %v7336_v25, %v7335_v37  ;;  %v9391_v31 = vpack.c.bf16 %v7322_v16, %v7321_v43  ;;  %v7351_v37 = vld [vmem:[#allocation9 + $0x150] sm:$0xff]  ;;  %v7352_v25 = vld [vmem:[#allocation9 + $0x158] sm:$0xff] }
0x57fc   :  { %9404 = vmatpush3.bf16.msra.mxu1 %v9403_v54  ;;  %9378 = vmatprep.subr.bf16.mxu0 %v9377_v8  ;;  %v9383_v54 = vpack.c.bf16 %v7318_v26, %v7317_v46  ;;  %v7349_v8 = vld [vmem:[#allocation9 + $0x140] sm:$0xff]  ;;  %v7355_v16 = vld [vmem:[#allocation9 + $0x170] sm:$0xff] }
0x57fd   :  { %9406 = vmatprep.subr.bf16.mxu1 %v9405_v49  ;;  %v9387_v49 = vpack.c.bf16 %v7320_v40, %v7319_v58  ;;  %v9415_v22 = vpack.c.bf16 %v7350_v27, %v7349_v8  ;;  %v7323_v58 = vld [vmem:[#allocation9 + $0x70] sm:$0xff]  ;;  %v7324_v40 = vld [vmem:[#allocation9 + $0x78] sm:$0xff]  ;;  %v7370_v27 = vld [vmem:[#allocation9 + $0x1e8] sm:$0xff] }
0x57fe   :  { %v9395_v8 = vpack.c.bf16 %v7324_v40, %v7323_v58  ;;  %v7376_v58 = vld [vmem:[#allocation9 + $0x218] sm:$0xff]  ;;  %v11633_v40 = vld [vmem:[#allocation9 + $0x2a0] sm:$0xff] }
0x57ff   :  { %9380 = vmatpush3.bf16.msra.mxu0 %v9379_v41  ;;  %v7338_v41 = vld [vmem:[#allocation9 + $0xe8] sm:$0xff] }
0x5800   :  { %9408 = vmatpush3.bf16.msra.mxu1 %v9407_v32  ;;  %9382 = vmatprep.subr.bf16.mxu0 %v9381_v44  ;;  %v7233_v32 = vmul.f32 %v11568_v14, %v11540_v17  ;;  %v7367_v44 = vld [vmem:[#allocation9 + $0x1d0] sm:$0xff] }
0x5801   :  { %9410 = vmatprep.subr.bf16.mxu1 %v9409_v5  ;;  %v9417_v4 = vpack.c.bf16 %v7368_v7, %v7367_v44  ;;  %v7339_v17 = vld [vmem:[#allocation9 + $0xf0] sm:$0xff]  ;;  %v7356_v44 = vld [vmem:[#allocation9 + $0x178] sm:$0xff] }
0x5803   :  { %9384 = vmatpush3.bf16.msra.mxu0 %v9383_v54  ;;  %v9419_v54 = vpack.c.bf16 %v7352_v25, %v7351_v37  ;;  %v9633_v37 = vpack.i.bf16 %v10685_v38, %v10811_v24  ;;  %v9628_v25 = vpack.i.bf16 %v10621_v19, %v10745_v59  ;;  %v9653_v38 = vpack.i.bf16 %v10683_v36, %v10809_v18 }
0x5804   :  { %9412 = vmatpush3.bf16.msra.mxu1 %v9411_v34  ;;  %9386 = vmatprep.subr.bf16.mxu0 %v9385_v12  ;;  %v9389_v34 = vpack.c.bf16 %v7338_v41, %v7337_v61  ;;  %v7389_v61 = vld [vmem:[#allocation9 + $0x280] sm:$0xff]  ;;  %v7390_v41 = vld [vmem:[#allocation9 + $0x288] sm:$0xff]  ;;  %v9648_v19 = vpack.i.bf16 %v10626_v21, %v10743_v56  ;;  %v9663_v59 = vpack.i.bf16 %v10944_v47, %v11068_v0 }
0x5805   :  { %9414 = vmatprep.subr.bf16.mxu1 %v9413_v35  ;;  %v7340_v35 = vld [vmem:[#allocation9 + $0xf8] sm:$0xff]  ;;  %v9658_v24 = vpack.i.bf16 %v10884_v6, %v11008_v53  ;;  %v9673_v36 = vpack.i.bf16 %v11199_v29, %v11323_v28  ;;  %v9668_v21 = vpack.i.bf16 %v11139_v55, %v11263_v63  ;;  %v9683_v56 = vpack.i.bf16 %v11137_v33, %v11261_v15  ;;  %v7422_v47 = vld [vmem:[#allocation9 + $0x388] sm:$0xff]  ;;  %v7373_v15 = vld [vmem:[#allocation9 + $0x200] sm:$0xff] }
0x5806   :  { %v9393_v12 = vpack.c.bf16 %v7340_v35, %v7339_v17  ;;  %v9678_v18 = vpack.i.bf16 %v11391_v30, %v11516_v13  ;;  %v9688_v6 = vpack.i.bf16 %v11197_v1, %v11321_v39  ;;  %v7374_v28 = vld [vmem:[#allocation9 + $0x208] sm:$0xff]  ;;  %v7391_v30 = vld [vmem:[#allocation9 + $0x290] sm:$0xff]  ;;  %v7392_v13 = vld [vmem:[#allocation9 + $0x298] sm:$0xff] }
0x5807   :  { %9388 = vmatpush3.bf16.msra.mxu0 %v9387_v49  ;;  %v7369_v49 = vld [vmem:[#allocation9 + $0x1e0] sm:$0xff] }
0x5808   :  { %9416 = vmatpush3.bf16.msra.mxu1 %v9415_v22  ;;  %9390 = vmatprep.subr.bf16.mxu0 %v9389_v34  ;;  %v7354_v22 = vld [vmem:[#allocation9 + $0x168] sm:$0xff]  ;;  %v7372_v34 = vld [vmem:[#allocation9 + $0x1f8] sm:$0xff] }
0x5809   :  { %9418 = vmatprep.subr.bf16.mxu1 %v9417_v4  ;;  %v9643_v4 = vpack.i.bf16 %v10946_v9, %v11070_v2 }
0x580b   :  { %9392 = vmatpush3.bf16.msra.mxu0 %v9391_v31 }
0x580c   :  { %9420 = vmatpush3.bf16.msra.mxu1 %v9419_v54  ;;  %9394 = vmatprep.subr.bf16.mxu0 %v9393_v12  ;;  %v9638_v54 = vpack.i.bf16 %v10886_v62, %v11010_v52  ;;  %v7421_v62 = vld [vmem:[#allocation9 + $0x380] sm:$0xff] }
0x580d   :  { %v9461_v9 = vpack.c.bf16 %v7422_v47, %v7421_v62  ;;  %v7425_v47 = vld [vmem:[#allocation9 + $0x3a0] sm:$0xff] }
0x580f   :  { %9396 = vmatpush3.bf16.msra.mxu0 %v9395_v8 }
0x5867   :  { %v7250_v50 = vpop.permute.xlu1 %7249 }
0x5868   :  { %v7254_v46 = vadd.f32 %v7250_v50, %v7234_v57  ;;  %v7248_v5 = vpop.permute.xlu0 %7247  ;;  %v7353_v57 = vld [vmem:[#allocation9 + $0x160] sm:$0xff]  ;;  %v9421_v50 = vpack.c.bf16 %v7370_v27, %v7369_v49  ;;  %v11635_v49 = vld [vmem:[#allocation9 + $0x2a8] sm:$0xff]  ;;  %v9431_v27 = vpack.c.bf16 %v7374_v28, %v7373_v15  ;;  %v7380_v28 = vld [vmem:[#allocation9 + $0x238] sm:$0xff] }
0x5869   :  { %v7253_v26 = vadd.f32 %v7248_v5, %v7233_v32  ;;  %v9423_v32 = vpack.c.bf16 %v7354_v22, %v7353_v57  ;;  %v7371_v5 = vld [vmem:[#allocation9 + $0x1f0] sm:$0xff]  ;;  %v9433_v57 = vpack.c.bf16 %v7392_v13, %v7391_v30  ;;  %v7405_v22 = vld [vmem:[#allocation9 + $0x300] sm:$0xff]  ;;  %v7398_v13 = vld [vmem:[#allocation9 + $0x2c8] sm:$0xff] }
0x586a   :  { %10216 = vtanh.f32 %v7254_v46  ;;  %9422 = vmatprep.subr.bf16.mxu1 %v9421_v50  ;;  %v9429_v46 = vpack.c.bf16 %v7390_v41, %v7389_v61  ;;  %v9425_v43 = vpack.c.bf16 %v7372_v34, %v7371_v5  ;;  %v7406_v61 = vld [vmem:[#allocation9 + $0x308] sm:$0xff]  ;;  %v7423_v41 = vld [vmem:[#allocation9 + $0x390] sm:$0xff]  ;;  %v11647_v5 = vld [vmem:[#allocation9 + $0x220] sm:$0xff] }
0x586b   :  { %10218 = vtanh.f32 %v7253_v26  ;;  %9424 = vmatpush3.bf16.msra.mxu1 %v9423_v32  ;;  %v9427_v26 = vpack.c.bf16 %v7356_v44, %v7355_v16  ;;  %v11649_v34 = vld [vmem:[#allocation9 + $0x228] sm:$0xff]  ;;  %v7397_v30 = vld [vmem:[#allocation9 + $0x2c0] sm:$0xff] }
0x586c   :  { %9430 = vmatprep.subr.bf16.mxu0 %v9429_v46  ;;  %9426 = vmatprep.subr.bf16.mxu1 %v9425_v43  ;;  %v7424_v46 = vld [vmem:[#allocation9 + $0x398] sm:$0xff]  ;;  %v11651_v43 = vld [vmem:[#allocation9 + $0x2b0] sm:$0xff] }
0x586f   :  { %9428 = vmatpush3.bf16.msra.mxu1 %v9427_v26 }
0x5870   :  { %9462 = vmatprep.subr.bf16.mxu1 %v9461_v9  ;;  %v7426_v9 = vld [vmem:[#allocation9 + $0x3a8] sm:$0xff] }
0x5874   :  { %v10217_v31 = vpop.eup %10216 }
0x5875   :  { %v10219_v7 = vpop.eup %10218  ;;  %7261 = vrot.lane.b32.xlu1 %v10217_v31, %s10386_s21 }
0x5876   :  { %7259 = vrot.lane.b32.xlu0 %v10219_v7, %s10386_s21  ;;  %v11821_v7 = vld [vmem:[#allocation24_spill] sm:$0xff] }
0x5879   :  { %9634 = vrot.lane.b32.xlu1 %v9633_v37, %s10386_s21 }
0x587a   :  { %9629 = vrot.lane.b32.xlu0 %v9628_v25, %s10395_s9  ;;  %v11657_v25 = vld [vmem:[#allocation9 + $0x2b8] sm:$0xff] }
0x587d   :  { %9644 = vrot.lane.b32.xlu1 %v9643_v4, %s10386_s21  ;;  %v7407_v4 = vld [vmem:[#allocation9 + $0x310] sm:$0xff] }
0x587e   :  { %9639 = vrot.lane.b32.xlu0 %v9638_v54, %s10395_s9  ;;  %v7408_v54 = vld [vmem:[#allocation9 + $0x318] sm:$0xff] }
0x5881   :  { %9654 = vrot.lane.b32.xlu1 %v9653_v38, %s10386_s21 }
0x5882   :  { %9649 = vrot.lane.b32.xlu0 %v9648_v19, %s10395_s9  ;;  %v11822_v19 = vld [vmem:[#allocation27_spill] sm:$0xff] }
0x5885   :  { %9664 = vrot.lane.b32.xlu1 %v9663_v59, %s10386_s21 }
0x5886   :  { %9659 = vrot.lane.b32.xlu0 %v9658_v24, %s10395_s9  ;;  %v11823_v24 = vld [vmem:[#allocation23_spill] sm:$0xff] }
0x5889   :  { %9674 = vrot.lane.b32.xlu1 %v9673_v36, %s10386_s21 }
0x588a   :  { %9669 = vrot.lane.b32.xlu0 %v9668_v21, %s10395_s9  ;;  %v9463_v21 = vpack.c.bf16 %v7406_v61, %v7405_v22  ;;  %v7428_v22 = vld [vmem:[#allocation9 + $0x3b8] sm:$0xff]  ;;  %v11829_v61 = vld [vmem:[#allocation21_spill] sm:$0xff] }
0x588d   :  { %9684 = vrot.lane.b32.xlu1 %v9683_v56, %s10395_s9  ;;  %v9465_v56 = vpack.c.bf16 %v7424_v46, %v7423_v41 }
0x588e   :  { %9679 = vrot.lane.b32.xlu0 %v9678_v18, %s10395_s9 }
0x5891   :  { %9689 = vrot.lane.b32.xlu1 %v9688_v6, %s10386_s21 }
0x58e7   :  { %v7262_v53 = vpop.permute.xlu1 %7261 }
0x58e8   :  { %v7266_v52 = vmul.f32 %v11566_v23, %v7262_v53  ;;  %v7260_v0 = vpop.permute.xlu0 %7259  ;;  %v9698_v23 = vpack.i.bf16 %v11389_v48, %v11514_v11  ;;  %v9439_v53 = vpack.c.bf16 %v11649_v34, %v11647_v5  ;;  %v11831_v34 = vld [vmem:[#allocation22_spill] sm:$0xff] }
0x58e9   :  { %v7265_v2 = vmul.f32 %v11568_v14, %v7260_v0  ;;  %v7379_v0 = vld [vmem:[#allocation9 + $0x230] sm:$0xff] }
0x58ea   :  { %v9703_v33 = vpack.i.bf16 %v11454_v51, %v7266_v52  ;;  %v11627_v51 = vld [vmem:[#allocation9 + $0x210] sm:$0xff]  ;;  %v9441_v52 = vpack.c.bf16 %v11657_v25, %v11651_v43 }
0x58eb   :  { %v9693_v55 = vpack.i.bf16 %v11456_v3, %v7265_v2  ;;  %v9635_v29 = vpop.permute.xlu1 %9634  ;;  %v9467_v2 = vpack.c.bf16 %v7408_v54, %v7407_v4  ;;  %v7399_v25 = vld [vmem:[#allocation9 + $0x2d0] sm:$0xff] }
0x58ec   :  { %9704 = vrot.lane.b32.xlu1 %v9703_v33, %s10386_s21  ;;  %v9630_v1 = vpop.permute.xlu0 %9629  ;;  %v9637_v3 = vunpack.i.h.bf16 %v9635_v29  ;;  %v9636_v14 = vunpack.i.l.bf16 %v9635_v29  ;;  %v7411_v54 = vld [vmem:[#allocation9 + $0x330] sm:$0xff] }
0x58ed   :  { %v9632_v63 = vunpack.i.h.bf16 %v9630_v1  ;;  %v9631_v39 = vunpack.i.l.bf16 %v9630_v1  ;;  %9694 = vrot.lane.b32.xlu0 %v9693_v55, %s10386_s21  ;;  %v11824_v1 = vld [vmem:[#allocation19_spill] sm:$0xff] }
0x58ef   :  { %v995_v17 = vsel %vm104_vm2, %v10587_v45, %v9632_v63  ;;  %v9645_v35 = vpop.permute.xlu1 %9644  ;;  %v1895_v12 = vsel %vm104_vm2, %v10717_v20, %v9631_v39  ;;  %v11825_v63 = vld [vmem:[#allocation17_spill] sm:$0xff] }
0x58f0   :  { %v9640_v8 = vpop.permute.xlu0 %9639  ;;  %v1897_v48 = vsel %vm997_vm3, %v1895_v12, %v10775_v42  ;;  %v998_v11 = vsel %vm997_vm3, %v995_v17, %v10655_v60  ;;  %v9435_v42 = vpack.c.bf16 %v7376_v58, %v11627_v51  ;;  %v9437_v60 = vpack.c.bf16 %v11635_v49, %v11633_v40  ;;  %v11826_v51 = vld [vmem:[#allocation20_spill] sm:$0xff] }
0x58f1   :  { %v9642_v45 = vunpack.i.h.bf16 %v9640_v8  ;;  %v9641_v50 = vunpack.i.l.bf16 %v9640_v8  ;;  %9699 = vrot.lane.b32.xlu0 %v9698_v23, %s10395_s9  ;;  %v1899_v20 = vsel %vm1000_vm4, %v1897_v48, %v9636_v14  ;;  %v1001_v32 = vsel %vm1000_vm4, %v998_v11, %v9637_v3  ;;  %v11827_v14 = vld [vmem:[#allocation18_spill] sm:$0xff]  ;;  %v7409_v8 = vld [vmem:[#allocation9 + $0x320] sm:$0xff]  ;;  %v7410_v48 = vld [vmem:[#allocation9 + $0x328] sm:$0xff] }
0x58f2   :  { %7508 = vmatprep.mubr.f32.mxu0 %v1899_v20  ;;  %v9647_v16 = vunpack.i.h.bf16 %v9645_v35  ;;  %v9646_v44 = vunpack.i.l.bf16 %v9645_v35  ;;  %v9469_v35 = vpack.c.bf16 %v7426_v9, %v7425_v47  ;;  %v9443_v11 = vpack.c.bf16 %v7380_v28, %v7379_v0  ;;  %v11828_v20 = vld [vmem:[#allocation25_spill] sm:$0xff]  ;;  %v7384_v47 = vld [vmem:[#allocation9 + $0x258] sm:$0xff]  ;;  %v7401_v0 = vld [vmem:[#allocation9 + $0x2e0] sm:$0xff] }
0x58f3   :  { %v2793_v26 = vsel %vm104_vm2, %v10858_v10, %v9642_v45  ;;  %v9655_v31 = vpop.permute.xlu1 %9654  ;;  %7509 = vmatmul.mubr.f32.vlgmr.msra.gmra.mrb[32].mxu0 %v1001_v32  ;;  %v3691_v37 = vsel %vm104_vm2, %v11821_v7, %v9641_v50  ;;  %v7386_v28 = vld [vmem:[#allocation9 + $0x268] sm:$0xff] }
0x58f4   :  { %9432 = vmatpush3.bf16.msra.mxu0 %v9431_v27  ;;  %v9650_v38 = vpop.permute.xlu0 %9649  ;;  %v3693_v59 = vsel %vm997_vm3, %v3691_v37, %v11822_v19  ;;  %v2795_v36 = vsel %vm997_vm3, %v2793_v26, %v11823_v24  ;;  %v9657_v33 = vunpack.i.h.bf16 %v9655_v31  ;;  %v9656_v55 = vunpack.i.l.bf16 %v9655_v31  ;;  %v7400_v19 = vld [vmem:[#allocation9 + $0x2d8] sm:$0xff]  ;;  %v7430_v24 = vld [vmem:[#allocation9 + $0x3c8] sm:$0xff] }
0x58f5   :  { %v9652_v10 = vunpack.i.h.bf16 %v9650_v38  ;;  %v9651_v18 = vunpack.i.l.bf16 %v9650_v38  ;;  %v3695_v6 = vsel %vm1000_vm4, %v3693_v59, %v9646_v44  ;;  %9434 = vmatprep.subr.bf16.mxu0 %v9433_v57  ;;  %v2797_v62 = vsel %vm1000_vm4, %v2795_v36, %v9647_v16  ;;  %v7427_v57 = vld [vmem:[#allocation9 + $0x3b0] sm:$0xff]  ;;  %v7381_v16 = vld [vmem:[#allocation9 + $0x240] sm:$0xff]  ;;  %v7382_v44 = vld [vmem:[#allocation9 + $0x248] sm:$0xff] }
0x58f6   :  { %7583 = vmatprep.mubr.f32.mxu1 %v3695_v6  ;;  %v9445_v27 = vpack.c.bf16 %v7398_v13, %v7397_v30  ;;  %v9471_v26 = vpack.c.bf16 %v7410_v48, %v7409_v8  ;;  %v9473_v4 = vpack.c.bf16 %v7428_v22, %v7427_v57  ;;  %v7412_v38 = vld [vmem:[#allocation9 + $0x338] sm:$0xff]  ;;  %v7429_v59 = vld [vmem:[#allocation9 + $0x3c0] sm:$0xff]  ;;  %v9447_v6 = vpack.c.bf16 %v7382_v44, %v7381_v16  ;;  %v7387_v8 = vld [vmem:[#allocation9 + $0x270] sm:$0xff] }
0x58f7   :  { %v9665_v29 = vpop.permute.xlu1 %9664  ;;  %7584 = vmatmul.mubr.f32.vlgmr.msra.gmra.mrb[36].mxu1 %v2797_v62  ;;  %v1896_v15 = vsel %vm104_vm2, %v11824_v1, %v9651_v18  ;;  %v996_v39 = vsel %vm104_vm2, %v11825_v63, %v9652_v10  ;;  %v11833_v10 = vld [vmem:[#allocation35_spill] sm:$0xff]  ;;  %v7383_v62 = vld [vmem:[#allocation9 + $0x250] sm:$0xff]  ;;  %v9475_v9 = vpack.c.bf16 %v7412_v38, %v7411_v54  ;;  %v7420_v16 = vld [vmem:[#allocation9 + $0x378] sm:$0xff] }
0x58f8   :  { %9436 = vmatpush3.bf16.msra.mxu0 %v9435_v42  ;;  %v9660_v23 = vpop.permute.xlu0 %9659  ;;  %v1898_v3 = vsel %vm997_vm3, %v1896_v15, %v11826_v51  ;;  %v999_v17 = vsel %vm997_vm3, %v996_v39, %v11827_v14  ;;  %9464 = vmatpush3.bf16.msra.mxu1 %v9463_v21  ;;  %v9667_v45 = vunpack.i.h.bf16 %v9665_v29  ;;  %v9666_v50 = vunpack.i.l.bf16 %v9665_v29  ;;  %v11832_v21 = vld [vmem:[#allocation32_spill] sm:$0xff]  ;;  %v7431_v1 = vld [vmem:[#allocation9 + $0x3d0] sm:$0xff]  ;;  %v7432_v15 = vld [vmem:[#allocation9 + $0x3d8] sm:$0xff] }
0x58f9   :  { %v9662_v12 = vunpack.i.h.bf16 %v9660_v23  ;;  %v9661_v58 = vunpack.i.l.bf16 %v9660_v23  ;;  %v1900_v40 = vsel %vm1000_vm4, %v1898_v3, %v9656_v55  ;;  %9438 = vmatprep.subr.bf16.mxu0 %v9437_v60  ;;  %v1002_v49 = vsel %vm1000_vm4, %v999_v17, %v9657_v33  ;;  %9466 = vmatprep.subr.bf16.mxu1 %v9465_v56  ;;  %v11830_v60 = vld [vmem:[#allocation26_spill] sm:$0xff]  ;;  %v7413_v33 = vld [vmem:[#allocation9 + $0x340] sm:$0xff]  ;;  %v7414_v55 = vld [vmem:[#allocation9 + $0x348] sm:$0xff] }
0x58fa   :  { %7513 = vmatprep.mubr.f32.mxu0 %v1900_v40  ;;  %v7402_v29 = vld [vmem:[#allocation9 + $0x2e8] sm:$0xff]  ;;  %v9451_v63 = vpack.c.bf16 %v7384_v47, %v7383_v62  ;;  %v7385_v39 = vld [vmem:[#allocation9 + $0x260] sm:$0xff]  ;;  %v9479_v30 = vpack.c.bf16 %v7414_v55, %v7413_v33  ;;  %v7403_v23 = vld [vmem:[#allocation9 + $0x2f0] sm:$0xff]  ;;  %v9481_v51 = vpack.c.bf16 %v7432_v15, %v7431_v1 }
0x58fb   :  { %7514 = vmatmul.mubr.f32.gmra.mrb[34].mxu0 %v1002_v49  ;;  %v3692_v32 = vsel %vm104_vm2, %v11828_v20, %v9661_v58  ;;  %v2794_v41 = vsel %vm104_vm2, %v11829_v61, %v9662_v12  ;;  %v11683_v46 = vpop.permute.xlu1 %9674  ;;  %v9453_v13 = vpack.c.bf16 %v7402_v29, %v7401_v0  ;;  %v7415_v3 = vld [vmem:[#allocation9 + $0x350] sm:$0xff]  ;;  %v7416_v14 = vld [vmem:[#allocation9 + $0x358] sm:$0xff]  ;;  %v7433_v12 = vld [vmem:[#allocation9 + $0x3e0] sm:$0xff]  ;;  %v9455_v49 = vpack.c.bf16 %v7386_v28, %v7385_v39 }
0x58fc   :  { %9440 = vmatpush3.bf16.msra.mxu0 %v9439_v53  ;;  %v11685_v42 = vpop.permute.xlu0 %9669  ;;  %v3694_v5 = vsel %vm997_vm3, %v3692_v32, %v11830_v60  ;;  %v2796_v43 = vsel %vm997_vm3, %v2794_v41, %v11831_v34  ;;  %9468 = vmatpush3.bf16.msra.mxu1 %v9467_v2  ;;  %v9676_v36 = vunpack.i.l.bf16 %v11683_v46  ;;  %v9477_v2 = vpack.c.bf16 %v7430_v24, %v7429_v59  ;;  %v7434_v58 = vld [vmem:[#allocation9 + $0x3e8] sm:$0xff]  ;;  %v7417_v22 = vld [vmem:[#allocation9 + $0x360] sm:$0xff]  ;;  %v7436_v20 = vld [vmem:[#allocation9 + $0x3f8] sm:$0xff] }
0x58fd   :  { %v9671_v31 = vunpack.i.l.bf16 %v11685_v42  ;;  %v3696_v7 = vsel %vm1000_vm4, %v3694_v5, %v9666_v50  ;;  %9442 = vmatprep.subr.bf16.mxu0 %v9441_v52  ;;  %v2798_v37 = vsel %vm1000_vm4, %v2796_v43, %v9667_v45  ;;  %9470 = vmatprep.subr.bf16.mxu1 %v9469_v35  ;;  %v9449_v52 = vpack.c.bf16 %v7400_v19, %v7399_v25  ;;  %v7404_v35 = vld [vmem:[#allocation9 + $0x2f8] sm:$0xff]  ;;  %v7418_v45 = vld [vmem:[#allocation9 + $0x368] sm:$0xff]  ;;  %v7435_v50 = vld [vmem:[#allocation9 + $0x3f0] sm:$0xff] }
0x58fe   :  { %7588 = vmatprep.mubr.f32.mxu1 %v3696_v7  ;;  %v9672_v40 = vunpack.i.h.bf16 %v11685_v42  ;;  %v9483_v48 = vpack.c.bf16 %v7416_v14, %v7415_v3  ;;  %v9485_v57 = vpack.c.bf16 %v7434_v58, %v7433_v12  ;;  %v11834_v61 = vld [vmem:[#allocation28_spill] sm:$0xff]  ;;  %v9487_v5 = vpack.c.bf16 %v7418_v45, %v7417_v22  ;;  %v7419_v43 = vld [vmem:[#allocation9 + $0x370] sm:$0xff]  ;;  %v11837_v59 = vld [vmem:[#allocation34_spill] sm:$0xff] }
0x58ff   :  { %7589 = vmatmul.mubr.f32.gmra.mrb[38].mxu1 %v2798_v37  ;;  %v5487_v56 = vsel %vm104_vm2, %v11832_v21, %v9671_v31  ;;  %v9685_v17 = vpop.permute.xlu1 %9684  ;;  %v9489_v34 = vpack.c.bf16 %v7436_v20, %v7435_v50  ;;  %v11835_v31 = vld [vmem:[#allocation31_spill] sm:$0xff]  ;;  %v11836_v37 = vld [vmem:[#allocation33_spill] sm:$0xff]  ;;  %v9491_v54 = vpack.c.bf16 %v7420_v16, %v7419_v43  ;;  %v7759_v22 = vld [vmem:[#allocation11 + $0x8] sm:$0xff] }
0x5900   :  { %9444 = vmatpush3.bf16.msra.mxu0 %v9443_v11  ;;  %v5489_v18 = vsel %vm997_vm3, %v5487_v56, %v11833_v10  ;;  %9472 = vmatpush3.bf16.msra.mxu1 %v9471_v26  ;;  %v9457_v11 = vpack.c.bf16 %v7404_v35, %v7403_v23  ;;  %v9686_v32 = vunpack.i.l.bf16 %v9685_v17  ;;  %v4589_v41 = vsel %vm104_vm2, %v11834_v61, %v9672_v40  ;;  %v11839_v10 = vld [vmem:[#allocation30_spill] sm:$0xff]  ;;  %v11842_v29 = vld [vmem:[#allocation43_spill] sm:$0xff]  ;;  %v11845_v12 = vld [vmem:[#allocation41_spill] sm:$0xff] }
0x5901   :  { %9446 = vmatprep.subr.bf16.mxu0 %v9445_v27  ;;  %v5491_v53 = vsel %vm1000_vm4, %v5489_v18, %v9676_v36  ;;  %9474 = vmatprep.subr.bf16.mxu1 %v9473_v4  ;;  %v7388_v27 = vld [vmem:[#allocation9 + $0x278] sm:$0xff]  ;;  %v9687_v44 = vunpack.i.h.bf16 %v9685_v17  ;;  %v4591_v7 = vsel %vm997_vm3, %v4589_v41, %v11835_v31  ;;  %v9677_v4 = vunpack.i.h.bf16 %v11683_v46  ;;  %v11838_v36 = vld [vmem:[#allocation29_spill] sm:$0xff]  ;;  %v11843_v15 = vld [vmem:[#allocation39_spill] sm:$0xff] }
0x5902   :  { %7658 = vmatprep.mubr.f32.mxu0 %v5491_v53  ;;  %v9459_v42 = vpack.c.bf16 %v7388_v27, %v7387_v8  ;;  %v5488_v25 = vsel %vm104_vm2, %v11836_v37, %v9686_v32  ;;  %v11844_v17 = vld [vmem:[#allocation37_spill] sm:$0xff]  ;;  %v11846_v40 = vld [vmem:[#allocation42_spill] sm:$0xff]  ;;  %v7762_v61 = vld [vmem:[#allocation11 + $0x20] sm:$0xff] }
0x5903   :  { %v9690_v60 = vpop.permute.xlu1 %9689  ;;  %v4593_v19 = vsel %vm1000_vm4, %v4591_v7, %v9677_v4  ;;  %v5490_v24 = vsel %vm997_vm3, %v5488_v25, %v11837_v59  ;;  %v4590_v21 = vsel %vm104_vm2, %v11838_v36, %v9687_v44  ;;  %v11847_v8 = vld [vmem:[#allocation38_spill] sm:$0xff]  ;;  %v7760_v50 = vld [vmem:[#allocation11 + $0x10] sm:$0xff]  ;;  %v7763_v41 = vld [vmem:[#allocation11 + $0x28] sm:$0xff] }
0x5904   :  { %9448 = vmatpush3.bf16.msra.mxu0 %v9447_v6  ;;  %9476 = vmatpush3.bf16.msra.mxu1 %v9475_v9  ;;  %v9691_v26 = vunpack.i.l.bf16 %v9690_v60  ;;  %v9692_v38 = vunpack.i.h.bf16 %v9690_v60  ;;  %v4592_v46 = vsel %vm997_vm3, %v4590_v21, %v11839_v10  ;;  %v9680_v6 = vpop.permute.xlu0 %9679  ;;  %v11840_v9 = vld [vmem:[#allocation36_spill] sm:$0xff]  ;;  %v7761_v20 = vld [vmem:[#allocation11 + $0x18] sm:$0xff]  ;;  %v7764_v16 = vld [vmem:[#allocation11 + $0x30] sm:$0xff] }
0x5905   :  { %9450 = vmatprep.subr.bf16.mxu0 %v9449_v52  ;;  %9478 = vmatprep.subr.bf16.mxu1 %v9477_v2  ;;  %v9682_v62 = vunpack.i.h.bf16 %v9680_v6  ;;  %v9681_v47 = vunpack.i.l.bf16 %v9680_v6  ;;  %v11841_v52 = vld [vmem:[#allocation40_spill] sm:$0xff]  ;;  %v9497_v32 = vpack.c.bf16 %v7761_v20, %v7760_v50  ;;  %v7765_v44 = vld [vmem:[#allocation11 + $0x38] sm:$0xff]  ;;  %v7766_v4 = vld [vmem:[#allocation11 + $0x40] sm:$0xff] }
0x5906   :  { %v5492_v56 = vsel %vm1000_vm4, %v5490_v24, %v9691_v26  ;;  %v4594_v18 = vsel %vm1000_vm4, %v4592_v46, %v9692_v38  ;;  %v8100_v43 = vld [vmem:[%s11763_s5] ss:$0 sm:$0xff]  ;;  %v9505_v31 = vpack.c.bf16 %v7765_v44, %v7764_v16  ;;  %v7768_v21 = vld [vmem:[#allocation11 + $0x50] sm:$0xff] }
0x5907   :  { %v6385_v53 = vsel %vm104_vm2, %v11840_v9, %v9682_v62  ;;  %v7283_v0 = vsel %vm104_vm2, %v11841_v52, %v9681_v47  ;;  %v7771_v6 = vld [vmem:[#allocation11 + $0x68] sm:$0xff] }
0x5908   :  { %9452 = vmatpush3.bf16.msra.mxu0 %v9451_v63  ;;  %9480 = vmatpush3.bf16.msra.mxu1 %v9479_v30  ;;  %v7285_v1 = vsel %vm997_vm3, %v7283_v0, %v11842_v29  ;;  %v6387_v63 = vsel %vm997_vm3, %v6385_v53, %v11843_v15  ;;  %v7772_v0 = vld [vmem:[#allocation11 + $0x70] sm:$0xff] }
0x5909   :  { %9454 = vmatprep.subr.bf16.mxu0 %v9453_v13  ;;  %9482 = vmatprep.subr.bf16.mxu1 %v9481_v51 }
0x590c   :  { %9456 = vmatpush3.bf16.msra.mxu0 %v9455_v49  ;;  %9484 = vmatpush3.bf16.msra.mxu1 %v9483_v48 }
0x590d   :  { %9458 = vmatprep.subr.bf16.mxu0 %v9457_v11  ;;  %9486 = vmatprep.subr.bf16.mxu1 %v9485_v57  ;;  %v7758_v57 = vld [vmem:[#allocation11] sm:$0xff] }
0x590e   :  { %v9493_v45 = vpack.c.bf16 %v7759_v22, %v7758_v57 }
0x5910   :  { %9460 = vmatpush3.bf16.msra.mxu0 %v9459_v42  ;;  %9488 = vmatpush3.bf16.msra.mxu1 %v9487_v5  ;;  %v9501_v42 = vpack.c.bf16 %v7763_v41, %v7762_v61 }
0x5911   :  { %9490 = vmatprep.subr.bf16.mxu1 %v9489_v34  ;;  %9494 = vmatprep.subr.bf16.mxu0 %v9493_v45 }
0x5913   :  { %7659 = vmatmul.mubr.f32.vlgmr.msra.gmra.mrb[36].mxu0 %v4593_v19 }
0x5914   :  { %7663 = vmatprep.mubr.f32.mxu0 %v5492_v56  ;;  %9492 = vmatpush3.bf16.msra.mxu1 %v9491_v54  ;;  %v7767_v54 = vld [vmem:[#allocation11 + $0x48] sm:$0xff]  ;;  %v7769_v56 = vld [vmem:[#allocation11 + $0x58] sm:$0xff] }
0x5915   :  { %9496 = vmatpush3.bf16.msra.mxu0 %v9493_v45  ;;  %v9509_v59 = vpack.c.bf16 %v7767_v54, %v7766_v4  ;;  %v9513_v46 = vpack.c.bf16 %v7769_v56, %v7768_v21  ;;  %v7292_v45 = vld [vmem:[#allocation3 + $0x8] sm:$0xff] }
0x5916   :  { %9498 = vmatprep.subr.bf16.mxu0 %v9497_v32 }
0x5917   :  { %7664 = vmatmul.mubr.f32.gmra.mrb[38].mxu0 %v4594_v18  ;;  %v7770_v18 = vld [vmem:[#allocation11 + $0x60] sm:$0xff] }
0x5918   :  { %v9517_v47 = vpack.c.bf16 %v7771_v6, %v7770_v18 }
0x5919   :  { %9500 = vmatpush3.bf16.msra.mxu0 %v9497_v32  ;;  %v8103_v32 = vld [vmem:[%s11765_s7] ss:$0 sm:$0xff] }
0x591a   :  { %9502 = vmatprep.subr.bf16.mxu0 %v9501_v42 }
0x591d   :  { %9504 = vmatpush3.bf16.msra.mxu0 %v9501_v42 }
0x591e   :  { %9506 = vmatprep.subr.bf16.mxu0 %v9505_v31 }
0x5921   :  { %9508 = vmatpush3.bf16.msra.mxu0 %v9505_v31 }
0x5922   :  { %9510 = vmatprep.subr.bf16.mxu0 %v9509_v59 }
0x5925   :  { %9512 = vmatpush3.bf16.msra.mxu0 %v9509_v59 }
0x5926   :  { %9514 = vmatprep.subr.bf16.mxu0 %v9513_v46 }
0x5929   :  { %9516 = vmatpush3.bf16.msra.mxu0 %v9513_v46 }
0x592a   :  { %9518 = vmatprep.subr.bf16.mxu0 %v9517_v47 }
0x592d   :  { %9520 = vmatpush3.bf16.msra.mxu0 %v9517_v47 }
0x595e   :  { %v9705_v30 = vpop.permute.xlu1 %9704 }
0x595f   :  { %v9695_v2 = vpop.permute.xlu0 %9694  ;;  %v9707_v3 = vunpack.i.h.bf16 %v9705_v30  ;;  %v9706_v14 = vunpack.i.l.bf16 %v9705_v30 }
0x5960   :  { %v9697_v33 = vunpack.i.h.bf16 %v9695_v2  ;;  %v9696_v55 = vunpack.i.l.bf16 %v9695_v2  ;;  %v7773_v2 = vld [vmem:[#allocation11 + $0x78] sm:$0xff] }
0x5962   :  { %v7287_v39 = vsel %vm1000_vm4, %v7285_v1, %v9696_v55  ;;  %v6389_v28 = vsel %vm1000_vm4, %v6387_v63, %v9697_v33  ;;  %v9521_v33 = vpack.c.bf16 %v7773_v2, %v7772_v0 }
0x5963   :  { %v9700_v13 = vpop.permute.xlu0 %9699  ;;  %7733 = vmatprep.mubr.f32.mxu1 %v7287_v39 }
0x5964   :  { %v9702_v23 = vunpack.i.h.bf16 %v9700_v13  ;;  %v9701_v51 = vunpack.i.l.bf16 %v9700_v13  ;;  %7734 = vmatmul.mubr.f32.vlgmr.msra.gmra.mrb[40].mxu1 %v6389_v28  ;;  %9522 = vmatprep.subr.bf16.mxu0 %v9521_v33 }
0x5965   :  { %9524 = vmatpush3.bf16.msra.mxu0 %v9521_v33 }
0x5966   :  { %v6386_v35 = vsel %vm104_vm2, %v11844_v17, %v9702_v23  ;;  %v7284_v58 = vsel %vm104_vm2, %v11845_v12, %v9701_v51 }
0x5967   :  { %v7286_v49 = vsel %vm997_vm3, %v7284_v58, %v11846_v40  ;;  %v6388_v48 = vsel %vm997_vm3, %v6386_v35, %v11847_v8 }
0x5968   :  { %v7288_v11 = vsel %vm1000_vm4, %v7286_v49, %v9706_v14  ;;  %v6390_v27 = vsel %vm1000_vm4, %v6388_v48, %v9707_v3 }
0x5969   :  { %7738 = vmatprep.mubr.f32.mxu1 %v7288_v11 }
0x596a   :  { %7739 = vmatmul.mubr.f32.gmra.mrb[42].mxu1 %v6390_v27  ;;  %v7291_v27 = vld [vmem:[#allocation3] sm:$0xff] }
0x59c6   :  { %v8424_v60 = vpop.f32.mrb[32].mxu0 }
0x59c7   :  { %v8425_v5 = vpop.f32.mrb[33].mxu0 }
0x59c8   :  { %v8426_v34 = vadd.f32 %v8425_v5, %v8424_v60 }
0x59ca   :  { %v8462_v26 = vpop.f32.mrb[36].mxu1  ;;  %v7511_v37 = vadd.f32 %v8426_v34, %v8100_v43 }
0x59cb   :  { %v8463_v7 = vpop.f32.mrb[37].mxu1 }
0x59cc   :  { %v8464_v25 = vadd.f32 %v8463_v7, %v8462_v26 }
0x59ce   :  { %v7586_v38 = vadd.f32 %v8464_v25, %v7511_v37  ;;  %v8427_v19 = vpop.f32.mrb[34].mxu0 }
0x59cf   :  { %v8428_v24 = vpop.f32.mrb[35].mxu0 }
0x59d0   :  { %v8429_v36 = vadd.f32 %v8428_v24, %v8427_v19 }
0x59d2   :  { %v8465_v10 = vpop.f32.mrb[38].mxu1  ;;  %v7516_v9 = vadd.f32 %v8429_v36, %v8100_v43 }
0x59d3   :  { %v8466_v62 = vpop.f32.mrb[39].mxu1 }
0x59d4   :  { %v8467_v53 = vadd.f32 %v8466_v62, %v8465_v10 }
0x59d6   :  { %v7591_v52 = vadd.f32 %v8467_v53, %v7516_v9 }
0x59e6   :  { %v8500_v55 = vpop.f32.mrb[36].mxu0 }
0x59e7   :  { %v8501_v29 = vpop.f32.mrb[37].mxu0 }
0x59e8   :  { %v8502_v1 = vadd.f32 %v8501_v29, %v8500_v55 }
0x59ea   :  { %v7661_v15 = vadd.f32 %v8502_v1, %v7586_v38  ;;  %v8503_v63 = vpop.f32.mrb[38].mxu0 }
0x59eb   :  { %v8504_v39 = vpop.f32.mrb[39].mxu0 }
0x59ec   :  { %v8505_v28 = vadd.f32 %v8504_v39, %v8503_v63 }
0x59ee   :  { %v7666_v30 = vadd.f32 %v8505_v28, %v7591_v52 }
0x5a37   :  { %v8538_v13 = vpop.f32.mrb[40].mxu1 }
0x5a38   :  { %v8539_v23 = vpop.f32.mrb[41].mxu1 }
0x5a39   :  { %v8540_v51 = vadd.f32 %v8539_v23, %v8538_v13 }
0x5a3b   :  { %v7736_v3 = vadd.f32 %v8540_v51, %v7661_v15 }
0x5a3d   :  { %v8101_v14 = vmul.f32 -1.442695, %v7736_v3  ;;  %v8541_v17 = vpop.f32.mrb[42].mxu1 }
0x5a3e   :  { %v8542_v35 = vpop.f32.mrb[43].mxu1 }
0x5a3f   :  { %10220 = vpow2.f32 %v8101_v14  ;;  %v8543_v12 = vadd.f32 %v8542_v35, %v8541_v17 }
0x5a41   :  { %v7741_v58 = vadd.f32 %v8543_v12, %v7666_v30 }
0x5a43   :  { %v8102_v40 = vmul.f32 -1.442695, %v7741_v58 }
0x5a45   :  { %10222 = vpow2.f32 %v8102_v40 }
0x5a49   :  { %v10221_v49 = vpop.eup %10220 }
0x5a4a   :  { %v7750_v8 = vadd.f32 1.0, %v10221_v49 }
0x5a4c   :  { %10224 = vrcp.f32 %v7750_v8 }
0x5a4f   :  { %v10223_v48 = vpop.eup %10222 }
0x5a50   :  { %v7751_v11 = vadd.f32 1.0, %v10223_v48 }
0x5a52   :  { %10226 = vrcp.f32 %v7751_v11 }
0x5a56   :  { %v10225_v57 = vpop.eup %10224 }
0x5a57   :  { %v7756_v22 = vmul.f32 %v10225_v57, %v7291_v27 }
0x5a59   :  { %9106 = vmatprep.mubr.f32.mxu0 %v7756_v22 }
0x5a5c   :  { %v10227_v50 = vpop.eup %10226 }
0x5a5d   :  { %v7757_v20 = vmul.f32 %v10227_v50, %v7292_v45 }
0x5a5f   :  { %9107 = vmatmul.mubr.f32.vlgmr.msra.gmra.mrb[40].mxu0 %v7757_v20 }
0x5b32   :  { %v9108_v61 = vpop.f32.mrb[40].mxu0 }
0x5b33   :  { %v7853_v41 = vadd.f32 %v9108_v61, %v8103_v32  ;;  %v7847_v60 = vpop.f32.mrb[41].mxu0 }
0x5b34   :  { %v7848_v42 = vadd.f32 %v8103_v32, %v7847_v60 }
0x5b35   :  { %7857 = vst [vmem:[#allocation12 + $0x8] sm:$0xff] %v7853_v41 }
0x5b36   :  { %7856 = vst [vmem:[#allocation12] sm:$0xff] %v7848_v42 }
0x5b37   :  { %10359 = shalt.err (!%p10356_p2)
}
0x5b38   :  { %s10360_s7 = scalar_lea.hbm %s11766_s8, 256 }
0x5b39   :  { %p10361_p3 = scmp.ne.s32.totalorder %s11766_s8, %s10360_s7  ;;  %p10364_p4 = scmp.lt.u32.totalorder %s10360_s7, %s11766_s8 }
0x5b3b   :  { %p10366_p5 = pnand %p10364_p4, %p10361_p3 }
0x5b3d   :  { %10369 = shalt.err (!%p10366_p5)
}
0x5b3e   :  { %7869 = dma.vmem_to_hbm [thread:$0]  %s7864_s12, 256, %s11766_s8, [#allocation5], %s10381_s28, %s10381_s28, %s10382_s29  }
0x5b3f   :  { %10376 = dma.done.wait [#allocation5], 256  }
0x5b40   :  { %10377 = vsyncadd [#allocation5], 4294967040 }
0x5b41   :  { %7873 = vsyncpa [#allocation4], 1 }
0x5b42   :  { %7874 = vsyncpa [#allocation7], 1 }
0x5b43   :  { %7875 = vsyncpa [#allocation10], 1 }
0x5b44   :  { %7876 = vsyncpa [#allocation5], 1 }

</bundles_post_ra>
